<compile_context>
chip_gen: v7x
topology: tpu7x:2x2x1
jax: 0.10.0
libtpu: 0.0.40
codegen_flags: <defaults>
</compile_context>

<pallas_src>
from functools import partial

import jax
import jax.numpy as jnp
from jax.experimental import pallas as pl
from jax.experimental.pallas import tpu as pltpu

IN_DIM = 36 * 3     # 108
IN_PAD = 128        # feature dim zero-padded to a full lane tile
HID = 512
OUT_DIM = 1


def mlp_kernel(x_ref, w1_ref, b1_ref, w2_ref, b2_ref, w3_ref, b3_ref, o_ref):
    # fc1: (bt, 128) @ (128, 512) on the MXU, bf16 inputs, f32 accumulation.
    h1 = jnp.dot(x_ref[...], w1_ref[...], preferred_element_type=jnp.float32)
    h1 = jnp.maximum(h1 + b1_ref[...], 0.0)          # ReLU (Dropout = identity)

    # fc2: (bt, 512) @ (512, 512) on the MXU, bf16 inputs, f32 accumulation.
    h2 = jnp.dot(h1.astype(jnp.bfloat16), w2_ref[...],
                 preferred_element_type=jnp.float32)
    h2 = jnp.maximum(h2 + b2_ref[...], 0.0)

    # fc3: Linear(512 -> 1) as a VPU multiply + lane (XLU) reduction; an N=1
    # MXU matmul would waste a full 128/256-lane pass. f32 throughout.
    row = jnp.sum(h2 * w3_ref[...], axis=1)          # (bt,)

    # Lane-dense store: batch maps to the 128-lane axis; b3 broadcasts (1,1).
    o_ref[...] = (row[None, :] + b3_ref[...]).astype(o_ref.dtype)   # (1, bt)


@partial(jax.jit, static_argnames=("batch_tile",))
def mlp_forward(x, params, *, batch_tile=256):
    """x: [B, IN_DIM] float32. params: dict of w1,b1,w2,b2,w3,b3. Returns [B, 1]."""
    B, D = x.shape
    assert D == IN_DIM
    assert batch_tile % 128 == 0, "batch_tile must be a multiple of 128"

    n_tiles = pl.cdiv(B, batch_tile)
    B_pad = n_tiles * batch_tile

    # Zero-pad batch to a tile multiple and features 108 -> 128; cast MXU
    # operands to bf16 (f32 accumulation keeps accuracy).
    x_p = jnp.pad(x.astype(jnp.bfloat16),
                  ((0, B_pad - B), (0, IN_PAD - IN_DIM)))
    w1 = jnp.pad(params["w1"].astype(jnp.bfloat16),
                 ((0, IN_PAD - IN_DIM), (0, 0)))              # (128, 512) bf16
    b1 = params["b1"].reshape(1, HID)                          # (1, 512) f32
    w2 = params["w2"].astype(jnp.bfloat16)                     # (512, 512) bf16
    b2 = params["b2"].reshape(1, HID)                          # (1, 512) f32
    w3 = params["w3"].reshape(1, HID)                          # (1, 512) f32 row
    b3 = params["b3"].reshape(1, 1)                            # (1, 1) f32

    full = lambda shape: pl.BlockSpec(shape, lambda i: (0, 0))

    out = pl.pallas_call(
        mlp_kernel,
        out_shape=jax.ShapeDtypeStruct((1, B_pad), jnp.float32),
        grid_spec=pltpu.PrefetchScalarGridSpec(
            num_scalar_prefetch=0,
            grid=(n_tiles,),
            in_specs=[
                pl.BlockSpec((batch_tile, IN_PAD), lambda i: (i, 0)),  # x tile
                full((IN_PAD, HID)),   # w1 (VMEM-resident across grid)
                full((1, HID)),        # b1
                full((HID, HID)),      # w2
                full((1, HID)),        # b2
                full((1, HID)),        # w3 (row vector for VPU broadcast)
                full((1, 1)),          # b3 (scalar as (1,1) VMEM block)
            ],
            out_specs=pl.BlockSpec((1, batch_tile), lambda i: (0, i)),
        ),
        compiler_params=pltpu.CompilerParams(
            dimension_semantics=("parallel",)),
    )(x_p, w1, b1, w2, b2, w3, b3)

    # Strip padding, restore PyTorch's [B, 1] output shape.
    return out[0, :B].reshape(B, OUT_DIM)


def init_params(key):
    """Deterministic init mimicking nn.Linear's uniform(-1/sqrt(fan_in), ...)."""
    ks = jax.random.split(key, 6)

    def lin(kw, kb, fan_in, fan_out):
        bound = 1.0 / jnp.sqrt(fan_in)
        w = jax.random.uniform(kw, (fan_in, fan_out), jnp.float32, -bound, bound)
        b = jax.random.uniform(kb, (1, fan_out), jnp.float32, -bound, bound)
        return w, b

    w1, b1 = lin(ks[0], ks[1], IN_DIM, HID)
    w2, b2 = lin(ks[2], ks[3], HID, HID)
    w3, b3 = lin(ks[4], ks[5], HID, OUT_DIM)
    return {"w1": w1, "b1": b1, "w2": w2, "b2": b2, "w3": w3, "b3": b3}


def mlp_ref(x, p):
    """Pure-JAX reference with matching precision (bf16 MXU inputs, f32 accum)."""
    h1 = jnp.maximum(
        jnp.dot(x.astype(jnp.bfloat16), p["w1"].astype(jnp.bfloat16),
                preferred_element_type=jnp.float32) + p["b1"], 0.0)
    h2 = jnp.maximum(
        jnp.dot(h1.astype(jnp.bfloat16), p["w2"].astype(jnp.bfloat16),
                preferred_element_type=jnp.float32) + p["b2"], 0.0)
    return jnp.sum(h2 * p["w3"].reshape(1, HID), axis=1, keepdims=True) \
        + p["b3"].reshape(1, 1)


if __name__ == "__main__":
    key = jax.random.PRNGKey(0)
    k_param, k_x1, k_x2 = jax.random.split(key, 3)
    params = init_params(k_param)

    # Ragged batch: exercises batch padding (300 -> 512) and a 2-step grid.
    x1 = jax.random.normal(k_x1, (300, IN_DIM), jnp.float32)
    out1 = jax.block_until_ready(mlp_forward(x1, params, batch_tile=256))
    ref1 = mlp_ref(x1, params)
    assert out1.shape == (300, OUT_DIM)
    assert jnp.allclose(out1, ref1, atol=2e-3, rtol=2e-3), \
        float(jnp.max(jnp.abs(out1 - ref1)))

    # Small batch: whole batch fits in a single padded tile.
    x2 = jax.random.normal(k_x2, (16, IN_DIM), jnp.float32)
    out2 = jax.block_until_ready(mlp_forward(x2, params))
    ref2 = mlp_ref(x2, params)
    assert out2.shape == (16, OUT_DIM)
    assert jnp.allclose(out2, ref2, atol=2e-3, rtol=2e-3)

    print("KERNEL_OK")
</pallas_src>

<mosaic_0001>
module attributes {stable_mosaic.version = 11 : i64} {
  func.func @mlp_kernel(%arg0: i32, %arg1: memref<256x128xbf16, #tpu.memory_space<vmem>>, %arg2: memref<128x512xbf16, #tpu.memory_space<vmem>>, %arg3: memref<1x512xf32, #tpu.memory_space<vmem>>, %arg4: memref<512x512xbf16, #tpu.memory_space<vmem>>, %arg5: memref<1x512xf32, #tpu.memory_space<vmem>>, %arg6: memref<1x512xf32, #tpu.memory_space<vmem>>, %arg7: memref<1x1xf32, #tpu.memory_space<vmem>>, %arg8: memref<1x256xf32, #tpu.memory_space<vmem>>) attributes {dimension_semantics = [#tpu.dimension_semantics<parallel>], iteration_bounds = array<i64: 2>, scalar_prefetch = 0 : i64, scratch_operands = 0 : i64, tpu.core_type = #tpu.core_type<tc>, window_params = [{transform_indices = @transform_0, window_bounds = array<i64: 256, 128>}, {pipeline_mode = #tpu.pipeline_mode<synchronous>, transform_indices = @transform_1, window_bounds = array<i64: 128, 512>}, {pipeline_mode = #tpu.pipeline_mode<synchronous>, transform_indices = @transform_2, window_bounds = array<i64: 1, 512>}, {pipeline_mode = #tpu.pipeline_mode<synchronous>, transform_indices = @transform_3, window_bounds = array<i64: 512, 512>}, {pipeline_mode = #tpu.pipeline_mode<synchronous>, transform_indices = @transform_4, window_bounds = array<i64: 1, 512>}, {pipeline_mode = #tpu.pipeline_mode<synchronous>, transform_indices = @transform_5, window_bounds = array<i64: 1, 512>}, {pipeline_mode = #tpu.pipeline_mode<synchronous>, transform_indices = @transform_6, window_bounds = array<i64: 1, 1>}, {transform_indices = @transform_7, window_bounds = array<i64: 1, 256>}]} {
    %c0 = arith.constant 0 : index
    %c0_0 = arith.constant 0 : index
    %0 = vector.load %arg1[%c0, %c0_0] : memref<256x128xbf16, #tpu.memory_space<vmem>>, vector<256x128xbf16>
    %c0_1 = arith.constant 0 : index
    %c0_2 = arith.constant 0 : index
    %1 = vector.load %arg2[%c0_1, %c0_2] : memref<128x512xbf16, #tpu.memory_space<vmem>>, vector<128x512xbf16>
    %cst = arith.constant dense<0.000000e+00> : vector<256x512xf32>
    %2 = tpu.matmul %0, %1, %cst {dimension_numbers = #tpu.dot_dimension_numbers<[1], [0], [0], [1], [0, 0, 1, 1], [], []>} : vector<256x128xbf16>, vector<128x512xbf16>, vector<256x512xf32> -> vector<256x512xf32>
    %c0_3 = arith.constant 0 : index
    %c0_4 = arith.constant 0 : index
    %3 = vector.load %arg3[%c0_3, %c0_4] : memref<1x512xf32, #tpu.memory_space<vmem>>, vector<1x512xf32>
    %4 = vector.broadcast %3 : vector<1x512xf32> to vector<256x512xf32>
    %5 = arith.addf %2, %4 : vector<256x512xf32>
    %cst_5 = arith.constant 0.000000e+00 : f32
    %6 = vector.broadcast %cst_5 : f32 to vector<256x512xf32>
    %7 = arith.maximumf %5, %6 : vector<256x512xf32>
    %8 = arith.truncf %7 : vector<256x512xf32> to vector<256x512xbf16>
    %c0_6 = arith.constant 0 : index
    %c0_7 = arith.constant 0 : index
    %9 = vector.load %arg4[%c0_6, %c0_7] : memref<512x512xbf16, #tpu.memory_space<vmem>>, vector<512x512xbf16>
    %cst_8 = arith.constant dense<0.000000e+00> : vector<256x512xf32>
    %10 = tpu.matmul %8, %9, %cst_8 {dimension_numbers = #tpu.dot_dimension_numbers<[1], [0], [0], [1], [0, 0, 1, 1], [], []>} : vector<256x512xbf16>, vector<512x512xbf16>, vector<256x512xf32> -> vector<256x512xf32>
    %c0_9 = arith.constant 0 : index
    %c0_10 = arith.constant 0 : index
    %11 = vector.load %arg5[%c0_9, %c0_10] : memref<1x512xf32, #tpu.memory_space<vmem>>, vector<1x512xf32>
    %12 = vector.broadcast %11 : vector<1x512xf32> to vector<256x512xf32>
    %13 = arith.addf %10, %12 : vector<256x512xf32>
    %cst_11 = arith.constant 0.000000e+00 : f32
    %14 = vector.broadcast %cst_11 : f32 to vector<256x512xf32>
    %15 = arith.maximumf %13, %14 : vector<256x512xf32>
    %c0_12 = arith.constant 0 : index
    %c0_13 = arith.constant 0 : index
    %16 = vector.load %arg6[%c0_12, %c0_13] : memref<1x512xf32, #tpu.memory_space<vmem>>, vector<1x512xf32>
    %17 = vector.broadcast %16 : vector<1x512xf32> to vector<256x512xf32>
    %18 = arith.mulf %15, %17 : vector<256x512xf32>
    %cst_14 = arith.constant dense<0.000000e+00> : vector<256xf32>
    %19 = vector.multi_reduction <add>, %18, %cst_14 [1] : vector<256x512xf32> to vector<256xf32>
    %20 = vector.shape_cast %19 : vector<256xf32> to vector<1x256xf32>
    %c0_15 = arith.constant 0 : index
    %c0_16 = arith.constant 0 : index
    %21 = vector.load %arg7[%c0_15, %c0_16] : memref<1x1xf32, #tpu.memory_space<vmem>>, vector<1x1xf32>
    %22 = vector.broadcast %21 : vector<1x1xf32> to vector<1x256xf32>
    %23 = arith.addf %20, %22 : vector<1x256xf32>
    %c0_17 = arith.constant 0 : index
    %c0_18 = arith.constant 0 : index
    %24 = vector.load %arg8[%c0_17, %c0_18] : memref<1x256xf32, #tpu.memory_space<vmem>>, vector<1x256xf32>
    tpu.vector_store %arg8[%c0_17, %c0_18], %23 {strides = array<i32>} : memref<1x256xf32, #tpu.memory_space<vmem>>, vector<1x256xf32>,
    return
  }
  func.func @transform_0(%arg0: i32) -> (i32, i32) {
    %c0_i32 = arith.constant 0 : i32
    %c0_i32_0 = arith.constant 0 : i32
    return %arg0, %c0_i32 : i32, i32
  }
  func.func @transform_1(%arg0: i32) -> (i32, i32) {
    %c0_i32 = arith.constant 0 : i32
    %c0_i32_0 = arith.constant 0 : i32
    %c0_i32_1 = arith.constant 0 : i32
    return %c0_i32, %c0_i32_0 : i32, i32
  }
  func.func @transform_2(%arg0: i32) -> (i32, i32) {
    %c0_i32 = arith.constant 0 : i32
    %c0_i32_0 = arith.constant 0 : i32
    %c0_i32_1 = arith.constant 0 : i32
    return %c0_i32, %c0_i32_0 : i32, i32
  }
  func.func @transform_3(%arg0: i32) -> (i32, i32) {
    %c0_i32 = arith.constant 0 : i32
    %c0_i32_0 = arith.constant 0 : i32
    %c0_i32_1 = arith.constant 0 : i32
    return %c0_i32, %c0_i32_0 : i32, i32
  }
  func.func @transform_4(%arg0: i32) -> (i32, i32) {
    %c0_i32 = arith.constant 0 : i32
    %c0_i32_0 = arith.constant 0 : i32
    %c0_i32_1 = arith.constant 0 : i32
    return %c0_i32, %c0_i32_0 : i32, i32
  }
  func.func @transform_5(%arg0: i32) -> (i32, i32) {
    %c0_i32 = arith.constant 0 : i32
    %c0_i32_0 = arith.constant 0 : i32
    %c0_i32_1 = arith.constant 0 : i32
    return %c0_i32, %c0_i32_0 : i32, i32
  }
  func.func @transform_6(%arg0: i32) -> (i32, i32) {
    %c0_i32 = arith.constant 0 : i32
    %c0_i32_0 = arith.constant 0 : i32
    %c0_i32_1 = arith.constant 0 : i32
    return %c0_i32, %c0_i32_0 : i32, i32
  }
  func.func @transform_7(%arg0: i32) -> (i32, i32) {
    %c0_i32 = arith.constant 0 : i32
    %c0_i32_0 = arith.constant 0 : i32
    return %c0_i32, %arg0 : i32, i32
  }
}

</mosaic_0001>

<bundles_post_ra>
// kernel: mlp_forward.1
= control target key start
LH: loop header
LB: loop body
LE: loop exit
PB: predicated region body
PF: predicated region fallthrough
CT: control target
= control target key end

     0   :  { %s6989_s26 = smov 0   ;;  %s8993_s0 = inlined_call_operand.vmem [shape: bf16[512,128], index: 0, kind: input, shape index: {}]   ;;  %s8994_s1 = inlined_call_operand.vmem [shape: bf16[128,512], index: 1, kind: input, shape index: {}]   ;;  %s8995_s2 = inlined_call_operand.vmem [shape: f32[1,512], index: 2, kind: input, shape index: {}]   ;;  %s8996_s3 = inlined_call_operand.vmem [shape: bf16[512,512], index: 3, kind: input, shape index: {}]   ;;  %s8997_s4 = inlined_call_operand.vmem [shape: f32[1,512], index: 4, kind: input, shape index: {}]   ;;  %s8998_s5 = inlined_call_operand.vmem [shape: f32[1,512], index: 5, kind: input, shape index: {}]   ;;  %s8999_s6 = inlined_call_operand.<no memory space> [shape: f32[1,1], index: 6, kind: input, shape index: {}]   ;;  %s9000_s7 = inlined_call_operand.vmem [shape: f32[1,512], index: 7, kind: output, shape index: {}]  }
   0x1   :  { %v12_v0 = vstv %s8999_s6 }
   0x2   :  { %13 = vst [vmem:[#allocation2] sm:$0x1] %v12_v0 }
   0x3 LB: > { %s6226_s27 = sadd.s32 4294967295, %s6942_s26   ;;  %p6230_p0 = scmp.ge.s32.totalorder %s6942_s26, 1  ;;  %s6942_s26 = sphi %s6989_s26, %s19_s26  }
   0x4   : > { %p240_p1 = scmp.lt.s32.totalorder %s6942_s26, 3 }
   0x6   : > { %p241_p2 = pnand %p6230_p0, %p240_p1 }
   0x7   : > { %v6680_v1 = vld [vmem:[%s8994_s1 + $0x4] ss:$16 sps:$4 sm:$0xff] (!%p241_p2)   ;;  %s6231_s6 = sshll.u32 (!%p241_p2), %s6226_s27, 5  ;;  %v6682_v2 = vld [vmem:[%s8994_s1] ss:$16 sps:$4 sm:$0xff] (!%p241_p2)   ;;  %v6944_v3 = vmov (!%p241_p2), 0  }
   0x8   : > { %244 = sbr.rel (%p241_p2) target bundleno = 1083 (0x43b), region = 48  ;;  %657 = vmatprep.mubr.bf16.mxu0 (!%p241_p2), %v6944_v3  ;;  %p272_p3 = scmp.lt.s32.totalorder (!%p241_p2), %s6231_s6, 63  ;;  %850 = vmatprep.mubr.bf16.mxu1 (!%p241_p2), %v6944_v3  ;;  %v6683_v4 = vld [vmem:[%s8994_s1 + $0x24] ss:$16 sps:$4 sm:$0xff] (!%p241_p2)   ;;  %v6685_v5 = vld [vmem:[%s8994_s1 + $0x20] ss:$16 sps:$4 sm:$0xff] (!%p241_p2)  }
   0x9   : > { %625 = vmatprep.subr.bf16.mxu0 (!%p241_p2), %v6680_v1  ;;  %6678 = vset.pattern.permute.xlu1 (!%p241_p2), %v6944_v3  ;;  %v6686_v6 = vld [vmem:[%s8994_s1 + $0x44] ss:$16 sps:$4 sm:$0xff] (!%p241_p2)   ;;  %v6688_v7 = vld [vmem:[%s8994_s1 + $0x40] ss:$16 sps:$4 sm:$0xff] (!%p241_p2)   ;;  %v6712_v14 = vld [vmem:[%s8994_s1 + $0xc] ss:$16 sps:$4 sm:$0xff] (!%p241_p2)  }
   0xa   : > { %626 = vmatpush1.bf16.msra.mxu0 (!%p241_p2), %v6682_v2  ;;  %6679 = vset.pattern.permute.xlu0 (!%p241_p2), %v6944_v3  ;;  %v6689_v8 = vld [vmem:[%s8994_s1 + $0x64] ss:$16 sps:$4 sm:$0xff] (!%p241_p2)   ;;  %v6691_v9 = vld [vmem:[%s8994_s1 + $0x60] ss:$16 sps:$4 sm:$0xff] (!%p241_p2)   ;;  %v6714_v15 = vld [vmem:[%s8994_s1 + $0x8] ss:$16 sps:$4 sm:$0xff] (!%p241_p2)  }
   0xb   : > { %627 = vmatprep.subr.bf16.mxu0 (!%p241_p2), %v6683_v4  ;;  %v6692_v10 = vld [vmem:[%s8994_s1 + $0x84] ss:$16 sps:$4 sm:$0xff] (!%p241_p2)   ;;  %v6694_v11 = vld [vmem:[%s8994_s1 + $0x80] ss:$16 sps:$4 sm:$0xff] (!%p241_p2)   ;;  %818 = vmatprep.subr.bf16.mxu1 (!%p241_p2), %v6712_v14  ;;  %v6716_v17 = vld [vmem:[%s8994_s1 + $0x2c] ss:$16 sps:$4 sm:$0xff] (!%p241_p2)  }
   0xc   : > { %v6695_v12 = vld [vmem:[%s8994_s1 + $0xa4] ss:$16 sps:$4 sm:$0xff] (!%p241_p2)   ;;  %v6697_v13 = vld [vmem:[%s8994_s1 + $0xa0] ss:$16 sps:$4 sm:$0xff] (!%p241_p2)   ;;  %819 = vmatpush1.bf16.msra.mxu1 (!%p241_p2), %v6714_v15  ;;  %v6718_v18 = vld [vmem:[%s8994_s1 + $0x28] ss:$16 sps:$4 sm:$0xff] (!%p241_p2)  }
   0xd   : > { %v6698_v16 = vld [vmem:[%s8994_s1 + $0xc4] ss:$16 sps:$4 sm:$0xff] (!%p241_p2)   ;;  %v6700_v19 = vld [vmem:[%s8994_s1 + $0xc0] ss:$16 sps:$4 sm:$0xff] (!%p241_p2)   ;;  %820 = vmatprep.subr.bf16.mxu1 (!%p241_p2), %v6716_v17  ;;  %v6719_v20 = vld [vmem:[%s8994_s1 + $0x4c] ss:$16 sps:$4 sm:$0xff] (!%p241_p2)  }
   0xe   : > { %628 = vmatpush1.bf16.msra.mxu0 (!%p241_p2), %v6685_v5  ;;  %v6701_v21 = vld [vmem:[%s8994_s1 + $0xe4] ss:$16 sps:$4 sm:$0xff] (!%p241_p2)   ;;  %v6703_v22 = vld [vmem:[%s8994_s1 + $0xe0] ss:$16 sps:$4 sm:$0xff] (!%p241_p2)   ;;  %v6721_v23 = vld [vmem:[%s8994_s1 + $0x48] ss:$16 sps:$4 sm:$0xff] (!%p241_p2)  }
   0xf   : > { %s9002_s6 = smov (!%p272_p3, %s6231_s6), 63  ;;  %629 = vmatprep.subr.bf16.mxu0 %v6686_v6  ;;  %v6723_v24 = vld [vmem:[%s8994_s1 + $0x6c] ss:$16 sps:$4 sm:$0xff]   ;;  %v6725_v26 = vld [vmem:[%s8994_s1 + $0x68] ss:$16 sps:$4 sm:$0xff]   ;;  %vm5976_vm0 = vcmask 130112  }
  0x10   : > { %s6232_s15 = sshll.u32 %s9002_s6, 2  ;;  %821 = vmatpush1.bf16.msra.mxu1 %v6718_v18  ;;  %v6726_v27 = vld [vmem:[%s8994_s1 + $0x8c] ss:$16 sps:$4 sm:$0xff]   ;;  %v6728_v28 = vld [vmem:[%s8994_s1 + $0x88] ss:$16 sps:$4 sm:$0xff]   ;;  %vm5983_vm1 = vcmask 195712  }
  0x11   : > { %s7027_s22 = scalar_lea.vmem %s8993_s0, %s6232_s15  ;;  %822 = vmatprep.subr.bf16.mxu1 %v6719_v20  ;;  %v6740_v29 = vld [vmem:[%s8996_s3] ss:$16 sps:$4 sm:$0xff]   ;;  %v6742_v30 = vld [vmem:[%s8996_s3 + $0x4] ss:$16 sps:$4 sm:$0xff]   ;;  %v6730_v31 = vld [vmem:[%s8994_s1 + $0xac] ss:$16 sps:$4 sm:$0xff]  }
  0x12   : > { %630 = vmatpush1.bf16.msra.mxu0 %v6688_v7  ;;  %v6704_v25 = vld [vmem:[%s7027_s22] sm:$0xff]   ;;  %v6705_v32 = vld [vmem:[%s7027_s22 + $0x8] sm:$0xff]   ;;  %v6706_v41 = vld [vmem:[%s7027_s22 + $0x10] sm:$0xff]   ;;  %vm5990_vm2 = vcmask 261312   ;;  %vm5997_vm3 = vcmask 326912   ;;  %vm6004_vm4 = vcmask 392512  }
  0x13   : > { %631 = vmatprep.subr.bf16.mxu0 %v6689_v8  ;;  %v6732_v33 = vld [vmem:[%s8994_s1 + $0xa8] ss:$16 sps:$4 sm:$0xff]   ;;  %v6747_v34 = vld [vmem:[%s8996_s3 + $0x20] ss:$16 sps:$4 sm:$0xff]   ;;  %v6749_v35 = vld [vmem:[%s8996_s3 + $0x24] ss:$16 sps:$4 sm:$0xff]  }
  0x14   : > { %823 = vmatpush1.bf16.msra.mxu1 %v6721_v23  ;;  %v6733_v36 = vld [vmem:[%s8994_s1 + $0xcc] ss:$16 sps:$4 sm:$0xff]   ;;  %v6754_v37 = vld [vmem:[%s8996_s3 + $0x40] ss:$16 sps:$4 sm:$0xff]   ;;  %v6756_v38 = vld [vmem:[%s8996_s3 + $0x44] ss:$16 sps:$4 sm:$0xff]  }
  0x15   : > { %824 = vmatprep.subr.bf16.mxu1 %v6723_v24  ;;  %v6735_v39 = vld [vmem:[%s8994_s1 + $0xc8] ss:$16 sps:$4 sm:$0xff]   ;;  %v6737_v40 = vld [vmem:[%s8994_s1 + $0xec] ss:$16 sps:$4 sm:$0xff]   ;;  %v6761_v42 = vld [vmem:[%s8996_s3 + $0x60] ss:$16 sps:$4 sm:$0xff]  }
  0x16   : > { %632 = vmatpush1.bf16.msra.mxu0 %v6691_v9  ;;  %v6763_v43 = vld [vmem:[%s8996_s3 + $0x64] ss:$16 sps:$4 sm:$0xff]   ;;  %v6739_v44 = vld [vmem:[%s8994_s1 + $0xe8] ss:$16 sps:$4 sm:$0xff]   ;;  %v6746_v45 = vld [vmem:[%s8996_s3 + $0xc] ss:$16 sps:$4 sm:$0xff]  }
  0x17   : > { %633 = vmatprep.subr.bf16.mxu0 %v6692_v10  ;;  %v6768_v46 = vld [vmem:[%s8996_s3 + $0x80] ss:$16 sps:$4 sm:$0xff]   ;;  %v6770_v47 = vld [vmem:[%s8996_s3 + $0x84] ss:$16 sps:$4 sm:$0xff]   ;;  %v6744_v48 = vld [vmem:[%s8996_s3 + $0x8] ss:$16 sps:$4 sm:$0xff]  }
  0x18   : > { %825 = vmatpush1.bf16.msra.mxu1 %v6725_v26  ;;  %v6753_v49 = vld [vmem:[%s8996_s3 + $0x2c] ss:$16 sps:$4 sm:$0xff]   ;;  %v6776_v50 = vld [vmem:[%s8996_s3 + $0xa4] ss:$16 sps:$4 sm:$0xff]   ;;  %v6774_v51 = vld [vmem:[%s8996_s3 + $0xa0] ss:$16 sps:$4 sm:$0xff]  }
  0x19   : > { %826 = vmatprep.subr.bf16.mxu1 %v6726_v27  ;;  %v6707_v52 = vld [vmem:[%s7027_s22 + $0x18] sm:$0xff]   ;;  %v6782_v55 = vld [vmem:[%s8996_s3 + $0xc4] ss:$16 sps:$4 sm:$0xff]   ;;  %v6780_v56 = vld [vmem:[%s8996_s3 + $0xc0] ss:$16 sps:$4 sm:$0xff]   ;;  %vm6011_vm5 = vcmask 458112  }
  0x1a   : > { %634 = vmatpush1.bf16.msra.mxu0 %v6694_v11  ;;  %v6751_v53 = vld [vmem:[%s8996_s3 + $0x28] ss:$16 sps:$4 sm:$0xff]   ;;  %v6760_v54 = vld [vmem:[%s8996_s3 + $0x4c] ss:$16 sps:$4 sm:$0xff]   ;;  %v6788_v59 = vld [vmem:[%s8996_s3 + $0xe4] ss:$16 sps:$4 sm:$0xff]  }
  0x1b   : > { %635 = vmatprep.subr.bf16.mxu0 %v6695_v12  ;;  %v6758_v57 = vld [vmem:[%s8996_s3 + $0x48] ss:$16 sps:$4 sm:$0xff]   ;;  %v6767_v58 = vld [vmem:[%s8996_s3 + $0x6c] ss:$16 sps:$4 sm:$0xff]   ;;  %v6786_v60 = vld [vmem:[%s8996_s3 + $0xe0] ss:$16 sps:$4 sm:$0xff]  }
  0x1c   : > { %827 = vmatpush1.bf16.msra.mxu1 %v6728_v28  ;;  %v6708_v61 = vld [vmem:[%s7027_s22 + $0x20] sm:$0xff]   ;;  %v6765_v62 = vld [vmem:[%s8996_s3 + $0x68] ss:$16 sps:$4 sm:$0xff]   ;;  %v6773_v63 = vld [vmem:[%s8996_s3 + $0x8c] ss:$16 sps:$4 sm:$0xff]   ;;  %vm6018_vm6 = vcmask 523712  }
  0x1d   : > { %828 = vmatprep.subr.bf16.mxu1 %v6730_v31  ;;  %v6794_v0 = vld [vmem:[%s8996_s3 + $0x104] ss:$16 sps:$4 sm:$0xff]   ;;  %v6792_v1 = vld [vmem:[%s8996_s3 + $0x100] ss:$16 sps:$4 sm:$0xff]   ;;  %v6771_v2 = vld [vmem:[%s8996_s3 + $0x88] ss:$16 sps:$4 sm:$0xff]  }
  0x1e   : > { %636 = vmatpush1.bf16.msra.mxu0 %v6697_v13  ;;  %v6779_v4 = vld [vmem:[%s8996_s3 + $0xac] ss:$16 sps:$4 sm:$0xff]   ;;  %v6800_v5 = vld [vmem:[%s8996_s3 + $0x124] ss:$16 sps:$4 sm:$0xff]   ;;  %v6798_v6 = vld [vmem:[%s8996_s3 + $0x120] ss:$16 sps:$4 sm:$0xff]  }
  0x1f   : > { %637 = vmatprep.subr.bf16.mxu0 %v6698_v16  ;;  %v6709_v7 = vld [vmem:[%s7027_s22 + $0x28] sm:$0xff]   ;;  %v6806_v10 = vld [vmem:[%s8996_s3 + $0x144] ss:$16 sps:$4 sm:$0xff]   ;;  %v6804_v11 = vld [vmem:[%s8996_s3 + $0x140] ss:$16 sps:$4 sm:$0xff]   ;;  %vm6025_vm7 = vcmask 589312  }
  0x20   : > { %829 = vmatpush1.bf16.msra.mxu1 %v6732_v33  ;;  %v6777_v8 = vld [vmem:[%s8996_s3 + $0xa8] ss:$16 sps:$4 sm:$0xff]   ;;  %v6785_v9 = vld [vmem:[%s8996_s3 + $0xcc] ss:$16 sps:$4 sm:$0xff]   ;;  %v6812_v14 = vld [vmem:[%s8996_s3 + $0x164] ss:$16 sps:$4 sm:$0xff]  }
  0x21   : > { %830 = vmatprep.subr.bf16.mxu1 %v6733_v36  ;;  %v6783_v12 = vld [vmem:[%s8996_s3 + $0xc8] ss:$16 sps:$4 sm:$0xff]   ;;  %v6791_v13 = vld [vmem:[%s8996_s3 + $0xec] ss:$16 sps:$4 sm:$0xff]   ;;  %v6710_v15 = vld [vmem:[%s7027_s22 + $0x30] sm:$0xff]   ;;  %vm6032_vm8 = vcmask 654912  }
  0x22   : > { %638 = vmatpush1.bf16.msra.mxu0 %v6700_v19  ;;  %v6789_v16 = vld [vmem:[%s8996_s3 + $0xe8] ss:$16 sps:$4 sm:$0xff]   ;;  %v6797_v17 = vld [vmem:[%s8996_s3 + $0x10c] ss:$16 sps:$4 sm:$0xff]   ;;  %v6810_v18 = vld [vmem:[%s8996_s3 + $0x160] ss:$16 sps:$4 sm:$0xff]  }
  0x23   : > { %639 = vmatprep.subr.bf16.mxu0 %v6701_v21  ;;  %v6818_v19 = vld [vmem:[%s8996_s3 + $0x184] ss:$16 sps:$4 sm:$0xff]   ;;  %v6816_v20 = vld [vmem:[%s8996_s3 + $0x180] ss:$16 sps:$4 sm:$0xff]   ;;  %v6795_v21 = vld [vmem:[%s8996_s3 + $0x108] ss:$16 sps:$4 sm:$0xff]  }
  0x24   : > { %831 = vmatpush1.bf16.msra.mxu1 %v6735_v39  ;;  %v6824_v23 = vld [vmem:[%s8996_s3 + $0x1a4] ss:$16 sps:$4 sm:$0xff]   ;;  %v6822_v24 = vld [vmem:[%s8996_s3 + $0x1a0] ss:$16 sps:$4 sm:$0xff]   ;;  %v6801_v26 = vld [vmem:[%s8996_s3 + $0x128] ss:$16 sps:$4 sm:$0xff]  }
  0x25   : > { %832 = vmatprep.subr.bf16.mxu1 %v6737_v40  ;;  %v6809_v27 = vld [vmem:[%s8996_s3 + $0x14c] ss:$16 sps:$4 sm:$0xff]   ;;  %v6830_v28 = vld [vmem:[%s8996_s3 + $0x1c4] ss:$16 sps:$4 sm:$0xff]   ;;  %v6813_v33 = vld [vmem:[%s8996_s3 + $0x168] ss:$16 sps:$4 sm:$0xff]  }
  0x26   : > { %640 = vmatpush1.bf16.msra.mxu0 %v6703_v22  ;;  %v6803_v22 = vld [vmem:[%s8996_s3 + $0x12c] ss:$16 sps:$4 sm:$0xff]   ;;  %v6831_v40 = vld [vmem:[%s8996_s3 + $0x1c8] ss:$16 sps:$4 sm:$0xff]   ;;  %vm6039_vm9 = vcmask 720512   ;;  %vm6046_vm10 = vcmask 786112  }
  0x27   : > { %1993 = vmatprep.subr.bf16.mxu0 %v6742_v30  ;;  %v6807_v30 = vld [vmem:[%s8996_s3 + $0x148] ss:$16 sps:$4 sm:$0xff]   ;;  %v6815_v31 = vld [vmem:[%s8996_s3 + $0x16c] ss:$16 sps:$4 sm:$0xff]   ;;  %vm6053_vm11 = vcmask 851712   ;;  %vm6060_vm12 = vcmask 917312  }
  0x28   : > { %833 = vmatpush1.bf16.msra.mxu1 %v6739_v44  ;;  %v6827_v36 = vld [vmem:[%s8996_s3 + $0x1ac] ss:$16 sps:$4 sm:$0xff]   ;;  %s6233_s13 = sshll.u32 %s6226_s27, 1  ;;  %vm6067_vm13 = vcmask 982912   ;;  %vm6074_vm14 = vcmask 1048512  }
  0x29   : > { %658 = vmatmul.mubr.bf16.vlgmr.msra.gmra.mrb[0].mxu0 %v6704_v25  ;;  %2379 = vmatprep.subr.bf16.mxu1 %v6746_v45  ;;  %v6833_v39 = vld [vmem:[%s8996_s3 + $0x1cc] ss:$16 sps:$4 sm:$0xff]   ;;  %v6834_v45 = vld [vmem:[%s8996_s3 + $0x1e0] ss:$16 sps:$4 sm:$0xff]   ;;  %p278_p4 = scmp.lt.s32.totalorder %s6233_s13, 3 }
  0x2a   : > { %667 = vmatprep.mubr.bf16.mxu0 %v6944_v3  ;;  %1994 = vmatpush1.bf16.msra.mxu0 %v6740_v29  ;;  %v6828_v29 = vld [vmem:[%s8996_s3 + $0x1c0] ss:$16 sps:$4 sm:$0xff]   ;;  %v6839_v44 = vld [vmem:[%s8996_s3 + $0x1ec] ss:$16 sps:$4 sm:$0xff]  }
  0x2b   : > { %1995 = vmatprep.subr.bf16.mxu0 %v6749_v35  ;;  %851 = vmatmul.mubr.bf16.vlgmr.msra.gmra.mrb[0].mxu1 %v6704_v25  ;;  %v6711_v25 = vld [vmem:[%s7027_s22 + $0x38] sm:$0xff]   ;;  %s9004_s13 = smov (!%p278_p4, %s6233_s13), 3 }
  0x2c   : > { %2380 = vmatpush1.bf16.msra.mxu1 %v6744_v48  ;;  %860 = vmatprep.mubr.bf16.mxu1 %v6944_v3  ;;  %v6819_v35 = vld [vmem:[%s8996_s3 + $0x188] ss:$16 sps:$4 sm:$0xff]   ;;  %v6842_v48 = vld [vmem:[%s8996_s3 + $0x204] ss:$16 sps:$4 sm:$0xff]   ;;  %s280_s15 = scalar_lea.vmem %s9000_s7, %s9004_s13 }
  0x2d   : > { %2381 = vmatprep.subr.bf16.mxu1 %v6753_v49  ;;  %v6845_v49 = vld [vmem:[%s8996_s3 + $0x20c] ss:$16 sps:$4 sm:$0xff]  }
  0x2e   : > { %1996 = vmatpush1.bf16.msra.mxu0 %v6747_v34  ;;  %v6821_v34 = vld [vmem:[%s8996_s3 + $0x18c] ss:$16 sps:$4 sm:$0xff]  }
  0x2f   : > { %1997 = vmatprep.subr.bf16.mxu0 %v6756_v38  ;;  %v6825_v38 = vld [vmem:[%s8996_s3 + $0x1a8] ss:$16 sps:$4 sm:$0xff]  }
  0x30   : > { %2382 = vmatpush1.bf16.msra.mxu1 %v6751_v53  ;;  %v349_v53 = vlaneseq }
  0x31   : > { %668 = vmatmul.mubr.bf16.gmra.mrb[4].mxu0 %v6705_v32  ;;  %2383 = vmatprep.subr.bf16.mxu1 %v6760_v54 }
  0x32   : > { %677 = vmatprep.mubr.bf16.mxu0 %v6944_v3  ;;  %1998 = vmatpush1.bf16.msra.mxu0 %v6754_v37  ;;  %v6722_v37 = vld [vmem:[%s7027_s22 + $0x48] sm:$0xff]   ;;  %v7349_v54 = vshrl.u32 %v349_v53, 7  ;;  %vm6173_vm15 = vcmp.lt.s32.totalorder %v349_v53, 256 }
  0x33   : > { %1999 = vmatprep.subr.bf16.mxu0 %v6763_v43  ;;  %861 = vmatmul.mubr.bf16.gmra.mrb[4].mxu1 %v6705_v32  ;;  %v6715_v32 = vld [vmem:[%s7027_s22 + $0x40] sm:$0xff]  }
  0x34   : > { %870 = vmatprep.mubr.bf16.mxu1 %v6944_v3  ;;  %2384 = vmatpush1.bf16.msra.mxu1 %v6758_v57  ;;  %v6836_v43 = vld [vmem:[%s8996_s3 + $0x1e4] ss:$16 sps:$4 sm:$0xff]   ;;  %v7358_v57 = vsub.s32 1, %v7349_v54 }
  0x35   : > { %2385 = vmatprep.subr.bf16.mxu1 %v6767_v58 }
  0x36   : > { %2000 = vmatpush1.bf16.msra.mxu0 %v6761_v42  ;;  %v6736_v42 = vld [vmem:[%s7027_s22 + $0x58] sm:$0xff]  }
  0x37   : > { %2001 = vmatprep.subr.bf16.mxu0 %v6770_v47  ;;  %v6743_v47 = vld [vmem:[%s7027_s22 + $0x60] sm:$0xff]  }
  0x38   : > { %2386 = vmatpush1.bf16.msra.mxu1 %v6765_v62 }
  0x39   : > { %678 = vmatmul.mubr.bf16.gmra.mrb[8].mxu0 %v6706_v41  ;;  %2387 = vmatprep.subr.bf16.mxu1 %v6773_v63 }
  0x3a   : > { %687 = vmatprep.mubr.bf16.mxu0 %v6944_v3  ;;  %2002 = vmatpush1.bf16.msra.mxu0 %v6768_v46  ;;  %v6837_v46 = vld [vmem:[%s8996_s3 + $0x1e8] ss:$16 sps:$4 sm:$0xff]  }
  0x3b   : > { %2003 = vmatprep.subr.bf16.mxu0 %v6776_v50  ;;  %871 = vmatmul.mubr.bf16.gmra.mrb[8].mxu1 %v6706_v41  ;;  %v6729_v41 = vld [vmem:[%s7027_s22 + $0x50] sm:$0xff]   ;;  %v6750_v50 = vld [vmem:[%s7027_s22 + $0x68] sm:$0xff]  }
  0x3c   : > { %880 = vmatprep.mubr.bf16.mxu1 %v6944_v3  ;;  %2388 = vmatpush1.bf16.msra.mxu1 %v6771_v2 }
  0x3d   : > { %2389 = vmatprep.subr.bf16.mxu1 %v6779_v4 }
  0x3e   : > { %2004 = vmatpush1.bf16.msra.mxu0 %v6774_v51  ;;  %v6757_v51 = vld [vmem:[%s7027_s22 + $0x70] sm:$0xff]  }
  0x3f   : > { %2005 = vmatprep.subr.bf16.mxu0 %v6782_v55  ;;  %v7352_v55 = vsub.s32 0, %v7349_v54 }
  0x40   : > { %2390 = vmatpush1.bf16.msra.mxu1 %v6777_v8 }
  0x41   : > { %688 = vmatmul.mubr.bf16.gmra.mrb[12].mxu0 %v6707_v52  ;;  %2391 = vmatprep.subr.bf16.mxu1 %v6785_v9 }
  0x42   : > { %697 = vmatprep.mubr.bf16.mxu0 %v6944_v3  ;;  %2006 = vmatpush1.bf16.msra.mxu0 %v6780_v56  ;;  %v347_v56 = vld [vmem:[%s8995_s2] sm:$0xf] }
  0x43   : > { %2007 = vmatprep.subr.bf16.mxu0 %v6788_v59  ;;  %881 = vmatmul.mubr.bf16.gmra.mrb[12].mxu1 %v6707_v52  ;;  %v6764_v52 = vld [vmem:[%s7027_s22 + $0x78] sm:$0xff]   ;;  %v7361_v58 = vrot.slane %v347_v56, %v7352_v55 }
  0x44   : > { %890 = vmatprep.mubr.bf16.mxu1 %v6944_v3  ;;  %2392 = vmatpush1.bf16.msra.mxu1 %v6783_v12  ;;  %v6843_v12 = vld [vmem:[%s8996_s3 + $0x208] ss:$16 sps:$4 sm:$0xff]  }
  0x45   : > { %2393 = vmatprep.subr.bf16.mxu1 %v6791_v13 }
  0x46   : > { %2008 = vmatpush1.bf16.msra.mxu0 %v6786_v60 }
  0x47   : > { %2009 = vmatprep.subr.bf16.mxu0 %v6794_v0 }
  0x48   : > { %2394 = vmatpush1.bf16.msra.mxu1 %v6789_v16  ;;  %v6851_v16 = vld [vmem:[%s8996_s3 + $0x22c] ss:$16 sps:$4 sm:$0xff]  }
  0x49   : > { %698 = vmatmul.mubr.bf16.gmra.mrb[16].mxu0 %v6708_v61  ;;  %2395 = vmatprep.subr.bf16.mxu1 %v6797_v17 }
  0x4a   : > { %707 = vmatprep.mubr.bf16.mxu0 %v6944_v3  ;;  %2010 = vmatpush1.bf16.msra.mxu0 %v6792_v1 }
  0x4b   : > { %2011 = vmatprep.subr.bf16.mxu0 %v6800_v5  ;;  %891 = vmatmul.mubr.bf16.gmra.mrb[16].mxu1 %v6708_v61 }
  0x4c   : > { %900 = vmatprep.mubr.bf16.mxu1 %v6944_v3  ;;  %2396 = vmatpush1.bf16.msra.mxu1 %v6795_v21  ;;  %v6846_v21 = vld [vmem:[%s8996_s3 + $0x220] ss:$16 sps:$4 sm:$0xff]  }
  0x4d   : > { %2397 = vmatprep.subr.bf16.mxu1 %v6803_v22 }
  0x4e   : > { %2012 = vmatpush1.bf16.msra.mxu0 %v6798_v6 }
  0x4f   : > { %2013 = vmatprep.subr.bf16.mxu0 %v6806_v10 }
  0x50   : > { %2398 = vmatpush1.bf16.msra.mxu1 %v6801_v26 }
  0x51   : > { %708 = vmatmul.mubr.bf16.gmra.mrb[20].mxu0 %v6709_v7  ;;  %2399 = vmatprep.subr.bf16.mxu1 %v6809_v27 }
  0x52   : > { %717 = vmatprep.mubr.bf16.mxu0 %v6944_v3  ;;  %2014 = vmatpush1.bf16.msra.mxu0 %v6804_v11  ;;  %v6840_v11 = vld [vmem:[%s8996_s3 + $0x200] ss:$16 sps:$4 sm:$0xff]  }
  0x53   : > { %2015 = vmatprep.subr.bf16.mxu0 %v6812_v14  ;;  %901 = vmatmul.mubr.bf16.gmra.mrb[20].mxu1 %v6709_v7 }
  0x54   : > { %910 = vmatprep.mubr.bf16.mxu1 %v6944_v3  ;;  %2400 = vmatpush1.bf16.msra.mxu1 %v6807_v30 }
  0x55   : > { %2401 = vmatprep.subr.bf16.mxu1 %v6815_v31 }
  0x56   : > { %2016 = vmatpush1.bf16.msra.mxu0 %v6810_v18 }
  0x57   : > { %2017 = vmatprep.subr.bf16.mxu0 %v6818_v19 }
  0x58   : > { %2402 = vmatpush1.bf16.msra.mxu1 %v6813_v33 }
  0x59   : > { %718 = vmatmul.mubr.bf16.gmra.mrb[24].mxu0 %v6710_v15  ;;  %2403 = vmatprep.subr.bf16.mxu1 %v6821_v34 }
  0x5a   : > { %727 = vmatprep.mubr.bf16.mxu0 %v6944_v3  ;;  %2018 = vmatpush1.bf16.msra.mxu0 %v6816_v20 }
  0x5b   : > { %2019 = vmatprep.subr.bf16.mxu0 %v6824_v23  ;;  %911 = vmatmul.mubr.bf16.gmra.mrb[24].mxu1 %v6710_v15  ;;  %v6848_v15 = vld [vmem:[%s8996_s3 + $0x224] ss:$16 sps:$4 sm:$0xff]   ;;  %v6849_v23 = vld [vmem:[%s8996_s3 + $0x228] ss:$16 sps:$4 sm:$0xff]  }
  0x5c   : > { %920 = vmatprep.mubr.bf16.mxu1 %v6944_v3  ;;  %2404 = vmatpush1.bf16.msra.mxu1 %v6819_v35  ;;  %v6852_v35 = vld [vmem:[%s8996_s3 + $0x240] ss:$16 sps:$4 sm:$0xff]  }
  0x5d   : > { %2405 = vmatprep.subr.bf16.mxu1 %v6827_v36  ;;  %v6855_v36 = vld [vmem:[%s8996_s3 + $0x248] ss:$16 sps:$4 sm:$0xff]  }
  0x5e   : > { %2020 = vmatpush1.bf16.msra.mxu0 %v6822_v24  ;;  %v6854_v24 = vld [vmem:[%s8996_s3 + $0x244] ss:$16 sps:$4 sm:$0xff]  }
  0x5f   : > { %2021 = vmatprep.subr.bf16.mxu0 %v6830_v28  ;;  %v6857_v28 = vld [vmem:[%s8996_s3 + $0x24c] ss:$16 sps:$4 sm:$0xff]  }
  0x60   : > { %2406 = vmatpush1.bf16.msra.mxu1 %v6825_v38 }
  0x61   : > { %728 = vmatmul.mubr.bf16.gmra.mrb[28].mxu0 %v6711_v25  ;;  %2407 = vmatprep.subr.bf16.mxu1 %v6833_v39 }
  0x62   : > { %737 = vmatprep.mubr.bf16.mxu0 %v6944_v3  ;;  %2022 = vmatpush1.bf16.msra.mxu0 %v6828_v29  ;;  %v7402_v29 = vsub.s32 3, %v7349_v54 }
  0x63   : > { %921 = vmatmul.mubr.bf16.gmra.mrb[28].mxu1 %v6711_v25  ;;  %2023 = vmatprep.subr.bf16.mxu0 %v6836_v43  ;;  %v7396_v25 = vsub.s32 2, %v7349_v54 }
  0x64   : > { %930 = vmatprep.mubr.bf16.mxu1 %v6944_v3  ;;  %2408 = vmatpush1.bf16.msra.mxu1 %v6831_v40  ;;  %v6860_v40 = vld [vmem:[%s8996_s3 + $0x264] ss:$16 sps:$4 sm:$0xff]  }
  0x65   : > { %2409 = vmatprep.subr.bf16.mxu1 %v6839_v44 }
  0x66   : > { %2024 = vmatpush1.bf16.msra.mxu0 %v6834_v45 }
  0x67   : > { %2186 = vmatprep.subr.bf16.mxu0 %v6842_v48 }
  0x68   : > { %2410 = vmatpush1.bf16.msra.mxu1 %v6837_v46 }
  0x69   : > { %738 = vmatmul.mubr.bf16.gmra.mrb[32].mxu0 %v6715_v32  ;;  %2572 = vmatprep.subr.bf16.mxu1 %v6845_v49 }
  0x6a   : > { %747 = vmatprep.mubr.bf16.mxu0 %v6944_v3 }
  0x6b   : > { %931 = vmatmul.mubr.bf16.gmra.mrb[32].mxu1 %v6715_v32 }
  0x6c   : > { %940 = vmatprep.mubr.bf16.mxu1 %v6944_v3 }
  0x71   : > { %748 = vmatmul.mubr.bf16.gmra.mrb[36].mxu0 %v6722_v37 }
  0x72   : > { %757 = vmatprep.mubr.bf16.mxu0 %v6944_v3 }
  0x73   : > { %941 = vmatmul.mubr.bf16.gmra.mrb[36].mxu1 %v6722_v37  ;;  %v7411_v37 = vrot.slane %v347_v56, %v7396_v25 }
  0x74   : > { %950 = vmatprep.mubr.bf16.mxu1 %v6944_v3 }
  0x79   : > { %758 = vmatmul.mubr.bf16.gmra.mrb[40].mxu0 %v6729_v41 }
  0x7a   : > { %767 = vmatprep.mubr.bf16.mxu0 %v6944_v3 }
  0x7b   : > { %951 = vmatmul.mubr.bf16.gmra.mrb[40].mxu1 %v6729_v41  ;;  %v6863_v41 = vld [vmem:[%s8996_s3 + $0x26c] ss:$16 sps:$4 sm:$0xff]  }
  0x7c   : > { %960 = vmatprep.mubr.bf16.mxu1 %v6944_v3 }
  0x81   : > { %768 = vmatmul.mubr.bf16.gmra.mrb[44].mxu0 %v6736_v42 }
  0x82   : > { %777 = vmatprep.mubr.bf16.mxu0 %v6944_v3 }
  0x83   : > { %961 = vmatmul.mubr.bf16.gmra.mrb[44].mxu1 %v6736_v42  ;;  %v7421_v42 = vrot.slane %v347_v56, %v7402_v29 }
  0x84   : > { %970 = vmatprep.mubr.bf16.mxu1 %v6944_v3 }
  0x89   : > { %778 = vmatmul.mubr.bf16.gmra.mrb[48].mxu0 %v6743_v47 }
  0x8a   : > { %787 = vmatprep.mubr.bf16.mxu0 %v6944_v3 }
  0x8b   : > { %971 = vmatmul.mubr.bf16.gmra.mrb[48].mxu1 %v6743_v47  ;;  %v6858_v47 = vld [vmem:[%s8996_s3 + $0x260] ss:$16 sps:$4 sm:$0xff]  }
  0x8c   : > { %980 = vmatprep.mubr.bf16.mxu1 %v6944_v3 }
  0x91   : > { %788 = vmatmul.mubr.bf16.gmra.mrb[52].mxu0 %v6750_v50 }
  0x92   : > { %797 = vmatprep.mubr.bf16.mxu0 %v6944_v3 }
  0x93   : > { %981 = vmatmul.mubr.bf16.gmra.mrb[52].mxu1 %v6750_v50  ;;  %v6861_v50 = vld [vmem:[%s8996_s3 + $0x268] ss:$16 sps:$4 sm:$0xff]  }
  0x94   : > { %990 = vmatprep.mubr.bf16.mxu1 %v6944_v3 }
  0x99   : > { %798 = vmatmul.mubr.bf16.gmra.mrb[56].mxu0 %v6757_v51 }
  0x9a   : > { %807 = vmatprep.mubr.bf16.mxu0 %v6944_v3 }
  0x9b   : > { %991 = vmatmul.mubr.bf16.gmra.mrb[56].mxu1 %v6757_v51  ;;  %v6866_v51 = vld [vmem:[%s8996_s3 + $0x284] ss:$16 sps:$4 sm:$0xff]  }
  0x9c   : > { %1000 = vmatprep.mubr.bf16.mxu1 %v6944_v3  ;;  %v7364_v3 = vrot.slane %v347_v56, %v7358_v57 }
  0xa1   : > { %808 = vmatmul.mubr.bf16.gmra.mrb[60].mxu0 %v6764_v52 }
  0xa3   : > { %1001 = vmatmul.mubr.bf16.gmra.mrb[60].mxu1 %v6764_v52 }
  0xfc   : > { %v659_v59 = vpop.f32.mrb[0].mxu0 }
  0xfd   : > { %v660_v60 = vadd.f32 %v659_v59, %v7361_v58  ;;  %v661_v61 = vpop.f32.mrb[1].mxu0 }
  0xfe   : > { %v662_v62 = vadd.f32 %v661_v61, %v7364_v3  ;;  %v663_v63 = vpop.f32.mrb[2].mxu0  ;;  %v852_v48 = vpop.f32.mrb[0].mxu1  ;;  %v6869_v61 = vld [vmem:[%s8996_s3 + $0x28c] ss:$16 sps:$4 sm:$0xff]  }
  0xff   : > { %v664_v0 = vadd.f32 %v663_v63, %v7361_v58  ;;  %v665_v1 = vpop.f32.mrb[3].mxu0  ;;  %v1011_v4 = vmax.f32 %v660_v60, 0.0  ;;  %v853_v52 = vadd.f32 %v852_v48, %v7411_v37  ;;  %v854_v56 = vpop.f32.mrb[1].mxu1 }
 0x100   : > { %v666_v2 = vadd.f32 %v665_v1, %v7364_v3  ;;  %v1012_v6 = vmax.f32 %v662_v62, 0.0  ;;  %v855_v62 = vadd.f32 %v854_v56, %v7421_v42  ;;  %v856_v63 = vpop.f32.mrb[2].mxu1 }
 0x101   : > { %v1015_v5 = vmax.f32 %v664_v0, 0.0 }
 0x102   : > { %v1016_v7 = vmax.f32 %v666_v2, 0.0  ;;  %v1013_v2 = vmax.f32 %v853_v52, 0.0  ;;  %v6879_v52 = vld [vmem:[%s8996_s3 + $0x2c8] ss:$16 sps:$4 sm:$0xff]  }
 0x103   : > { %v1139_v8 = vpack.c.bf16 %v1015_v5, %v1011_v4  ;;  %v857_v4 = vadd.f32 %v856_v63, %v7411_v37  ;;  %v858_v5 = vpop.f32.mrb[3].mxu1 }
 0x104   : > { %v1140_v9 = vpack.c.bf16 %v1016_v7, %v1012_v6  ;;  %v669_v10 = vpop.f32.mrb[4].mxu0  ;;  %v1014_v7 = vmax.f32 %v855_v62, 0.0  ;;  %v6887_v62 = vld [vmem:[%s8996_s3 + $0x2ec] ss:$16 sps:$4 sm:$0xff]  }
 0x105   : > { %v670_v13 = vadd.f32 %v669_v10, %v7361_v58  ;;  %v671_v14 = vpop.f32.mrb[5].mxu0 }
 0x106   : > { %v672_v17 = vadd.f32 %v671_v14, %v7364_v3  ;;  %v673_v18 = vpop.f32.mrb[6].mxu0  ;;  %2025 = vmatprep.mubr.bf16.mxu0 %v1140_v9  ;;  %2411 = vmatprep.mubr.bf16.mxu1 %v1140_v9 }
 0x107   : > { %v674_v19 = vadd.f32 %v673_v18, %v7361_v58  ;;  %v675_v20 = vpop.f32.mrb[7].mxu0  ;;  %2026 = vmatmul.mubr.bf16.vlgmr.msra.gmra.mrb[64].mxu0 %v1139_v8  ;;  %2412 = vmatmul.mubr.bf16.vlgmr.msra.gmra.mrb[64].mxu1 %v1139_v8  ;;  %v1019_v26 = vmax.f32 %v670_v13, 0.0  ;;  %v859_v8 = vadd.f32 %v858_v5, %v7421_v42  ;;  %v1017_v13 = vmax.f32 %v857_v4, 0.0 }
 0x108   : > { %v676_v22 = vadd.f32 %v675_v20, %v7364_v3  ;;  %2187 = vmatpush1.bf16.msra.mxu0 %v6840_v11  ;;  %2573 = vmatpush1.bf16.msra.mxu1 %v6843_v12  ;;  %v1020_v30 = vmax.f32 %v672_v17, 0.0  ;;  %v6864_v11 = vld [vmem:[%s8996_s3 + $0x280] ss:$16 sps:$4 sm:$0xff]   ;;  %v6867_v12 = vld [vmem:[%s8996_s3 + $0x288] ss:$16 sps:$4 sm:$0xff]  }
 0x109   : > { %v1023_v27 = vmax.f32 %v674_v19, 0.0  ;;  %2188 = vmatprep.subr.bf16.mxu0 %v6848_v15  ;;  %2574 = vmatprep.subr.bf16.mxu1 %v6851_v16  ;;  %v6872_v16 = vld [vmem:[%s8996_s3 + $0x2a4] ss:$16 sps:$4 sm:$0xff]   ;;  %v6875_v17 = vld [vmem:[%s8996_s3 + $0x2ac] ss:$16 sps:$4 sm:$0xff]   ;;  %v1018_v18 = vmax.f32 %v859_v8, 0.0 }
 0x10a   : > { %v1024_v31 = vmax.f32 %v676_v22, 0.0 }
 0x10b   : > { %v1143_v32 = vpack.c.bf16 %v1023_v27, %v1019_v26  ;;  %v7462_v26 = vpack.c.bf16 %v1018_v18, %v1014_v7  ;;  %v862_v27 = vpop.f32.mrb[4].mxu1 }
 0x10c   : > { %v1144_v33 = vpack.c.bf16 %v1024_v31, %v1020_v30  ;;  %v679_v34 = vpop.f32.mrb[8].mxu0  ;;  %2189 = vmatpush1.bf16.msra.mxu0 %v6846_v21  ;;  %2575 = vmatpush1.bf16.msra.mxu1 %v6849_v23  ;;  %v7456_v21 = vpack.c.bf16 %v1017_v13, %v1013_v2  ;;  %v6873_v30 = vld [vmem:[%s8996_s3 + $0x2a8] ss:$16 sps:$4 sm:$0xff]   ;;  %v6878_v31 = vld [vmem:[%s8996_s3 + $0x2c4] ss:$16 sps:$4 sm:$0xff]  }
 0x10d   : > { %v680_v38 = vadd.f32 %v679_v34, %v7361_v58  ;;  %v681_v39 = vpop.f32.mrb[9].mxu0  ;;  %2190 = vmatprep.subr.bf16.mxu0 %v6854_v24  ;;  %2576 = vmatprep.subr.bf16.mxu1 %v6857_v28  ;;  %v6870_v24 = vld [vmem:[%s8996_s3 + $0x2a0] ss:$16 sps:$4 sm:$0xff]  }
 0x10e   : > { %v682_v43 = vadd.f32 %v681_v39, %v7364_v3  ;;  %v683_v44 = vpop.f32.mrb[10].mxu0  ;;  %2035 = vmatprep.mubr.bf16.mxu0 %v1144_v33  ;;  %2421 = vmatprep.mubr.bf16.mxu1 %v1144_v33  ;;  %v864_v33 = vpop.f32.mrb[5].mxu1 }
 0x10f   : > { %v684_v45 = vadd.f32 %v683_v44, %v7361_v58  ;;  %v685_v46 = vpop.f32.mrb[11].mxu0  ;;  %2036 = vmatmul.mubr.bf16.gmra.mrb[68].mxu0 %v1143_v32  ;;  %2422 = vmatmul.mubr.bf16.gmra.mrb[68].mxu1 %v1143_v32  ;;  %v1027_v59 = vmax.f32 %v680_v38, 0.0  ;;  %v863_v32 = vadd.f32 %v862_v27, %v7411_v37  ;;  %v865_v38 = vadd.f32 %v864_v33, %v7421_v42  ;;  %v866_v39 = vpop.f32.mrb[6].mxu1  ;;  %v6888_v33 = vld [vmem:[%s8996_s3 + $0x300] ss:$16 sps:$4 sm:$0xff]  }
 0x110   : > { %v686_v49 = vadd.f32 %v685_v46, %v7364_v3  ;;  %2191 = vmatpush1.bf16.msra.mxu0 %v6852_v35  ;;  %2577 = vmatpush1.bf16.msra.mxu1 %v6855_v36  ;;  %v1028_v0 = vmax.f32 %v682_v43, 0.0  ;;  %v6881_v36 = vld [vmem:[%s8996_s3 + $0x2cc] ss:$16 sps:$4 sm:$0xff]   ;;  %v867_v44 = vadd.f32 %v866_v39, %v7411_v37  ;;  %v6896_v39 = vld [vmem:[%s8996_s3 + $0x324] ss:$16 sps:$4 sm:$0xff]  }
 0x111   : > { %v1031_v60 = vmax.f32 %v684_v45, 0.0  ;;  %2192 = vmatprep.subr.bf16.mxu0 %v6860_v40  ;;  %2578 = vmatprep.subr.bf16.mxu1 %v6863_v41  ;;  %v1021_v43 = vmax.f32 %v863_v32, 0.0  ;;  %v868_v45 = vpop.f32.mrb[7].mxu1 }
 0x112   : > { %v1032_v1 = vmax.f32 %v686_v49, 0.0  ;;  %v869_v48 = vadd.f32 %v868_v45, %v7421_v42  ;;  %v1025_v56 = vmax.f32 %v867_v44, 0.0  ;;  %v872_v8 = vpop.f32.mrb[8].mxu1 }
 0x113   : > { %v1147_v6 = vpack.c.bf16 %v1031_v60, %v1027_v59  ;;  %v874_v13 = vpop.f32.mrb[9].mxu1 }
 0x114   : > { %v1148_v9 = vpack.c.bf16 %v1032_v1, %v1028_v0  ;;  %v689_v10 = vpop.f32.mrb[12].mxu0  ;;  %2193 = vmatpush1.bf16.msra.mxu0 %v6858_v47  ;;  %2579 = vmatpush1.bf16.msra.mxu1 %v6861_v50  ;;  %v1022_v47 = vmax.f32 %v865_v38, 0.0  ;;  %v1026_v63 = vmax.f32 %v869_v48, 0.0  ;;  %v7492_v2 = vpack.c.bf16 %v1025_v56, %v1021_v43  ;;  %v876_v18 = vpop.f32.mrb[10].mxu1  ;;  %v6894_v48 = vld [vmem:[%s8996_s3 + $0x320] ss:$16 sps:$4 sm:$0xff]  }
 0x115   : > { %v690_v14 = vadd.f32 %v689_v10, %v7361_v58  ;;  %v691_v15 = vpop.f32.mrb[13].mxu0  ;;  %2194 = vmatprep.subr.bf16.mxu0 %v6866_v51  ;;  %2580 = vmatprep.subr.bf16.mxu1 %v6869_v61  ;;  %v6876_v51 = vld [vmem:[%s8996_s3 + $0x2c0] ss:$16 sps:$4 sm:$0xff]   ;;  %v6884_v61 = vld [vmem:[%s8996_s3 + $0x2e4] ss:$16 sps:$4 sm:$0xff]  }
 0x116   : > { %v692_v19 = vadd.f32 %v691_v15, %v7364_v3  ;;  %v693_v20 = vpop.f32.mrb[14].mxu0  ;;  %2045 = vmatprep.mubr.bf16.mxu0 %v1148_v9  ;;  %2431 = vmatprep.mubr.bf16.mxu1 %v1148_v9  ;;  %v7498_v7 = vpack.c.bf16 %v1026_v63, %v1022_v47  ;;  %v6885_v10 = vld [vmem:[%s8996_s3 + $0x2e8] ss:$16 sps:$4 sm:$0xff]   ;;  %v6902_v56 = vld [vmem:[%s8996_s3 + $0x344] ss:$16 sps:$4 sm:$0xff]  }
 0x117   : > { %v694_v22 = vadd.f32 %v693_v20, %v7361_v58  ;;  %v695_v23 = vpop.f32.mrb[15].mxu0  ;;  %2046 = vmatmul.mubr.bf16.gmra.mrb[72].mxu0 %v1147_v6  ;;  %2432 = vmatmul.mubr.bf16.gmra.mrb[72].mxu1 %v1147_v6  ;;  %v1035_v34 = vmax.f32 %v690_v14, 0.0  ;;  %v6882_v6 = vld [vmem:[%s8996_s3 + $0x2e0] ss:$16 sps:$4 sm:$0xff]   ;;  %v6905_v63 = vld [vmem:[%s8996_s3 + $0x34c] ss:$16 sps:$4 sm:$0xff]  }
 0x118   : > { %v696_v28 = vadd.f32 %v695_v23, %v7364_v3  ;;  %2195 = vmatpush1.bf16.msra.mxu0 %v6864_v11  ;;  %2581 = vmatpush1.bf16.msra.mxu1 %v6867_v12  ;;  %v1036_v40 = vmax.f32 %v692_v19, 0.0  ;;  %v6890_v11 = vld [vmem:[%s8996_s3 + $0x304] ss:$16 sps:$4 sm:$0xff]   ;;  %v873_v12 = vadd.f32 %v872_v8, %v7411_v37  ;;  %v877_v23 = vadd.f32 %v876_v18, %v7411_v37 }
 0x119   : > { %v1039_v35 = vmax.f32 %v694_v22, 0.0  ;;  %2196 = vmatprep.subr.bf16.mxu0 %v6872_v16  ;;  %2582 = vmatprep.subr.bf16.mxu1 %v6875_v17  ;;  %v6893_v16 = vld [vmem:[%s8996_s3 + $0x30c] ss:$16 sps:$4 sm:$0xff]   ;;  %v875_v17 = vadd.f32 %v874_v13, %v7421_v42 }
 0x11a   : > { %v1040_v41 = vmax.f32 %v696_v28, 0.0  ;;  %v1029_v22 = vmax.f32 %v873_v12, 0.0 }
 0x11b   : > { %v1151_v46 = vpack.c.bf16 %v1039_v35, %v1035_v34  ;;  %v1030_v28 = vmax.f32 %v875_v17, 0.0  ;;  %v6891_v34 = vld [vmem:[%s8996_s3 + $0x308] ss:$16 sps:$4 sm:$0xff]   ;;  %v1033_v35 = vmax.f32 %v877_v23, 0.0 }
 0x11c   : > { %v1152_v49 = vpack.c.bf16 %v1040_v41, %v1036_v40  ;;  %v699_v50 = vpop.f32.mrb[16].mxu0  ;;  %2197 = vmatpush1.bf16.msra.mxu0 %v6870_v24  ;;  %2583 = vmatpush1.bf16.msra.mxu1 %v6873_v30  ;;  %v878_v24 = vpop.f32.mrb[11].mxu1  ;;  %v6899_v40 = vld [vmem:[%s8996_s3 + $0x32c] ss:$16 sps:$4 sm:$0xff]  }
 0x11d   : > { %v700_v59 = vadd.f32 %v699_v50, %v7361_v58  ;;  %v701_v60 = vpop.f32.mrb[17].mxu0  ;;  %2198 = vmatprep.subr.bf16.mxu0 %v6878_v31  ;;  %2584 = vmatprep.subr.bf16.mxu1 %v6881_v36  ;;  %v879_v30 = vadd.f32 %v878_v24, %v7421_v42  ;;  %v7528_v45 = vpack.c.bf16 %v1033_v35, %v1029_v22  ;;  %v882_v50 = vpop.f32.mrb[12].mxu1  ;;  %v6911_v22 = vld [vmem:[%s8996_s3 + $0x36c] ss:$16 sps:$4 sm:$0xff]  }
 0x11e   : > { %v702_v0 = vadd.f32 %v701_v60, %v7364_v3  ;;  %v703_v1 = vpop.f32.mrb[18].mxu0  ;;  %2055 = vmatprep.mubr.bf16.mxu0 %v1152_v49  ;;  %2441 = vmatprep.mubr.bf16.mxu1 %v1152_v49  ;;  %v884_v60 = vpop.f32.mrb[13].mxu1 }
 0x11f   : > { %v704_v4 = vadd.f32 %v703_v1, %v7361_v58  ;;  %v705_v5 = vpop.f32.mrb[19].mxu0  ;;  %2056 = vmatmul.mubr.bf16.gmra.mrb[76].mxu0 %v1151_v46  ;;  %2442 = vmatmul.mubr.bf16.gmra.mrb[76].mxu1 %v1151_v46  ;;  %v1043_v14 = vmax.f32 %v700_v59, 0.0  ;;  %v1034_v41 = vmax.f32 %v879_v30, 0.0  ;;  %v883_v59 = vadd.f32 %v882_v50, %v7411_v37  ;;  %v886_v1 = vpop.f32.mrb[14].mxu1 }
 0x120   : > { %v706_v9 = vadd.f32 %v705_v5, %v7364_v3  ;;  %2199 = vmatpush1.bf16.msra.mxu0 %v6876_v51  ;;  %2585 = vmatpush1.bf16.msra.mxu1 %v6879_v52  ;;  %v1044_v19 = vmax.f32 %v702_v0, 0.0  ;;  %v6897_v52 = vld [vmem:[%s8996_s3 + $0x328] ss:$16 sps:$4 sm:$0xff]   ;;  %v885_v0 = vadd.f32 %v884_v60, %v7421_v42  ;;  %v887_v8 = vadd.f32 %v886_v1, %v7411_v37 }
 0x121   : > { %v1047_v15 = vmax.f32 %v704_v4, 0.0  ;;  %2200 = vmatprep.subr.bf16.mxu0 %v6884_v61  ;;  %2586 = vmatprep.subr.bf16.mxu1 %v6887_v62  ;;  %v7534_v49 = vpack.c.bf16 %v1034_v41, %v1030_v28  ;;  %v6915_v1 = vld [vmem:[%s8996_s3 + $0x388] ss:$16 sps:$4 sm:$0xff]  }
 0x122   : > { %v1048_v20 = vmax.f32 %v706_v9, 0.0  ;;  %v888_v9 = vpop.f32.mrb[15].mxu1  ;;  %v1041_v17 = vmax.f32 %v887_v8, 0.0  ;;  %v6920_v8 = vld [vmem:[%s8996_s3 + $0x3a4] ss:$16 sps:$4 sm:$0xff]  }
 0x123   : > { %v1155_v27 = vpack.c.bf16 %v1047_v15, %v1043_v14  ;;  %v889_v12 = vadd.f32 %v888_v9, %v7421_v42  ;;  %v6900_v15 = vld [vmem:[%s8996_s3 + $0x340] ss:$16 sps:$4 sm:$0xff]   ;;  %v6923_v9 = vld [vmem:[%s8996_s3 + $0x3ac] ss:$16 sps:$4 sm:$0xff]  }
 0x124   : > { %v1156_v31 = vpack.c.bf16 %v1048_v20, %v1044_v19  ;;  %v709_v32 = vpop.f32.mrb[20].mxu0  ;;  %2201 = vmatpush1.bf16.msra.mxu0 %v6882_v6  ;;  %2587 = vmatpush1.bf16.msra.mxu1 %v6885_v10  ;;  %v1037_v6 = vmax.f32 %v883_v59, 0.0  ;;  %v6908_v20 = vld [vmem:[%s8996_s3 + $0x364] ss:$16 sps:$4 sm:$0xff]  }
 0x125   : > { %v710_v36 = vadd.f32 %v709_v32, %v7361_v58  ;;  %v711_v38 = vpop.f32.mrb[21].mxu0  ;;  %2202 = vmatprep.subr.bf16.mxu0 %v6890_v11  ;;  %2588 = vmatprep.subr.bf16.mxu1 %v6893_v16  ;;  %v1038_v11 = vmax.f32 %v885_v0, 0.0  ;;  %v6903_v16 = vld [vmem:[%s8996_s3 + $0x348] ss:$16 sps:$4 sm:$0xff]   ;;  %v1042_v23 = vmax.f32 %v889_v12, 0.0 }
 0x126   : > { %v712_v43 = vadd.f32 %v711_v38, %v7364_v3  ;;  %v713_v44 = vpop.f32.mrb[22].mxu0  ;;  %2065 = vmatprep.mubr.bf16.mxu0 %v1156_v31  ;;  %2451 = vmatprep.mubr.bf16.mxu1 %v1156_v31  ;;  %v7564_v28 = vpack.c.bf16 %v1041_v17, %v1037_v6  ;;  %v6906_v32 = vld [vmem:[%s8996_s3 + $0x360] ss:$16 sps:$4 sm:$0xff]   ;;  %v6914_v38 = vld [vmem:[%s8996_s3 + $0x384] ss:$16 sps:$4 sm:$0xff]  }
 0x127   : > { %v714_v46 = vadd.f32 %v713_v44, %v7361_v58  ;;  %v715_v47 = vpop.f32.mrb[23].mxu0  ;;  %2066 = vmatmul.mubr.bf16.gmra.mrb[80].mxu0 %v1155_v27  ;;  %2452 = vmatmul.mubr.bf16.gmra.mrb[80].mxu1 %v1155_v27  ;;  %v1051_v61 = vmax.f32 %v710_v36, 0.0  ;;  %v6909_v36 = vld [vmem:[%s8996_s3 + $0x368] ss:$16 sps:$4 sm:$0xff]   ;;  %v6917_v44 = vld [vmem:[%s8996_s3 + $0x38c] ss:$16 sps:$4 sm:$0xff]  }
 0x128   : > { %v716_v51 = vadd.f32 %v715_v47, %v7364_v3  ;;  %2203 = vmatpush1.bf16.msra.mxu0 %v6888_v33  ;;  %2589 = vmatpush1.bf16.msra.mxu1 %v6891_v34  ;;  %v1052_v4 = vmax.f32 %v712_v43, 0.0  ;;  %v7570_v33 = vpack.c.bf16 %v1042_v23, %v1038_v11  ;;  %v892_v34 = vpop.f32.mrb[16].mxu1  ;;  %v6912_v0 = vld [vmem:[%s8996_s3 + $0x380] ss:$16 sps:$4 sm:$0xff]  }
 0x129   : > { %v1055_v62 = vmax.f32 %v714_v46, 0.0  ;;  %2204 = vmatprep.subr.bf16.mxu0 %v6896_v39  ;;  %2590 = vmatprep.subr.bf16.mxu1 %v6899_v40  ;;  %v893_v39 = vadd.f32 %v892_v34, %v7411_v37  ;;  %v894_v40 = vpop.f32.mrb[17].mxu1 }
 0x12a   : > { %v1056_v5 = vmax.f32 %v716_v51, 0.0  ;;  %v895_v46 = vadd.f32 %v894_v40, %v7421_v42  ;;  %v896_v47 = vpop.f32.mrb[18].mxu1 }
 0x12b   : > { %v1159_v10 = vpack.c.bf16 %v1055_v62, %v1051_v61  ;;  %v1045_v51 = vmax.f32 %v893_v39, 0.0 }
 0x12c   : > { %v1160_v13 = vpack.c.bf16 %v1056_v5, %v1052_v4  ;;  %v719_v14 = vpop.f32.mrb[24].mxu0  ;;  %2205 = vmatpush1.bf16.msra.mxu0 %v6894_v48  ;;  %2591 = vmatpush1.bf16.msra.mxu1 %v6897_v52  ;;  %v897_v52 = vadd.f32 %v896_v47, %v7411_v37  ;;  %v1046_v60 = vmax.f32 %v895_v46, 0.0 }
 0x12d   : > { %v720_v18 = vadd.f32 %v719_v14, %v7361_v58  ;;  %v721_v19 = vpop.f32.mrb[25].mxu0  ;;  %2206 = vmatprep.subr.bf16.mxu0 %v6902_v56  ;;  %2592 = vmatprep.subr.bf16.mxu1 %v6905_v63  ;;  %v898_v56 = vpop.f32.mrb[19].mxu1 }
 0x12e   : > { %v722_v24 = vadd.f32 %v721_v19, %v7364_v3  ;;  %v723_v27 = vpop.f32.mrb[26].mxu0  ;;  %2075 = vmatprep.mubr.bf16.mxu0 %v1160_v13  ;;  %2461 = vmatprep.mubr.bf16.mxu1 %v1160_v13  ;;  %v899_v61 = vadd.f32 %v898_v56, %v7421_v42  ;;  %v1049_v4 = vmax.f32 %v897_v52, 0.0 }
 0x12f   : > { %v724_v30 = vadd.f32 %v723_v27, %v7361_v58  ;;  %v725_v31 = vpop.f32.mrb[27].mxu0  ;;  %2076 = vmatmul.mubr.bf16.gmra.mrb[84].mxu0 %v1159_v10  ;;  %2462 = vmatmul.mubr.bf16.gmra.mrb[84].mxu1 %v1159_v10  ;;  %v1059_v41 = vmax.f32 %v720_v18, 0.0  ;;  %v902_v18 = vpop.f32.mrb[20].mxu1 }
 0x130   : > { %v726_v35 = vadd.f32 %v725_v31, %v7364_v3  ;;  %2207 = vmatpush1.bf16.msra.mxu0 %v6900_v15  ;;  %2593 = vmatpush1.bf16.msra.mxu1 %v6903_v16  ;;  %v1060_v48 = vmax.f32 %v722_v24, 0.0  ;;  %v1050_v10 = vmax.f32 %v899_v61, 0.0  ;;  %v7600_v13 = vpack.c.bf16 %v1049_v4, %v1045_v51  ;;  %v6918_v16 = vld [vmem:[%s8996_s3 + $0x3a0] ss:$16 sps:$4 sm:$0xff]   ;;  %v904_v24 = vpop.f32.mrb[21].mxu1 }
 0x131   : > { %v1063_v43 = vmax.f32 %v724_v30, 0.0  ;;  %2208 = vmatprep.subr.bf16.mxu0 %v6908_v20  ;;  %2594 = vmatprep.subr.bf16.mxu1 %v6911_v22  ;;  %v6921_v20 = vld [vmem:[%s8996_s3 + $0x3a8] ss:$16 sps:$4 sm:$0xff]   ;;  %v6926_v22 = vld [vmem:[%s8996_s3 + $0x3c4] ss:$16 sps:$4 sm:$0xff]   ;;  %v903_v23 = vadd.f32 %v902_v18, %v7411_v37  ;;  %v906_v34 = vpop.f32.mrb[22].mxu1 }
 0x132   : > { %v1064_v50 = vmax.f32 %v726_v35, 0.0  ;;  %v7606_v17 = vpack.c.bf16 %v1050_v10, %v1046_v60  ;;  %v6929_v31 = vld [vmem:[%s8996_s3 + $0x3cc] ss:$16 sps:$4 sm:$0xff]   ;;  %v907_v39 = vadd.f32 %v906_v34, %v7411_v37  ;;  %v908_v40 = vpop.f32.mrb[23].mxu1  ;;  %v6933_v10 = vld [vmem:[%s8996_s3 + $0x3e8] ss:$16 sps:$4 sm:$0xff]  }
 0x133   : > { %v1163_v59 = vpack.c.bf16 %v1063_v43, %v1059_v41  ;;  %v6935_v60 = vld [vmem:[%s8996_s3 + $0x3ec] ss:$16 sps:$4 sm:$0xff]  }
 0x134   : > { %v1164_v62 = vpack.c.bf16 %v1064_v50, %v1060_v48  ;;  %v729_v63 = vpop.f32.mrb[28].mxu0  ;;  %2209 = vmatpush1.bf16.msra.mxu0 %v6906_v32  ;;  %2595 = vmatpush1.bf16.msra.mxu1 %v6909_v36  ;;  %v905_v32 = vadd.f32 %v904_v24, %v7421_v42  ;;  %v6924_v48 = vld [vmem:[%s8996_s3 + $0x3c0] ss:$16 sps:$4 sm:$0xff]   ;;  %v6927_v50 = vld [vmem:[%s8996_s3 + $0x3c8] ss:$16 sps:$4 sm:$0xff]   ;;  %v1057_v51 = vmax.f32 %v907_v39, 0.0 }
 0x135   : > { %v730_v5 = vadd.f32 %v729_v63, %v7361_v58  ;;  %v731_v6 = vpop.f32.mrb[29].mxu0  ;;  %2210 = vmatprep.subr.bf16.mxu0 %v6914_v38  ;;  %2596 = vmatprep.subr.bf16.mxu1 %v6917_v44  ;;  %v1053_v38 = vmax.f32 %v903_v23, 0.0  ;;  %v909_v44 = vadd.f32 %v908_v40, %v7421_v42 }
 0x136   : > { %v732_v11 = vadd.f32 %v731_v6, %v7364_v3  ;;  %v733_v12 = vpop.f32.mrb[30].mxu0  ;;  %2085 = vmatprep.mubr.bf16.mxu0 %v1164_v62  ;;  %2471 = vmatprep.mubr.bf16.mxu1 %v1164_v62  ;;  %v1054_v43 = vmax.f32 %v905_v32, 0.0  ;;  %v912_v6 = vpop.f32.mrb[24].mxu1 }
 0x137   : > { %v734_v14 = vadd.f32 %v733_v12, %v7361_v58  ;;  %v735_v15 = vpop.f32.mrb[31].mxu0  ;;  %2086 = vmatmul.mubr.bf16.gmra.mrb[88].mxu0 %v1163_v59  ;;  %2472 = vmatmul.mubr.bf16.gmra.mrb[88].mxu1 %v1163_v59  ;;  %v1067_v27 = vmax.f32 %v730_v5, 0.0  ;;  %v6932_v59 = vld [vmem:[%s8996_s3 + $0x3e4] ss:$16 sps:$4 sm:$0xff]   ;;  %v1058_v61 = vmax.f32 %v909_v44, 0.0  ;;  %v914_v12 = vpop.f32.mrb[25].mxu1 }
 0x138   : > { %v736_v19 = vadd.f32 %v735_v15, %v7364_v3  ;;  %2211 = vmatpush1.bf16.msra.mxu0 %v6912_v0  ;;  %2597 = vmatpush1.bf16.msra.mxu1 %v6915_v1  ;;  %v1068_v35 = vmax.f32 %v732_v11, 0.0  ;;  %v7636_v0 = vpack.c.bf16 %v1057_v51, %v1053_v38  ;;  %v913_v11 = vadd.f32 %v912_v6, %v7411_v37  ;;  %v916_v18 = vpop.f32.mrb[26].mxu1 }
 0x139   : > { %v1071_v30 = vmax.f32 %v734_v14, 0.0  ;;  %2212 = vmatprep.subr.bf16.mxu0 %v6920_v8  ;;  %2598 = vmatprep.subr.bf16.mxu1 %v6923_v9  ;;  %v7639_v5 = vpack.c.bf16 %v1058_v61, %v1054_v43  ;;  %v6930_v9 = vld [vmem:[%s8996_s3 + $0x3e0] ss:$16 sps:$4 sm:$0xff]   ;;  %v917_v23 = vadd.f32 %v916_v18, %v7411_v37  ;;  %v918_v24 = vpop.f32.mrb[27].mxu1 }
 0x13a   : > { %v1072_v36 = vmax.f32 %v736_v19, 0.0 }
 0x13b   : > { %v1167_v41 = vpack.c.bf16 %v1071_v30, %v1067_v27 }
 0x13c   : > { %v1168_v46 = vpack.c.bf16 %v1072_v36, %v1068_v35  ;;  %v739_v47 = vpop.f32.mrb[32].mxu0  ;;  %2213 = vmatpush1.bf16.msra.mxu0 %v6918_v16  ;;  %2599 = vmatpush1.bf16.msra.mxu1 %v6921_v20  ;;  %v915_v16 = vadd.f32 %v914_v12, %v7421_v42  ;;  %v1065_v35 = vmax.f32 %v917_v23, 0.0 }
 0x13d   : > { %v740_v52 = vadd.f32 %v739_v47, %v7361_v58  ;;  %v741_v56 = vpop.f32.mrb[33].mxu0  ;;  %2214 = vmatprep.subr.bf16.mxu0 %v6926_v22  ;;  %2600 = vmatprep.subr.bf16.mxu1 %v6929_v31  ;;  %v1061_v22 = vmax.f32 %v913_v11, 0.0  ;;  %v919_v31 = vadd.f32 %v918_v24, %v7421_v42 }
 0x13e   : > { %v742_v62 = vadd.f32 %v741_v56, %v7364_v3  ;;  %v743_v63 = vpop.f32.mrb[34].mxu0  ;;  %2095 = vmatprep.mubr.bf16.mxu0 %v1168_v46  ;;  %2481 = vmatprep.mubr.bf16.mxu1 %v1168_v46  ;;  %v1062_v30 = vmax.f32 %v915_v16, 0.0 }
 0x13f   : > { %v744_v1 = vadd.f32 %v743_v63, %v7361_v58  ;;  %v745_v4 = vpop.f32.mrb[35].mxu0  ;;  %2096 = vmatmul.mubr.bf16.gmra.mrb[92].mxu0 %v1167_v41  ;;  %2482 = vmatmul.mubr.bf16.gmra.mrb[92].mxu1 %v1167_v41  ;;  %v1075_v14 = vmax.f32 %v740_v52, 0.0  ;;  %v1066_v39 = vmax.f32 %v919_v31, 0.0  ;;  %v7654_v43 = vpack.c.bf16 %v1065_v35, %v1061_v22 }
 0x140   : > { %v746_v8 = vadd.f32 %v745_v4, %v7364_v3  ;;  %2215 = vmatpush1.bf16.msra.mxu0 %v6924_v48  ;;  %2601 = vmatpush1.bf16.msra.mxu1 %v6927_v50  ;;  %v1076_v19 = vmax.f32 %v742_v62, 0.0  ;;  %v922_v48 = vpop.f32.mrb[28].mxu1 }
 0x141   : > { %v1079_v15 = vmax.f32 %v744_v1, 0.0  ;;  %2216 = vmatprep.subr.bf16.mxu0 %v6932_v59  ;;  %2602 = vmatprep.subr.bf16.mxu1 %v6935_v60  ;;  %v7657_v47 = vpack.c.bf16 %v1066_v39, %v1062_v30  ;;  %v923_v51 = vadd.f32 %v922_v48, %v7411_v37  ;;  %v924_v52 = vpop.f32.mrb[29].mxu1 }
 0x142   : > { %v1080_v20 = vmax.f32 %v746_v8, 0.0  ;;  %v925_v60 = vadd.f32 %v924_v52, %v7421_v42  ;;  %v926_v61 = vpop.f32.mrb[30].mxu1 }
 0x143   : > { %v1171_v27 = vpack.c.bf16 %v1079_v15, %v1075_v14  ;;  %v1069_v1 = vmax.f32 %v923_v51, 0.0  ;;  %v927_v4 = vadd.f32 %v926_v61, %v7411_v37  ;;  %v928_v6 = vpop.f32.mrb[31].mxu1 }
 0x144   : > { %v1172_v32 = vpack.c.bf16 %v1080_v20, %v1076_v19  ;;  %v749_v34 = vpop.f32.mrb[36].mxu0  ;;  %2217 = vmatpush1.bf16.msra.mxu0 %v6930_v9  ;;  %2603 = vmatpush1.bf16.msra.mxu1 %v6933_v10  ;;  %v1070_v9 = vmax.f32 %v925_v60, 0.0  ;;  %v929_v10 = vadd.f32 %v928_v6, %v7421_v42  ;;  %v932_v30 = vpop.f32.mrb[32].mxu1 }
 0x145   : > { %v750_v36 = vadd.f32 %v749_v34, %v7361_v58  ;;  %v751_v38 = vpop.f32.mrb[37].mxu0  ;;  %v1073_v14 = vmax.f32 %v927_v4, 0.0  ;;  %v934_v34 = vpop.f32.mrb[33].mxu1 }
 0x146   : > { %v752_v40 = vadd.f32 %v751_v38, %v7364_v3  ;;  %v753_v41 = vpop.f32.mrb[38].mxu0  ;;  %2105 = vmatprep.mubr.bf16.mxu0 %v1172_v32  ;;  %2491 = vmatprep.mubr.bf16.mxu1 %v1172_v32  ;;  %v1074_v18 = vmax.f32 %v929_v10, 0.0  ;;  %v933_v32 = vadd.f32 %v932_v30, %v7411_v37  ;;  %v935_v38 = vadd.f32 %v934_v34, %v7421_v42  ;;  %v936_v39 = vpop.f32.mrb[34].mxu1 }
 0x147   : > { %v754_v44 = vadd.f32 %v753_v41, %v7361_v58  ;;  %v755_v46 = vpop.f32.mrb[39].mxu0  ;;  %2106 = vmatmul.mubr.bf16.gmra.mrb[96].mxu0 %v1171_v27  ;;  %2492 = vmatmul.mubr.bf16.gmra.mrb[96].mxu1 %v1171_v27  ;;  %v1083_v56 = vmax.f32 %v750_v36, 0.0  ;;  %v7666_v22 = vpack.c.bf16 %v1073_v14, %v1069_v1  ;;  %v938_v48 = vpop.f32.mrb[35].mxu1 }
 0x148   : > { %v756_v50 = vadd.f32 %v755_v46, %v7364_v3  ;;  %v1084_v62 = vmax.f32 %v752_v40, 0.0  ;;  %v7669_v27 = vpack.c.bf16 %v1074_v18, %v1070_v9  ;;  %v937_v46 = vadd.f32 %v936_v39, %v7411_v37 }
 0x149   : > { %v1087_v59 = vmax.f32 %v754_v44, 0.0  ;;  %v1077_v44 = vmax.f32 %v933_v32, 0.0  ;;  %v1078_v51 = vmax.f32 %v935_v38, 0.0  ;;  %v939_v52 = vadd.f32 %v938_v48, %v7421_v42 }
 0x14a   : > { %v1088_v63 = vmax.f32 %v756_v50, 0.0  ;;  %v1081_v60 = vmax.f32 %v937_v46, 0.0 }
 0x14b   : > { %v1175_v8 = vpack.c.bf16 %v1087_v59, %v1083_v56 }
 0x14c   : > { %v1176_v11 = vpack.c.bf16 %v1088_v63, %v1084_v62  ;;  %v759_v12 = vpop.f32.mrb[40].mxu0  ;;  %v1082_v63 = vmax.f32 %v939_v52, 0.0  ;;  %v7678_v6 = vpack.c.bf16 %v1081_v60, %v1077_v44 }
 0x14d   : > { %v760_v15 = vadd.f32 %v759_v12, %v7361_v58  ;;  %v761_v16 = vpop.f32.mrb[41].mxu0 }
 0x14e   : > { %v762_v19 = vadd.f32 %v761_v16, %v7364_v3  ;;  %v763_v20 = vpop.f32.mrb[42].mxu0  ;;  %2115 = vmatprep.mubr.bf16.mxu0 %v1176_v11  ;;  %2501 = vmatprep.mubr.bf16.mxu1 %v1176_v11  ;;  %v7681_v10 = vpack.c.bf16 %v1082_v63, %v1078_v51  ;;  %v942_v11 = vpop.f32.mrb[36].mxu1 }
 0x14f   : > { %v764_v23 = vadd.f32 %v763_v20, %v7361_v58  ;;  %v765_v24 = vpop.f32.mrb[43].mxu0  ;;  %2116 = vmatmul.mubr.bf16.gmra.mrb[100].mxu0 %v1175_v8  ;;  %2502 = vmatmul.mubr.bf16.gmra.mrb[100].mxu1 %v1175_v8  ;;  %v1091_v35 = vmax.f32 %v760_v15, 0.0  ;;  %v943_v14 = vadd.f32 %v942_v11, %v7411_v37  ;;  %v944_v15 = vpop.f32.mrb[37].mxu1 }
 0x150   : > { %v766_v31 = vadd.f32 %v765_v24, %v7364_v3  ;;  %v1092_v40 = vmax.f32 %v762_v19, 0.0  ;;  %v945_v19 = vadd.f32 %v944_v15, %v7421_v42  ;;  %v946_v20 = vpop.f32.mrb[38].mxu1 }
 0x151   : > { %v1095_v36 = vmax.f32 %v764_v23, 0.0  ;;  %v1085_v30 = vmax.f32 %v943_v14, 0.0  ;;  %v948_v32 = vpop.f32.mrb[39].mxu1 }
 0x152   : > { %v1096_v41 = vmax.f32 %v766_v31, 0.0  ;;  %v947_v31 = vadd.f32 %v946_v20, %v7411_v37  ;;  %v952_v60 = vpop.f32.mrb[40].mxu1 }
 0x153   : > { %v1179_v50 = vpack.c.bf16 %v1095_v36, %v1091_v35  ;;  %v1086_v35 = vmax.f32 %v945_v19, 0.0  ;;  %v949_v36 = vadd.f32 %v948_v32, %v7421_v42  ;;  %v954_v63 = vpop.f32.mrb[41].mxu1 }
 0x154   : > { %v1180_v56 = vpack.c.bf16 %v1096_v41, %v1092_v40  ;;  %v769_v59 = vpop.f32.mrb[44].mxu0  ;;  %v1089_v40 = vmax.f32 %v947_v31, 0.0 }
 0x155   : > { %v770_v61 = vadd.f32 %v769_v59, %v7361_v58  ;;  %v771_v62 = vpop.f32.mrb[45].mxu0  ;;  %v1090_v46 = vmax.f32 %v949_v36, 0.0 }
 0x156   : > { %v772_v1 = vadd.f32 %v771_v62, %v7364_v3  ;;  %v773_v4 = vpop.f32.mrb[46].mxu0  ;;  %2125 = vmatprep.mubr.bf16.mxu0 %v1180_v56  ;;  %2511 = vmatprep.mubr.bf16.mxu1 %v1180_v56  ;;  %v7690_v51 = vpack.c.bf16 %v1089_v40, %v1085_v30  ;;  %v953_v62 = vadd.f32 %v952_v60, %v7411_v37 }
 0x157   : > { %v774_v8 = vadd.f32 %v773_v4, %v7361_v58  ;;  %v775_v9 = vpop.f32.mrb[47].mxu0  ;;  %2126 = vmatmul.mubr.bf16.gmra.mrb[104].mxu0 %v1179_v50  ;;  %2512 = vmatmul.mubr.bf16.gmra.mrb[104].mxu1 %v1179_v50  ;;  %v1099_v16 = vmax.f32 %v770_v61, 0.0  ;;  %v7693_v59 = vpack.c.bf16 %v1090_v46, %v1086_v35 }
 0x158   : > { %v776_v12 = vadd.f32 %v775_v9, %v7364_v3  ;;  %v1100_v23 = vmax.f32 %v772_v1, 0.0  ;;  %v956_v9 = vpop.f32.mrb[42].mxu1  ;;  %v1093_v14 = vmax.f32 %v953_v62, 0.0 }
 0x159   : > { %v1103_v18 = vmax.f32 %v774_v8, 0.0  ;;  %v955_v8 = vadd.f32 %v954_v63, %v7421_v42  ;;  %v957_v15 = vadd.f32 %v956_v9, %v7411_v37 }
 0x15a   : > { %v1104_v24 = vmax.f32 %v776_v12, 0.0 }
 0x15b   : > { %v1183_v34 = vpack.c.bf16 %v1103_v18, %v1099_v16  ;;  %v958_v16 = vpop.f32.mrb[43].mxu1  ;;  %v1094_v19 = vmax.f32 %v955_v8, 0.0  ;;  %v1097_v30 = vmax.f32 %v957_v15, 0.0 }
 0x15c   : > { %v1184_v38 = vpack.c.bf16 %v1104_v24, %v1100_v23  ;;  %v779_v39 = vpop.f32.mrb[48].mxu0  ;;  %v959_v20 = vadd.f32 %v958_v16, %v7421_v42 }
 0x15d   : > { %v780_v41 = vadd.f32 %v779_v39, %v7361_v58  ;;  %v781_v44 = vpop.f32.mrb[49].mxu0 }
 0x15e   : > { %v782_v48 = vadd.f32 %v781_v44, %v7364_v3  ;;  %v783_v50 = vpop.f32.mrb[50].mxu0  ;;  %2135 = vmatprep.mubr.bf16.mxu0 %v1184_v38  ;;  %2521 = vmatprep.mubr.bf16.mxu1 %v1184_v38  ;;  %v7702_v38 = vpack.c.bf16 %v1097_v30, %v1093_v14  ;;  %v962_v44 = vpop.f32.mrb[44].mxu1 }
 0x15f   : > { %v784_v52 = vadd.f32 %v783_v50, %v7361_v58  ;;  %v785_v56 = vpop.f32.mrb[51].mxu0  ;;  %2136 = vmatmul.mubr.bf16.gmra.mrb[108].mxu0 %v1183_v34  ;;  %2522 = vmatmul.mubr.bf16.gmra.mrb[108].mxu1 %v1183_v34  ;;  %v1107_v1 = vmax.f32 %v780_v41, 0.0  ;;  %v1098_v34 = vmax.f32 %v959_v20, 0.0  ;;  %v964_v50 = vpop.f32.mrb[45].mxu1 }
 0x160   : > { %v786_v61 = vadd.f32 %v785_v56, %v7364_v3  ;;  %v1108_v11 = vmax.f32 %v782_v48, 0.0  ;;  %v963_v48 = vadd.f32 %v962_v44, %v7411_v37  ;;  %v965_v60 = vadd.f32 %v964_v50, %v7421_v42 }
 0x161   : > { %v1111_v4 = vmax.f32 %v784_v52, 0.0  ;;  %v7705_v41 = vpack.c.bf16 %v1098_v34, %v1094_v19 }
 0x162   : > { %v1112_v12 = vmax.f32 %v786_v61, 0.0  ;;  %v966_v61 = vpop.f32.mrb[46].mxu1 }
 0x163   : > { %v1187_v18 = vpack.c.bf16 %v1111_v4, %v1107_v1  ;;  %v1101_v1 = vmax.f32 %v963_v48, 0.0  ;;  %v967_v4 = vadd.f32 %v966_v61, %v7411_v37  ;;  %v968_v8 = vpop.f32.mrb[47].mxu1 }
 0x164   : > { %v1188_v23 = vpack.c.bf16 %v1112_v12, %v1108_v11  ;;  %v789_v24 = vpop.f32.mrb[52].mxu0  ;;  %v1102_v11 = vmax.f32 %v965_v60, 0.0  ;;  %v969_v12 = vadd.f32 %v968_v8, %v7421_v42 }
 0x165   : > { %v790_v31 = vadd.f32 %v789_v24, %v7361_v58  ;;  %v791_v32 = vpop.f32.mrb[53].mxu0  ;;  %v1105_v16 = vmax.f32 %v967_v4, 0.0 }
 0x166   : > { %v792_v35 = vadd.f32 %v791_v32, %v7364_v3  ;;  %v793_v36 = vpop.f32.mrb[54].mxu0  ;;  %2145 = vmatprep.mubr.bf16.mxu0 %v1188_v23  ;;  %2531 = vmatprep.mubr.bf16.mxu1 %v1188_v23  ;;  %v1106_v20 = vmax.f32 %v969_v12, 0.0 }
 0x167   : > { %v794_v39 = vadd.f32 %v793_v36, %v7361_v58  ;;  %v795_v40 = vpop.f32.mrb[55].mxu0  ;;  %2146 = vmatmul.mubr.bf16.gmra.mrb[112].mxu0 %v1187_v18  ;;  %2532 = vmatmul.mubr.bf16.gmra.mrb[112].mxu1 %v1187_v18  ;;  %v1115_v52 = vmax.f32 %v790_v31, 0.0  ;;  %v7714_v30 = vpack.c.bf16 %v1105_v16, %v1101_v1 }
 0x168   : > { %v796_v46 = vadd.f32 %v795_v40, %v7364_v3  ;;  %v1116_v62 = vmax.f32 %v792_v35, 0.0  ;;  %v7717_v34 = vpack.c.bf16 %v1106_v20, %v1102_v11  ;;  %v972_v35 = vpop.f32.mrb[48].mxu1 }
 0x169   : > { %v1119_v56 = vmax.f32 %v794_v39, 0.0  ;;  %v973_v39 = vadd.f32 %v972_v35, %v7411_v37  ;;  %v974_v40 = vpop.f32.mrb[49].mxu1 }
 0x16a   : > { %v1120_v63 = vmax.f32 %v796_v46, 0.0  ;;  %v975_v48 = vadd.f32 %v974_v40, %v7421_v42  ;;  %v976_v50 = vpop.f32.mrb[50].mxu1 }
 0x16b   : > { %v1191_v9 = vpack.c.bf16 %v1119_v56, %v1115_v52  ;;  %v1109_v60 = vmax.f32 %v973_v39, 0.0  ;;  %v977_v61 = vadd.f32 %v976_v50, %v7411_v37 }
 0x16c   : > { %v1192_v14 = vpack.c.bf16 %v1120_v63, %v1116_v62  ;;  %v799_v15 = vpop.f32.mrb[56].mxu0  ;;  %v978_v62 = vpop.f32.mrb[51].mxu1  ;;  %v1110_v1 = vmax.f32 %v975_v48, 0.0 }
 0x16d   : > { %v800_v18 = vadd.f32 %v799_v15, %v7361_v58  ;;  %v801_v19 = vpop.f32.mrb[57].mxu0  ;;  %v979_v4 = vadd.f32 %v978_v62, %v7421_v42  ;;  %v1113_v11 = vmax.f32 %v977_v61, 0.0 }
 0x16e   : > { %v802_v23 = vadd.f32 %v801_v19, %v7364_v3  ;;  %v803_v24 = vpop.f32.mrb[58].mxu0  ;;  %2155 = vmatprep.mubr.bf16.mxu0 %v1192_v14  ;;  %2541 = vmatprep.mubr.bf16.mxu1 %v1192_v14 }
 0x16f   : > { %v804_v31 = vadd.f32 %v803_v24, %v7361_v58  ;;  %v805_v32 = vpop.f32.mrb[59].mxu0  ;;  %2156 = vmatmul.mubr.bf16.gmra.mrb[116].mxu0 %v1191_v9  ;;  %2542 = vmatmul.mubr.bf16.gmra.mrb[116].mxu1 %v1191_v9  ;;  %v1123_v44 = vmax.f32 %v800_v18, 0.0  ;;  %v1114_v15 = vmax.f32 %v979_v4, 0.0  ;;  %v7726_v19 = vpack.c.bf16 %v1113_v11, %v1109_v60  ;;  %v3203_v11 = vld [vmem:[#allocation2] sm:$0x1] }
 0x170   : > { %v806_v36 = vadd.f32 %v805_v32, %v7364_v3  ;;  %v1124_v52 = vmax.f32 %v802_v23, 0.0  ;;  %3206 = vperm.xlu1 %6678, %v3203_v11  }
 0x171   : > { %v1127_v46 = vmax.f32 %v804_v31, 0.0  ;;  %v7729_v24 = vpack.c.bf16 %v1114_v15, %v1110_v1  ;;  %v982_v31 = vpop.f32.mrb[52].mxu1 }
 0x172   : > { %v1128_v56 = vmax.f32 %v806_v36, 0.0  ;;  %v983_v35 = vadd.f32 %v982_v31, %v7411_v37  ;;  %v984_v36 = vpop.f32.mrb[53].mxu1 }
 0x173   : > { %v1195_v63 = vpack.c.bf16 %v1127_v46, %v1123_v44  ;;  %v985_v44 = vadd.f32 %v984_v36, %v7421_v42  ;;  %v986_v46 = vpop.f32.mrb[54].mxu1 }
 0x174   : > { %v1196_v8 = vpack.c.bf16 %v1128_v56, %v1124_v52  ;;  %v809_v9 = vpop.f32.mrb[60].mxu0  ;;  %v1117_v52 = vmax.f32 %v983_v35, 0.0  ;;  %v988_v56 = vpop.f32.mrb[55].mxu1 }
 0x175   : > { %v810_v12 = vadd.f32 %v809_v9, %v7361_v58  ;;  %v811_v14 = vpop.f32.mrb[61].mxu0  ;;  %v1118_v61 = vmax.f32 %v985_v44, 0.0  ;;  %v989_v62 = vadd.f32 %v988_v56, %v7421_v42  ;;  %v992_v9 = vpop.f32.mrb[56].mxu1 }
 0x176   : > { %v812_v16 = vadd.f32 %v811_v14, %v7364_v3  ;;  %v813_v18 = vpop.f32.mrb[62].mxu0  ;;  %2165 = vmatprep.mubr.bf16.mxu0 %v1196_v8  ;;  %2551 = vmatprep.mubr.bf16.mxu1 %v1196_v8  ;;  %v994_v14 = vpop.f32.mrb[57].mxu1 }
 0x177   : > { %v814_v20 = vadd.f32 %v813_v18, %v7361_v58  ;;  %v815_v23 = vpop.f32.mrb[63].mxu0  ;;  %2166 = vmatmul.mubr.bf16.gmra.mrb[120].mxu0 %v1195_v63  ;;  %2552 = vmatmul.mubr.bf16.gmra.mrb[120].mxu1 %v1195_v63  ;;  %v1131_v39 = vmax.f32 %v810_v12, 0.0  ;;  %v987_v58 = vadd.f32 %v986_v46, %v7411_v37  ;;  %v1122_v1 = vmax.f32 %v989_v62, 0.0 }
 0x178   : > { %v816_v32 = vadd.f32 %v815_v23, %v7364_v3  ;;  %v1132_v48 = vmax.f32 %v812_v16, 0.0  ;;  %v993_v12 = vadd.f32 %v992_v9, %v7411_v37  ;;  %v995_v15 = vadd.f32 %v994_v14, %v7421_v42  ;;  %v996_v16 = vpop.f32.mrb[58].mxu1 }
 0x179   : > { %v1135_v40 = vmax.f32 %v814_v20, 0.0  ;;  %v1121_v3 = vmax.f32 %v987_v58, 0.0  ;;  %v7738_v8 = vpack.c.bf16 %v1122_v1, %v1118_v61  ;;  %v997_v20 = vadd.f32 %v996_v16, %v7411_v37  ;;  %v998_v23 = vpop.f32.mrb[59].mxu1 }
 0x17a   : > { %v1136_v50 = vmax.f32 %v816_v32, 0.0  ;;  %v1125_v18 = vmax.f32 %v993_v12, 0.0  ;;  %v1126_v31 = vmax.f32 %v995_v15, 0.0  ;;  %v999_v32 = vadd.f32 %v998_v23, %v7421_v42 }
 0x17b   : > { %v1199_v60 = vpack.c.bf16 %v1135_v40, %v1131_v39  ;;  %v7736_v4 = vpack.c.bf16 %v1121_v3, %v1117_v52  ;;  %v1129_v35 = vmax.f32 %v997_v20, 0.0  ;;  %v1002_v40 = vpop.f32.mrb[60].mxu1 }
 0x17c   : > { %v1200_v63 = vpack.c.bf16 %v1136_v50, %v1132_v48  ;;  %v1130_v36 = vmax.f32 %v999_v32, 0.0  ;;  %v1003_v44 = vadd.f32 %v1002_v40, %v7411_v37  ;;  %v1004_v46 = vpop.f32.mrb[61].mxu1 }
 0x17d   : > { %v7746_v39 = vpack.c.bf16 %v1129_v35, %v1125_v18  ;;  %v1005_v48 = vadd.f32 %v1004_v46, %v7421_v42  ;;  %v1006_v50 = vpop.f32.mrb[62].mxu1 }
 0x17e   : > { %2175 = vmatprep.mubr.bf16.mxu0 %v1200_v63  ;;  %2561 = vmatprep.mubr.bf16.mxu1 %v1200_v63  ;;  %v1133_v52 = vmax.f32 %v1003_v44, 0.0  ;;  %v1007_v58 = vadd.f32 %v1006_v50, %v7411_v37  ;;  %v1008_v56 = vpop.f32.mrb[63].mxu1  ;;  %v1331_v37 = vld [vmem:[%s8997_s4] sm:$0xf] }
 0x17f   : > { %2176 = vmatmul.mubr.bf16.gmra.mrb[124].mxu0 %v1199_v60  ;;  %2562 = vmatmul.mubr.bf16.gmra.mrb[124].mxu1 %v1199_v60  ;;  %v1134_v60 = vmax.f32 %v1005_v48, 0.0 }
 0x180   : > { %2218 = vmatprep.mubr.bf16.mxu0 %v7462_v26  ;;  %2604 = vmatprep.mubr.bf16.mxu1 %v7462_v26  ;;  %v7750_v26 = vpack.c.bf16 %v1130_v36, %v1126_v31  ;;  %v1137_v61 = vmax.f32 %v1007_v58, 0.0 }
 0x182   : > { %v1201_v63 = vpack.c.bf16 %v1137_v61, %v1133_v52 }
 0x187   : > { %2219 = vmatmul.mubr.bf16.vlgmr.msra.gmra.mrb[64].mxu0 %v7456_v21  ;;  %2605 = vmatmul.mubr.bf16.vlgmr.msra.gmra.mrb[64].mxu1 %v7456_v21  ;;  %v1009_v21 = vadd.f32 %v1008_v56, %v7421_v42  ;;  %v7816_v42 = vrot.slane %v1331_v37, %v7352_v55 }
 0x188   : > { %2228 = vmatprep.mubr.bf16.mxu0 %v7498_v7  ;;  %2614 = vmatprep.mubr.bf16.mxu1 %v7498_v7 }
 0x189   : > { %v1138_v62 = vmax.f32 %v1009_v21, 0.0 }
 0x18b   : > { %v1202_v7 = vpack.c.bf16 %v1138_v62, %v1134_v60 }
 0x18f   : > { %2229 = vmatmul.mubr.bf16.gmra.mrb[68].mxu0 %v7492_v2  ;;  %2615 = vmatmul.mubr.bf16.gmra.mrb[68].mxu1 %v7492_v2  ;;  %v7819_v2 = vrot.slane %v1331_v37, %v7396_v25 }
 0x190   : > { %2238 = vmatprep.mubr.bf16.mxu0 %v7534_v49  ;;  %2624 = vmatprep.mubr.bf16.mxu1 %v7534_v49  ;;  %v7825_v49 = vrot.slane %v1331_v37, %v7358_v57 }
 0x197   : > { %2239 = vmatmul.mubr.bf16.gmra.mrb[72].mxu0 %v7528_v45  ;;  %2625 = vmatmul.mubr.bf16.gmra.mrb[72].mxu1 %v7528_v45  ;;  %v2893_v45 = vld [vmem:[%s8998_s5] sm:$0xf] }
 0x198   : > { %2248 = vmatprep.mubr.bf16.mxu0 %v7570_v33  ;;  %2634 = vmatprep.mubr.bf16.mxu1 %v7570_v33  ;;  %v7851_v15 = vrot.slane %v2893_v45, %v7402_v29 }
 0x19f   : > { %2249 = vmatmul.mubr.bf16.gmra.mrb[76].mxu0 %v7564_v28  ;;  %2635 = vmatmul.mubr.bf16.gmra.mrb[76].mxu1 %v7564_v28 }
 0x1a0   : > { %2258 = vmatprep.mubr.bf16.mxu0 %v7606_v17  ;;  %2644 = vmatprep.mubr.bf16.mxu1 %v7606_v17 }
 0x1a7   : > { %2259 = vmatmul.mubr.bf16.gmra.mrb[80].mxu0 %v7600_v13  ;;  %2645 = vmatmul.mubr.bf16.gmra.mrb[80].mxu1 %v7600_v13  ;;  %v7828_v13 = vrot.slane %v1331_v37, %v7402_v29 }
 0x1a8   : > { %2268 = vmatprep.mubr.bf16.mxu0 %v7639_v5  ;;  %2654 = vmatprep.mubr.bf16.mxu1 %v7639_v5 }
 0x1af   : > { %2269 = vmatmul.mubr.bf16.gmra.mrb[84].mxu0 %v7636_v0  ;;  %2655 = vmatmul.mubr.bf16.gmra.mrb[84].mxu1 %v7636_v0  ;;  %v7832_v0 = vrot.slane %v2893_v45, %v7352_v55 }
 0x1b0   : > { %2278 = vmatprep.mubr.bf16.mxu0 %v7657_v47  ;;  %2664 = vmatprep.mubr.bf16.mxu1 %v7657_v47 }
 0x1b7   : > { %2279 = vmatmul.mubr.bf16.gmra.mrb[88].mxu0 %v7654_v43  ;;  %2665 = vmatmul.mubr.bf16.gmra.mrb[88].mxu1 %v7654_v43 }
 0x1b8   : > { %2288 = vmatprep.mubr.bf16.mxu0 %v7669_v27  ;;  %2674 = vmatprep.mubr.bf16.mxu1 %v7669_v27  ;;  %v7837_v27 = vrot.slane %v2893_v45, %v7358_v57 }
 0x1bf   : > { %2289 = vmatmul.mubr.bf16.gmra.mrb[92].mxu0 %v7666_v22  ;;  %2675 = vmatmul.mubr.bf16.gmra.mrb[92].mxu1 %v7666_v22 }
 0x1c0   : > { %2298 = vmatprep.mubr.bf16.mxu0 %v7681_v10  ;;  %2684 = vmatprep.mubr.bf16.mxu1 %v7681_v10 }
 0x1c7   : > { %2299 = vmatmul.mubr.bf16.gmra.mrb[96].mxu0 %v7678_v6  ;;  %2685 = vmatmul.mubr.bf16.gmra.mrb[96].mxu1 %v7678_v6 }
 0x1c8   : > { %2308 = vmatprep.mubr.bf16.mxu0 %v7693_v59  ;;  %2694 = vmatprep.mubr.bf16.mxu1 %v7693_v59  ;;  %v7840_v59 = vrot.slane %v2893_v45, %v7396_v25 }
 0x1cf   : > { %2309 = vmatmul.mubr.bf16.gmra.mrb[100].mxu0 %v7690_v51  ;;  %2695 = vmatmul.mubr.bf16.gmra.mrb[100].mxu1 %v7690_v51 }
 0x1d0   : > { %2318 = vmatprep.mubr.bf16.mxu0 %v7705_v41  ;;  %2704 = vmatprep.mubr.bf16.mxu1 %v7705_v41 }
 0x1d7   : > { %2319 = vmatmul.mubr.bf16.gmra.mrb[104].mxu0 %v7702_v38  ;;  %2705 = vmatmul.mubr.bf16.gmra.mrb[104].mxu1 %v7702_v38 }
 0x1d8   : > { %2328 = vmatprep.mubr.bf16.mxu0 %v7717_v34  ;;  %2714 = vmatprep.mubr.bf16.mxu1 %v7717_v34 }
 0x1df   : > { %2329 = vmatmul.mubr.bf16.gmra.mrb[108].mxu0 %v7714_v30  ;;  %2715 = vmatmul.mubr.bf16.gmra.mrb[108].mxu1 %v7714_v30 }
 0x1e0   : > { %2338 = vmatprep.mubr.bf16.mxu0 %v7729_v24  ;;  %2724 = vmatprep.mubr.bf16.mxu1 %v7729_v24 }
 0x1e7   : > { %2339 = vmatmul.mubr.bf16.gmra.mrb[112].mxu0 %v7726_v19  ;;  %2725 = vmatmul.mubr.bf16.gmra.mrb[112].mxu1 %v7726_v19 }
 0x1e8   : > { %2348 = vmatprep.mubr.bf16.mxu0 %v7738_v8  ;;  %2734 = vmatprep.mubr.bf16.mxu1 %v7738_v8 }
 0x1ef   : > { %2349 = vmatmul.mubr.bf16.gmra.mrb[116].mxu0 %v7736_v4  ;;  %2735 = vmatmul.mubr.bf16.gmra.mrb[116].mxu1 %v7736_v4 }
 0x1f0   : > { %2358 = vmatprep.mubr.bf16.mxu0 %v7750_v26  ;;  %2744 = vmatprep.mubr.bf16.mxu1 %v7750_v26 }
 0x1f7   : > { %2359 = vmatmul.mubr.bf16.gmra.mrb[120].mxu0 %v7746_v39  ;;  %2745 = vmatmul.mubr.bf16.gmra.mrb[120].mxu1 %v7746_v39 }
 0x1f8   : > { %2368 = vmatprep.mubr.bf16.mxu0 %v1202_v7  ;;  %2754 = vmatprep.mubr.bf16.mxu1 %v1202_v7 }
 0x1ff   : > { %2369 = vmatmul.mubr.bf16.gmra.mrb[124].mxu0 %v1201_v63  ;;  %2755 = vmatmul.mubr.bf16.gmra.mrb[124].mxu1 %v1201_v63 }
 0x25a   : > { %v2220_v28 = vpop.f32.mrb[64].mxu0  ;;  %v2606_v33 = vpop.f32.mrb[64].mxu1 }
 0x25b   : > { %v6412_v17 = vadd.f32 %v2220_v28, %v7816_v42  ;;  %v6476_v5 = vadd.f32 %v2606_v33, %v7819_v2  ;;  %v2222_v43 = vpop.f32.mrb[65].mxu0  ;;  %v2608_v47 = vpop.f32.mrb[65].mxu1 }
 0x25c   : > { %v6413_v22 = vadd.f32 %v2222_v43, %v7825_v49  ;;  %v2224_v6 = vpop.f32.mrb[66].mxu0  ;;  %v2610_v10 = vpop.f32.mrb[66].mxu1  ;;  %v6477_v24 = vadd.f32 %v2608_v47, %v7828_v13 }
 0x25d   : > { %v2765_v51 = vmax.f32 %v6412_v17, 0.0  ;;  %v6414_v38 = vadd.f32 %v2224_v6, %v7816_v42  ;;  %v2226_v41 = vpop.f32.mrb[67].mxu0  ;;  %v2612_v30 = vpop.f32.mrb[67].mxu1  ;;  %v2767_v34 = vmax.f32 %v6476_v5, 0.0  ;;  %v6478_v8 = vadd.f32 %v2610_v10, %v7819_v2 }
 0x25e   : > { %v2766_v19 = vmax.f32 %v6413_v22, 0.0  ;;  %v6415_v3 = vadd.f32 %v2226_v41, %v7825_v49  ;;  %v6479_v12 = vadd.f32 %v2612_v30, %v7828_v13  ;;  %v2768_v18 = vmax.f32 %v6477_v24, 0.0 }
 0x25f   : > { %v2915_v1 = vmul.f32 %v7832_v0, %v2765_v51  ;;  %v2769_v4 = vmax.f32 %v6414_v38, 0.0  ;;  %v2917_v16 = vmul.f32 %v7840_v59, %v2767_v34  ;;  %v2771_v35 = vmax.f32 %v6478_v8, 0.0 }
 0x260   : > { %v2916_v9 = vmul.f32 %v7837_v27, %v2766_v19  ;;  %v2770_v11 = vmax.f32 %v6415_v3, 0.0  ;;  %v2772_v46 = vmax.f32 %v6479_v12, 0.0  ;;  %v2918_v45 = vmul.f32 %v7851_v15, %v2768_v18 }
 0x261   : > { %v2919_v14 = vmul.f32 %v7832_v0, %v2769_v4  ;;  %v2921_v28 = vmul.f32 %v7840_v59, %v2771_v35 }
 0x262   : > { %v2920_v20 = vmul.f32 %v7837_v27, %v2770_v11  ;;  %v2230_v23 = vpop.f32.mrb[68].mxu0  ;;  %v2616_v31 = vpop.f32.mrb[68].mxu1  ;;  %v3043_v32 = vadd.f32 %v2916_v9, %v2915_v1  ;;  %v2922_v43 = vmul.f32 %v7851_v15, %v2772_v46 }
 0x263   : > { %v6416_v36 = vadd.f32 %v2230_v23, %v7816_v42  ;;  %v6480_v39 = vadd.f32 %v2616_v31, %v7819_v2  ;;  %v2232_v26 = vpop.f32.mrb[69].mxu0  ;;  %v2618_v40 = vpop.f32.mrb[69].mxu1 }
 0x264   : > { %v3048_v44 = vadd.f32 %v2920_v20, %v2919_v14  ;;  %v6417_v48 = vadd.f32 %v2232_v26, %v7825_v49  ;;  %v2234_v50 = vpop.f32.mrb[70].mxu0  ;;  %v2620_v52 = vpop.f32.mrb[70].mxu1  ;;  %v3044_v58 = vadd.f32 %v3043_v32, %v2917_v16  ;;  %v6481_v60 = vadd.f32 %v2618_v40, %v7828_v13 }
 0x265   : > { %v2773_v56 = vmax.f32 %v6416_v36, 0.0  ;;  %v6418_v21 = vadd.f32 %v2234_v50, %v7816_v42  ;;  %v2236_v61 = vpop.f32.mrb[71].mxu0  ;;  %v2622_v62 = vpop.f32.mrb[71].mxu1  ;;  %v2775_v63 = vmax.f32 %v6480_v39, 0.0  ;;  %v6482_v5 = vadd.f32 %v2620_v52, %v7819_v2 }
 0x266   : > { %v2774_v7 = vmax.f32 %v6417_v48, 0.0  ;;  %v6419_v37 = vadd.f32 %v2236_v61, %v7825_v49  ;;  %v6483_v6 = vadd.f32 %v2622_v62, %v7828_v13  ;;  %v2776_v10 = vmax.f32 %v6481_v60, 0.0 }
 0x267   : > { %v2923_v33 = vmul.f32 %v7832_v0, %v2773_v56  ;;  %v2777_v17 = vmax.f32 %v6418_v21, 0.0  ;;  %v3045_v38 = vadd.f32 %v3044_v58, %v2918_v45  ;;  %v3049_v41 = vadd.f32 %v3048_v44, %v2921_v28 }
 0x268   : > { %v2924_v47 = vmul.f32 %v7837_v27, %v2774_v7  ;;  %v2778_v22 = vmax.f32 %v6419_v37, 0.0  ;;  %v2925_v30 = vmul.f32 %v7840_v59, %v2775_v63  ;;  %v2779_v1 = vmax.f32 %v6482_v5, 0.0 }
 0x269   : > { %v2927_v51 = vmul.f32 %v7832_v0, %v2777_v17  ;;  %3046 = vadd.xlane.f32.xlu0 %v3045_v38  ;;  %v3050_v12 = vadd.f32 %v3049_v41, %v2922_v43  ;;  %v2780_v16 = vmax.f32 %v6483_v6, 0.0  ;;  %v2926_v32 = vmul.f32 %v7851_v15, %v2776_v10 }
 0x26a   : > { %v3053_v34 = vadd.f32 %v2924_v47, %v2923_v33  ;;  %v2928_v19 = vmul.f32 %v7837_v27, %v2778_v22  ;;  %v2240_v24 = vpop.f32.mrb[72].mxu0  ;;  %v2626_v3 = vpop.f32.mrb[72].mxu1  ;;  %v2929_v52 = vmul.f32 %v7840_v59, %v2779_v1 }
 0x26b   : > { %v6420_v4 = vadd.f32 %v2240_v24, %v7816_v42  ;;  %v6484_v8 = vadd.f32 %v2626_v3, %v7819_v2  ;;  %v2242_v9 = vpop.f32.mrb[73].mxu0  ;;  %v2628_v11 = vpop.f32.mrb[73].mxu1  ;;  %v2930_v21 = vmul.f32 %v7851_v15, %v2780_v16 }
 0x26c   : > { %v3058_v14 = vadd.f32 %v2928_v19, %v2927_v51  ;;  %v6421_v18 = vadd.f32 %v2242_v9, %v7825_v49  ;;  %v2244_v20 = vpop.f32.mrb[74].mxu0  ;;  %v2630_v23 = vpop.f32.mrb[74].mxu1  ;;  %v3054_v31 = vadd.f32 %v3053_v34, %v2925_v30  ;;  %v6485_v36 = vadd.f32 %v2628_v11, %v7828_v13 }
 0x26d   : > { %v2781_v35 = vmax.f32 %v6420_v4, 0.0  ;;  %v6422_v39 = vadd.f32 %v2244_v20, %v7816_v42  ;;  %v2246_v26 = vpop.f32.mrb[75].mxu0  ;;  %v2632_v40 = vpop.f32.mrb[75].mxu1  ;;  %v2783_v44 = vmax.f32 %v6484_v8, 0.0  ;;  %v6486_v48 = vadd.f32 %v2630_v23, %v7819_v2  ;;  %3051 = vadd.xlane.f32.xlu0 %v3050_v12 }
 0x26e   : > { %v2782_v46 = vmax.f32 %v6421_v18, 0.0  ;;  %v6423_v50 = vadd.f32 %v2246_v26, %v7825_v49  ;;  %v6487_v60 = vadd.f32 %v2632_v40, %v7828_v13  ;;  %v2784_v63 = vmax.f32 %v6485_v36, 0.0 }
 0x26f   : > { %v2931_v58 = vmul.f32 %v7832_v0, %v2781_v35  ;;  %v2785_v56 = vmax.f32 %v6422_v39, 0.0  ;;  %v3055_v37 = vadd.f32 %v3054_v31, %v2926_v32  ;;  %v3059_v45 = vadd.f32 %v3058_v14, %v2929_v52 }
 0x270   : > { %v2932_v61 = vmul.f32 %v7837_v27, %v2782_v46  ;;  %v2786_v62 = vmax.f32 %v6423_v50, 0.0  ;;  %v2933_v28 = vmul.f32 %v7840_v59, %v2783_v44  ;;  %v2787_v17 = vmax.f32 %v6486_v48, 0.0 }
 0x271   : > { %v2935_v7 = vmul.f32 %v7832_v0, %v2785_v56  ;;  %v2788_v22 = vmax.f32 %v6487_v60, 0.0  ;;  %3056 = vadd.xlane.f32.xlu1 %v3055_v37  ;;  %v3060_v41 = vadd.f32 %v3059_v45, %v2930_v21  ;;  %v2934_v12 = vmul.f32 %v7851_v15, %v2784_v63 }
 0x272   : > { %v3063_v33 = vadd.f32 %v2932_v61, %v2931_v58  ;;  %v2936_v5 = vmul.f32 %v7837_v27, %v2786_v62  ;;  %v2250_v43 = vpop.f32.mrb[76].mxu0  ;;  %v2636_v47 = vpop.f32.mrb[76].mxu1  ;;  %v2937_v20 = vmul.f32 %v7840_v59, %v2787_v17 }
 0x273   : > { %v6424_v6 = vadd.f32 %v2250_v43, %v7816_v42  ;;  %v6488_v10 = vadd.f32 %v2636_v47, %v7819_v2  ;;  %v2252_v51 = vpop.f32.mrb[77].mxu0  ;;  %v2638_v38 = vpop.f32.mrb[77].mxu1  ;;  %v2938_v35 = vmul.f32 %v7851_v15, %v2788_v22 }
 0x274   : > { %v3068_v30 = vadd.f32 %v2936_v5, %v2935_v7  ;;  %v6425_v34 = vadd.f32 %v2252_v51, %v7825_v49  ;;  %v6489_v19 = vadd.f32 %v2638_v38, %v7828_v13  ;;  %v2254_v24 = vpop.f32.mrb[78].mxu0  ;;  %v2640_v3 = vpop.f32.mrb[78].mxu1  ;;  %v3064_v1 = vadd.f32 %v3063_v33, %v2933_v28 }
 0x275   : > { %v2789_v4 = vmax.f32 %v6424_v6, 0.0  ;;  %v6426_v8 = vadd.f32 %v2254_v24, %v7816_v42  ;;  %v2256_v9 = vpop.f32.mrb[79].mxu0  ;;  %v2642_v11 = vpop.f32.mrb[79].mxu1  ;;  %v2791_v14 = vmax.f32 %v6488_v10, 0.0  ;;  %v6490_v32 = vadd.f32 %v2640_v3, %v7819_v2  ;;  %3061 = vadd.xlane.f32.xlu1 %v3060_v41 }
 0x276   : > { %v2790_v16 = vmax.f32 %v6425_v34, 0.0  ;;  %v6427_v18 = vadd.f32 %v2256_v9, %v7825_v49  ;;  %v2792_v39 = vmax.f32 %v6489_v19, 0.0  ;;  %v6491_v44 = vadd.f32 %v2642_v11, %v7828_v13 }
 0x277   : > { %v2939_v23 = vmul.f32 %v7832_v0, %v2789_v4  ;;  %v2793_v31 = vmax.f32 %v6426_v8, 0.0  ;;  %v3065_v46 = vadd.f32 %v3064_v1, %v2934_v12  ;;  %v3069_v48 = vadd.f32 %v3068_v30, %v2937_v20 }
 0x278   : > { %v2940_v36 = vmul.f32 %v7837_v27, %v2790_v16  ;;  %v2794_v26 = vmax.f32 %v6427_v18, 0.0  ;;  %v2941_v50 = vmul.f32 %v7840_v59, %v2791_v14  ;;  %v2795_v21 = vmax.f32 %v6490_v32, 0.0 }
 0x279   : > { %v2943_v40 = vmul.f32 %v7832_v0, %v2793_v31  ;;  %3066 = vadd.xlane.f32.xlu0 %v3065_v46  ;;  %v3070_v63 = vadd.f32 %v3069_v48, %v2938_v35  ;;  %v2942_v43 = vmul.f32 %v7851_v15, %v2792_v39  ;;  %v2796_v47 = vmax.f32 %v6491_v44, 0.0 }
 0x27a   : > { %v3073_v52 = vadd.f32 %v2940_v36, %v2939_v23  ;;  %v2944_v58 = vmul.f32 %v7837_v27, %v2794_v26  ;;  %v2260_v56 = vpop.f32.mrb[80].mxu0  ;;  %v2646_v60 = vpop.f32.mrb[80].mxu1  ;;  %v2945_v19 = vmul.f32 %v7840_v59, %v2795_v21 }
 0x27b   : > { %v6428_v61 = vadd.f32 %v2260_v56, %v7816_v42  ;;  %v6492_v62 = vadd.f32 %v2646_v60, %v7819_v2  ;;  %v2262_v7 = vpop.f32.mrb[81].mxu0  ;;  %v2648_v37 = vpop.f32.mrb[81].mxu1  ;;  %3071 = vadd.xlane.f32.xlu1 %v3070_v63  ;;  %v2946_v11 = vmul.f32 %v7851_v15, %v2796_v47 }
 0x27c   : > { %v3078_v45 = vadd.f32 %v2944_v58, %v2943_v40  ;;  %v6429_v28 = vadd.f32 %v2262_v7, %v7825_v49  ;;  %v2264_v33 = vpop.f32.mrb[82].mxu0  ;;  %v2650_v17 = vpop.f32.mrb[82].mxu1  ;;  %v3074_v5 = vadd.f32 %v3073_v52, %v2941_v50  ;;  %v6493_v30 = vadd.f32 %v2648_v37, %v7828_v13 }
 0x27d   : > { %v2797_v22 = vmax.f32 %v6428_v61, 0.0  ;;  %v6430_v6 = vadd.f32 %v2264_v33, %v7816_v42  ;;  %v2266_v10 = vpop.f32.mrb[83].mxu0  ;;  %v2652_v51 = vpop.f32.mrb[83].mxu1  ;;  %v2799_v38 = vmax.f32 %v6492_v62, 0.0  ;;  %v6494_v1 = vadd.f32 %v2650_v17, %v7819_v2 }
 0x27e   : > { %v2798_v41 = vmax.f32 %v6429_v28, 0.0  ;;  %v6431_v34 = vadd.f32 %v2266_v10, %v7825_v49  ;;  %v6495_v9 = vadd.f32 %v2652_v51, %v7828_v13  ;;  %v3075_v14 = vadd.f32 %v3074_v5, %v2942_v43 }
 0x27f   : > { %v2947_v24 = vmul.f32 %v7832_v0, %v2797_v22  ;;  %v2801_v3 = vmax.f32 %v6430_v6, 0.0  ;;  %v3079_v16 = vadd.f32 %v3078_v45, %v2945_v19  ;;  %v2949_v18 = vmul.f32 %v7840_v59, %v2799_v38 }
 0x280   : > { %v2948_v4 = vmul.f32 %v7837_v27, %v2798_v41  ;;  %v2802_v8 = vmax.f32 %v6431_v34, 0.0  ;;  %v2800_v23 = vmax.f32 %v6493_v30, 0.0  ;;  %v2803_v36 = vmax.f32 %v6494_v1, 0.0  ;;  %3076 = vadd.xlane.f32.xlu0 %v3075_v14 }
 0x281   : > { %v2951_v12 = vmul.f32 %v7832_v0, %v2801_v3  ;;  %v3080_v40 = vadd.f32 %v3079_v16, %v2946_v11  ;;  %v2804_v50 = vmax.f32 %v6495_v9, 0.0 }
 0x282   : > { %v3083_v20 = vadd.f32 %v2948_v4, %v2947_v24  ;;  %v2952_v31 = vmul.f32 %v7837_v27, %v2802_v8  ;;  %v2270_v32 = vpop.f32.mrb[84].mxu0  ;;  %v2656_v35 = vpop.f32.mrb[84].mxu1  ;;  %v2950_v37 = vmul.f32 %v7851_v15, %v2800_v23  ;;  %v2953_v17 = vmul.f32 %v7840_v59, %v2803_v36 }
 0x283   : > { %v6432_v39 = vadd.f32 %v2270_v32, %v7816_v42  ;;  %v6496_v26 = vadd.f32 %v2656_v35, %v7819_v2  ;;  %v2272_v44 = vpop.f32.mrb[85].mxu0  ;;  %v2658_v46 = vpop.f32.mrb[85].mxu1  ;;  %3081 = vadd.xlane.f32.xlu1 %v3080_v40  ;;  %v2954_v22 = vmul.f32 %v7851_v15, %v2804_v50 }
 0x284   : > { %v3088_v48 = vadd.f32 %v2952_v31, %v2951_v12  ;;  %v6433_v52 = vadd.f32 %v2272_v44, %v7825_v49  ;;  %v2274_v58 = vpop.f32.mrb[86].mxu0  ;;  %v2660_v56 = vpop.f32.mrb[86].mxu1  ;;  %v3084_v60 = vadd.f32 %v3083_v20, %v2949_v18  ;;  %v6497_v61 = vadd.f32 %v2658_v46, %v7828_v13 }
 0x285   : > { %v2805_v21 = vmax.f32 %v6432_v39, 0.0  ;;  %v6434_v62 = vadd.f32 %v2274_v58, %v7816_v42  ;;  %v2276_v63 = vpop.f32.mrb[87].mxu0  ;;  %v2662_v7 = vpop.f32.mrb[87].mxu1  ;;  %v2807_v45 = vmax.f32 %v6496_v26, 0.0  ;;  %v6498_v47 = vadd.f32 %v2660_v56, %v7819_v2 }
 0x286   : > { %v2806_v28 = vmax.f32 %v6433_v52, 0.0  ;;  %v6435_v33 = vadd.f32 %v2276_v63, %v7825_v49  ;;  %v6499_v51 = vadd.f32 %v2662_v7, %v7828_v13  ;;  %v2808_v38 = vmax.f32 %v6497_v61, 0.0 }
 0x287   : > { %v2955_v5 = vmul.f32 %v7832_v0, %v2805_v21  ;;  %v2809_v43 = vmax.f32 %v6434_v62, 0.0  ;;  %v3085_v30 = vadd.f32 %v3084_v60, %v2950_v37  ;;  %v3089_v34 = vadd.f32 %v3088_v48, %v2953_v17 }
 0x288   : > { %v2956_v6 = vmul.f32 %v7837_v27, %v2806_v28  ;;  %v2810_v10 = vmax.f32 %v6435_v33, 0.0  ;;  %v2957_v19 = vmul.f32 %v7840_v59, %v2807_v45  ;;  %v2811_v8 = vmax.f32 %v6498_v47, 0.0 }
 0x289   : > { %v2959_v41 = vmul.f32 %v7832_v0, %v2809_v43  ;;  %3086 = vadd.xlane.f32.xlu0 %v3085_v30  ;;  %v3090_v12 = vadd.f32 %v3089_v34, %v2954_v22  ;;  %v2812_v20 = vmax.f32 %v6499_v51, 0.0  ;;  %v2958_v36 = vmul.f32 %v7851_v15, %v2808_v38 }
 0x28a   : > { %v3093_v24 = vadd.f32 %v2956_v6, %v2955_v5  ;;  %v2960_v3 = vmul.f32 %v7837_v27, %v2810_v10  ;;  %v2280_v1 = vpop.f32.mrb[88].mxu0  ;;  %v2666_v4 = vpop.f32.mrb[88].mxu1  ;;  %v2961_v56 = vmul.f32 %v7840_v59, %v2811_v8 }
 0x28b   : > { %v6436_v9 = vadd.f32 %v2280_v1, %v7816_v42  ;;  %v6500_v11 = vadd.f32 %v2666_v4, %v7819_v2  ;;  %v2282_v14 = vpop.f32.mrb[89].mxu0  ;;  %v2668_v16 = vpop.f32.mrb[89].mxu1  ;;  %3091 = vadd.xlane.f32.xlu1 %v3090_v12  ;;  %v2962_v62 = vmul.f32 %v7851_v15, %v2812_v20 }
 0x28c   : > { %v3098_v18 = vadd.f32 %v2960_v3, %v2959_v41  ;;  %v6437_v23 = vadd.f32 %v2282_v14, %v7825_v49  ;;  %v2284_v31 = vpop.f32.mrb[90].mxu0  ;;  %v2670_v32 = vpop.f32.mrb[90].mxu1  ;;  %v3094_v35 = vadd.f32 %v3093_v24, %v2957_v19  ;;  %v6501_v26 = vadd.f32 %v2668_v16, %v7828_v13 }
 0x28d   : > { %v2813_v39 = vmax.f32 %v6436_v9, 0.0  ;;  %v6438_v40 = vadd.f32 %v2284_v31, %v7816_v42  ;;  %v2286_v44 = vpop.f32.mrb[91].mxu0  ;;  %v2672_v46 = vpop.f32.mrb[91].mxu1  ;;  %v2815_v48 = vmax.f32 %v6500_v11, 0.0  ;;  %v6502_v52 = vadd.f32 %v2670_v32, %v7819_v2 }
 0x28e   : > { %v2814_v50 = vmax.f32 %v6437_v23, 0.0  ;;  %v6439_v58 = vadd.f32 %v2286_v44, %v7825_v49  ;;  %v6503_v61 = vadd.f32 %v2672_v46, %v7828_v13  ;;  %v2816_v37 = vmax.f32 %v6501_v26, 0.0 }
 0x28f   : > { %v2963_v60 = vmul.f32 %v7832_v0, %v2813_v39  ;;  %v2817_v21 = vmax.f32 %v6438_v40, 0.0  ;;  %v3095_v28 = vadd.f32 %v3094_v35, %v2958_v36  ;;  %v3099_v33 = vadd.f32 %v3098_v18, %v2961_v56 }
 0x290   : > { %v2964_v63 = vmul.f32 %v7837_v27, %v2814_v50  ;;  %v2818_v7 = vmax.f32 %v6439_v58, 0.0  ;;  %v2965_v17 = vmul.f32 %v7840_v59, %v2815_v48  ;;  %v2819_v43 = vmax.f32 %v6502_v52, 0.0 }
 0x291   : > { %v2967_v45 = vmul.f32 %v7832_v0, %v2817_v21  ;;  %v2820_v10 = vmax.f32 %v6503_v61, 0.0  ;;  %3096 = vadd.xlane.f32.xlu0 %v3095_v28  ;;  %v3100_v41 = vadd.f32 %v3099_v33, %v2962_v62  ;;  %v2966_v16 = vmul.f32 %v7851_v15, %v2816_v37 }
 0x292   : > { %v3103_v5 = vadd.f32 %v2964_v63, %v2963_v60  ;;  %v2968_v47 = vmul.f32 %v7837_v27, %v2818_v7  ;;  %v2290_v22 = vpop.f32.mrb[92].mxu0  ;;  %v2676_v6 = vpop.f32.mrb[92].mxu1  ;;  %v2969_v31 = vmul.f32 %v7840_v59, %v2819_v43 }
 0x293   : > { %v6440_v51 = vadd.f32 %v2290_v22, %v7816_v42  ;;  %v6504_v38 = vadd.f32 %v2676_v6, %v7819_v2  ;;  %v2292_v30 = vpop.f32.mrb[93].mxu0  ;;  %v2678_v34 = vpop.f32.mrb[93].mxu1  ;;  %3101 = vadd.xlane.f32.xlu1 %v3100_v41  ;;  %v2970_v39 = vmul.f32 %v7851_v15, %v2820_v10 }
 0x294   : > { %v3108_v19 = vadd.f32 %v2968_v47, %v2967_v45  ;;  %v6441_v24 = vadd.f32 %v2292_v30, %v7825_v49  ;;  %v6505_v3 = vadd.f32 %v2678_v34, %v7828_v13  ;;  %v2294_v1 = vpop.f32.mrb[94].mxu0  ;;  %v2680_v4 = vpop.f32.mrb[94].mxu1  ;;  %v3104_v8 = vadd.f32 %v3103_v5, %v2965_v17 }
 0x295   : > { %v2821_v9 = vmax.f32 %v6440_v51, 0.0  ;;  %v6442_v11 = vadd.f32 %v2294_v1, %v7816_v42  ;;  %v2296_v12 = vpop.f32.mrb[95].mxu0  ;;  %v2682_v14 = vpop.f32.mrb[95].mxu1  ;;  %v2823_v18 = vmax.f32 %v6504_v38, 0.0  ;;  %v6506_v36 = vadd.f32 %v2680_v4, %v7819_v2 }
 0x296   : > { %v2822_v20 = vmax.f32 %v6441_v24, 0.0  ;;  %v6443_v23 = vadd.f32 %v2296_v12, %v7825_v49  ;;  %v2824_v40 = vmax.f32 %v6505_v3, 0.0  ;;  %v6507_v48 = vadd.f32 %v2682_v14, %v7828_v13 }
 0x297   : > { %v2971_v32 = vmul.f32 %v7832_v0, %v2821_v9  ;;  %v2825_v35 = vmax.f32 %v6442_v11, 0.0  ;;  %v3105_v50 = vadd.f32 %v3104_v8, %v2966_v16  ;;  %v3109_v52 = vadd.f32 %v3108_v19, %v2969_v31 }
 0x298   : > { %v2972_v26 = vmul.f32 %v7837_v27, %v2822_v20  ;;  %v2826_v44 = vmax.f32 %v6443_v23, 0.0  ;;  %v2973_v58 = vmul.f32 %v7840_v59, %v2823_v18  ;;  %v2827_v62 = vmax.f32 %v6506_v36, 0.0 }
 0x299   : > { %v2975_v46 = vmul.f32 %v7832_v0, %v2825_v35  ;;  %3106 = vadd.xlane.f32.xlu0 %v3105_v50  ;;  %v3110_v37 = vadd.f32 %v3109_v52, %v2970_v39  ;;  %v2974_v22 = vmul.f32 %v7851_v15, %v2824_v40  ;;  %v2828_v6 = vmax.f32 %v6507_v48, 0.0 }
 0x29a   : > { %v3113_v56 = vadd.f32 %v2972_v26, %v2971_v32  ;;  %v2976_v60 = vmul.f32 %v7837_v27, %v2826_v44  ;;  %v2300_v21 = vpop.f32.mrb[96].mxu0  ;;  %v2686_v61 = vpop.f32.mrb[96].mxu1  ;;  %v2977_v3 = vmul.f32 %v7840_v59, %v2827_v62 }
 0x29b   : > { %v6444_v63 = vadd.f32 %v2300_v21, %v7816_v42  ;;  %v6508_v7 = vadd.f32 %v2686_v61, %v7819_v2  ;;  %v2302_v45 = vpop.f32.mrb[97].mxu0  ;;  %v2688_v28 = vpop.f32.mrb[97].mxu1  ;;  %3111 = vadd.xlane.f32.xlu1 %v3110_v37  ;;  %v2978_v14 = vmul.f32 %v7851_v15, %v2828_v6 }
 0x29c   : > { %v3118_v33 = vadd.f32 %v2976_v60, %v2975_v46  ;;  %v6445_v17 = vadd.f32 %v2302_v45, %v7825_v49  ;;  %v2304_v5 = vpop.f32.mrb[98].mxu0  ;;  %v2690_v43 = vpop.f32.mrb[98].mxu1  ;;  %v3114_v47 = vadd.f32 %v3113_v56, %v2973_v58  ;;  %v6509_v19 = vadd.f32 %v2688_v28, %v7828_v13 }
 0x29d   : > { %v2829_v10 = vmax.f32 %v6444_v63, 0.0  ;;  %v6446_v51 = vadd.f32 %v2304_v5, %v7816_v42  ;;  %v2306_v38 = vpop.f32.mrb[99].mxu0  ;;  %v2692_v41 = vpop.f32.mrb[99].mxu1  ;;  %v2831_v30 = vmax.f32 %v6508_v7, 0.0  ;;  %v6510_v8 = vadd.f32 %v2690_v43, %v7819_v2 }
 0x29e   : > { %v2830_v34 = vmax.f32 %v6445_v17, 0.0  ;;  %v6447_v24 = vadd.f32 %v2306_v38, %v7825_v49  ;;  %v6511_v12 = vadd.f32 %v2692_v41, %v7828_v13  ;;  %v3115_v18 = vadd.f32 %v3114_v47, %v2974_v22 }
 0x29f   : > { %v2979_v1 = vmul.f32 %v7832_v0, %v2829_v10  ;;  %v2833_v4 = vmax.f32 %v6446_v51, 0.0  ;;  %v3119_v20 = vadd.f32 %v3118_v33, %v2977_v3  ;;  %v2981_v23 = vmul.f32 %v7840_v59, %v2831_v30 }
 0x2a0   : > { %v2980_v9 = vmul.f32 %v7837_v27, %v2830_v34  ;;  %v2834_v11 = vmax.f32 %v6447_v24, 0.0  ;;  %v2832_v32 = vmax.f32 %v6509_v19, 0.0  ;;  %v2835_v26 = vmax.f32 %v6510_v8, 0.0  ;;  %3116 = vadd.xlane.f32.xlu0 %v3115_v18 }
 0x2a1   : > { %v2983_v16 = vmul.f32 %v7832_v0, %v2833_v4  ;;  %v3120_v46 = vadd.f32 %v3119_v20, %v2978_v14  ;;  %v2836_v58 = vmax.f32 %v6511_v12, 0.0 }
 0x2a2   : > { %v3123_v31 = vadd.f32 %v2980_v9, %v2979_v1  ;;  %v2984_v35 = vmul.f32 %v7837_v27, %v2834_v11  ;;  %v2310_v36 = vpop.f32.mrb[100].mxu0  ;;  %v2696_v39 = vpop.f32.mrb[100].mxu1  ;;  %v2982_v28 = vmul.f32 %v7851_v15, %v2832_v32  ;;  %v2985_v43 = vmul.f32 %v7840_v59, %v2835_v26 }
 0x2a3   : > { %v6448_v40 = vadd.f32 %v2310_v36, %v7816_v42  ;;  %v6512_v44 = vadd.f32 %v2696_v39, %v7819_v2  ;;  %v2312_v48 = vpop.f32.mrb[101].mxu0  ;;  %v2698_v50 = vpop.f32.mrb[101].mxu1  ;;  %3121 = vadd.xlane.f32.xlu1 %v3120_v46  ;;  %v2986_v10 = vmul.f32 %v7851_v15, %v2836_v58 }
 0x2a4   : > { %v3128_v52 = vadd.f32 %v2984_v35, %v2983_v16  ;;  %v6449_v56 = vadd.f32 %v2312_v48, %v7825_v49  ;;  %v2314_v60 = vpop.f32.mrb[102].mxu0  ;;  %v2700_v21 = vpop.f32.mrb[102].mxu1  ;;  %v3124_v61 = vadd.f32 %v3123_v31, %v2981_v23  ;;  %v6513_v63 = vadd.f32 %v2698_v50, %v7828_v13 }
 0x2a5   : > { %v2837_v62 = vmax.f32 %v6448_v40, 0.0  ;;  %v6450_v7 = vadd.f32 %v2314_v60, %v7816_v42  ;;  %v2316_v37 = vpop.f32.mrb[103].mxu0  ;;  %v2702_v45 = vpop.f32.mrb[103].mxu1  ;;  %v2839_v33 = vmax.f32 %v6512_v44, 0.0  ;;  %v6514_v6 = vadd.f32 %v2700_v21, %v7819_v2 }
 0x2a6   : > { %v2838_v17 = vmax.f32 %v6449_v56, 0.0  ;;  %v6451_v5 = vadd.f32 %v2316_v37, %v7825_v49  ;;  %v6515_v41 = vadd.f32 %v2702_v45, %v7828_v13  ;;  %v2840_v30 = vmax.f32 %v6513_v63, 0.0 }
 0x2a7   : > { %v2987_v47 = vmul.f32 %v7832_v0, %v2837_v62  ;;  %v2841_v22 = vmax.f32 %v6450_v7, 0.0  ;;  %v3125_v19 = vadd.f32 %v3124_v61, %v2982_v28  ;;  %v3129_v24 = vadd.f32 %v3128_v52, %v2985_v43 }
 0x2a8   : > { %v2988_v51 = vmul.f32 %v7837_v27, %v2838_v17  ;;  %v2842_v38 = vmax.f32 %v6451_v5, 0.0  ;;  %v2989_v3 = vmul.f32 %v7840_v59, %v2839_v33  ;;  %v2843_v11 = vmax.f32 %v6514_v6, 0.0 }
 0x2a9   : > { %v2991_v34 = vmul.f32 %v7832_v0, %v2841_v22  ;;  %3126 = vadd.xlane.f32.xlu0 %v3125_v19  ;;  %v3130_v16 = vadd.f32 %v3129_v24, %v2986_v10  ;;  %v2844_v31 = vmax.f32 %v6515_v41, 0.0  ;;  %v2990_v26 = vmul.f32 %v7851_v15, %v2840_v30 }
 0x2aa   : > { %v3133_v1 = vadd.f32 %v2988_v51, %v2987_v47  ;;  %v2992_v4 = vmul.f32 %v7837_v27, %v2842_v38  ;;  %v2320_v8 = vpop.f32.mrb[104].mxu0  ;;  %v2706_v9 = vpop.f32.mrb[104].mxu1  ;;  %v2993_v21 = vmul.f32 %v7840_v59, %v2843_v11 }
 0x2ab   : > { %v6452_v12 = vadd.f32 %v2320_v8, %v7816_v42  ;;  %v6516_v14 = vadd.f32 %v2706_v9, %v7819_v2  ;;  %v2322_v18 = vpop.f32.mrb[105].mxu0  ;;  %v2708_v20 = vpop.f32.mrb[105].mxu1  ;;  %3131 = vadd.xlane.f32.xlu1 %v3130_v16  ;;  %v2994_v7 = vmul.f32 %v7851_v15, %v2844_v31 }
 0x2ac   : > { %v3138_v23 = vadd.f32 %v2992_v4, %v2991_v34  ;;  %v6453_v32 = vadd.f32 %v2322_v18, %v7825_v49  ;;  %v2324_v35 = vpop.f32.mrb[106].mxu0  ;;  %v2710_v36 = vpop.f32.mrb[106].mxu1  ;;  %v3134_v39 = vadd.f32 %v3133_v1, %v2989_v3  ;;  %v6517_v44 = vadd.f32 %v2708_v20, %v7828_v13 }
 0x2ad   : > { %v2845_v40 = vmax.f32 %v6452_v12, 0.0  ;;  %v6454_v46 = vadd.f32 %v2324_v35, %v7816_v42  ;;  %v2326_v48 = vpop.f32.mrb[107].mxu0  ;;  %v2712_v50 = vpop.f32.mrb[107].mxu1  ;;  %v2847_v52 = vmax.f32 %v6516_v14, 0.0  ;;  %v6518_v56 = vadd.f32 %v2710_v36, %v7819_v2 }
 0x2ae   : > { %v2846_v58 = vmax.f32 %v6453_v32, 0.0  ;;  %v6455_v60 = vadd.f32 %v2326_v48, %v7825_v49  ;;  %v6519_v63 = vadd.f32 %v2712_v50, %v7828_v13  ;;  %v2848_v28 = vmax.f32 %v6517_v44, 0.0 }
 0x2af   : > { %v2995_v61 = vmul.f32 %v7832_v0, %v2845_v40  ;;  %v2849_v62 = vmax.f32 %v6454_v46, 0.0  ;;  %v3135_v17 = vadd.f32 %v3134_v39, %v2990_v26  ;;  %v3139_v5 = vadd.f32 %v3138_v23, %v2993_v21 }
 0x2b0   : > { %v2996_v37 = vmul.f32 %v7837_v27, %v2846_v58  ;;  %v2850_v45 = vmax.f32 %v6455_v60, 0.0  ;;  %v2997_v43 = vmul.f32 %v7840_v59, %v2847_v52  ;;  %v2851_v22 = vmax.f32 %v6518_v56, 0.0 }
 0x2b1   : > { %v2999_v33 = vmul.f32 %v7832_v0, %v2849_v62  ;;  %v2852_v38 = vmax.f32 %v6519_v63, 0.0  ;;  %3136 = vadd.xlane.f32.xlu0 %v3135_v17  ;;  %v3140_v34 = vadd.f32 %v3139_v5, %v2994_v7  ;;  %v2998_v20 = vmul.f32 %v7851_v15, %v2848_v28 }
 0x2b2   : > { %v3143_v47 = vadd.f32 %v2996_v37, %v2995_v61  ;;  %v3000_v6 = vmul.f32 %v7837_v27, %v2850_v45  ;;  %v2330_v10 = vpop.f32.mrb[108].mxu0  ;;  %v2716_v51 = vpop.f32.mrb[108].mxu1  ;;  %v3001_v35 = vmul.f32 %v7840_v59, %v2851_v22 }
 0x2b3   : > { %v6456_v41 = vadd.f32 %v2330_v10, %v7816_v42  ;;  %v6520_v30 = vadd.f32 %v2716_v51, %v7819_v2  ;;  %v2332_v19 = vpop.f32.mrb[109].mxu0  ;;  %v2718_v24 = vpop.f32.mrb[109].mxu1  ;;  %3141 = vadd.xlane.f32.xlu1 %v3140_v34  ;;  %v3002_v40 = vmul.f32 %v7851_v15, %v2852_v38 }
 0x2b4   : > { %v3148_v3 = vadd.f32 %v3000_v6, %v2999_v33  ;;  %v6457_v1 = vadd.f32 %v2332_v19, %v7825_v49  ;;  %v6521_v4 = vadd.f32 %v2718_v24, %v7828_v13  ;;  %v2334_v8 = vpop.f32.mrb[110].mxu0  ;;  %v2720_v9 = vpop.f32.mrb[110].mxu1  ;;  %v3144_v11 = vadd.f32 %v3143_v47, %v2997_v43 }
 0x2b5   : > { %v2853_v12 = vmax.f32 %v6456_v41, 0.0  ;;  %v6458_v14 = vadd.f32 %v2334_v8, %v7816_v42  ;;  %v2336_v16 = vpop.f32.mrb[111].mxu0  ;;  %v2722_v18 = vpop.f32.mrb[111].mxu1  ;;  %v2855_v23 = vmax.f32 %v6520_v30, 0.0  ;;  %v6522_v26 = vadd.f32 %v2720_v9, %v7819_v2 }
 0x2b6   : > { %v2854_v31 = vmax.f32 %v6457_v1, 0.0  ;;  %v6459_v32 = vadd.f32 %v2336_v16, %v7825_v49  ;;  %v2856_v46 = vmax.f32 %v6521_v4, 0.0  ;;  %v6523_v52 = vadd.f32 %v2722_v18, %v7828_v13 }
 0x2b7   : > { %v3003_v36 = vmul.f32 %v7832_v0, %v2853_v12  ;;  %v2857_v39 = vmax.f32 %v6458_v14, 0.0  ;;  %v3145_v58 = vadd.f32 %v3144_v11, %v2998_v20  ;;  %v3149_v56 = vadd.f32 %v3148_v3, %v3001_v35 }
 0x2b8   : > { %v3004_v44 = vmul.f32 %v7837_v27, %v2854_v31  ;;  %v2858_v48 = vmax.f32 %v6459_v32, 0.0  ;;  %v3005_v60 = vmul.f32 %v7840_v59, %v2855_v23  ;;  %v2859_v7 = vmax.f32 %v6522_v26, 0.0 }
 0x2b9   : > { %v3007_v50 = vmul.f32 %v7832_v0, %v2857_v39  ;;  %3146 = vadd.xlane.f32.xlu0 %v3145_v58  ;;  %v3150_v28 = vadd.f32 %v3149_v56, %v3002_v40  ;;  %v3006_v10 = vmul.f32 %v7851_v15, %v2856_v46  ;;  %v2860_v51 = vmax.f32 %v6523_v52, 0.0 }
 0x2ba   : > { %v3153_v21 = vadd.f32 %v3004_v44, %v3003_v36  ;;  %v3008_v61 = vmul.f32 %v7837_v27, %v2858_v48  ;;  %v2340_v62 = vpop.f32.mrb[112].mxu0  ;;  %v2726_v63 = vpop.f32.mrb[112].mxu1  ;;  %v3009_v4 = vmul.f32 %v7840_v59, %v2859_v7 }
 0x2bb   : > { %v6460_v37 = vadd.f32 %v2340_v62, %v7816_v42  ;;  %v6524_v45 = vadd.f32 %v2726_v63, %v7819_v2  ;;  %v2342_v33 = vpop.f32.mrb[113].mxu0  ;;  %v2728_v17 = vpop.f32.mrb[113].mxu1  ;;  %3151 = vadd.xlane.f32.xlu1 %v3150_v28  ;;  %v3010_v18 = vmul.f32 %v7851_v15, %v2860_v51 }
 0x2bc   : > { %v3158_v5 = vadd.f32 %v3008_v61, %v3007_v50  ;;  %v6461_v43 = vadd.f32 %v2342_v33, %v7825_v49  ;;  %v2344_v47 = vpop.f32.mrb[114].mxu0  ;;  %v2730_v22 = vpop.f32.mrb[114].mxu1  ;;  %v3154_v6 = vadd.f32 %v3153_v21, %v3005_v60  ;;  %v6525_v3 = vadd.f32 %v2728_v17, %v7828_v13 }
 0x2bd   : > { %v2861_v38 = vmax.f32 %v6460_v37, 0.0  ;;  %v6462_v41 = vadd.f32 %v2344_v47, %v7816_v42  ;;  %v2346_v30 = vpop.f32.mrb[115].mxu0  ;;  %v2732_v34 = vpop.f32.mrb[115].mxu1  ;;  %v2863_v19 = vmax.f32 %v6524_v45, 0.0  ;;  %v6526_v11 = vadd.f32 %v2730_v22, %v7819_v2 }
 0x2be   : > { %v2862_v24 = vmax.f32 %v6461_v43, 0.0  ;;  %v6463_v1 = vadd.f32 %v2346_v30, %v7825_v49  ;;  %v6527_v16 = vadd.f32 %v2732_v34, %v7828_v13  ;;  %v3155_v23 = vadd.f32 %v3154_v6, %v3006_v10 }
 0x2bf   : > { %v3011_v8 = vmul.f32 %v7832_v0, %v2861_v38  ;;  %v2865_v9 = vmax.f32 %v6462_v41, 0.0  ;;  %v3159_v31 = vadd.f32 %v3158_v5, %v3009_v4  ;;  %v3013_v32 = vmul.f32 %v7840_v59, %v2863_v19 }
 0x2c0   : > { %v3012_v12 = vmul.f32 %v7837_v27, %v2862_v24  ;;  %v2866_v14 = vmax.f32 %v6463_v1, 0.0  ;;  %v2864_v36 = vmax.f32 %v6525_v3, 0.0  ;;  %v2867_v44 = vmax.f32 %v6526_v11, 0.0  ;;  %3156 = vadd.xlane.f32.xlu0 %v3155_v23 }
 0x2c1   : > { %v3015_v20 = vmul.f32 %v7832_v0, %v2865_v9  ;;  %v3160_v58 = vadd.f32 %v3159_v31, %v3010_v18  ;;  %v2868_v60 = vmax.f32 %v6527_v16, 0.0 }
 0x2c2   : > { %v3163_v35 = vadd.f32 %v3012_v12, %v3011_v8  ;;  %v3016_v39 = vmul.f32 %v7837_v27, %v2866_v14  ;;  %v2350_v26 = vpop.f32.mrb[116].mxu0  ;;  %v2736_v40 = vpop.f32.mrb[116].mxu1  ;;  %v3014_v17 = vmul.f32 %v7851_v15, %v2864_v36  ;;  %v3017_v22 = vmul.f32 %v7840_v59, %v2867_v44 }
 0x2c3   : > { %v6464_v46 = vadd.f32 %v2350_v26, %v7816_v42  ;;  %v6528_v48 = vadd.f32 %v2736_v40, %v7819_v2  ;;  %v2352_v50 = vpop.f32.mrb[117].mxu0  ;;  %v2738_v52 = vpop.f32.mrb[117].mxu1  ;;  %v3018_v38 = vmul.f32 %v7851_v15, %v2868_v60 }
 0x2c4   : > { %v3168_v56 = vadd.f32 %v3016_v39, %v3015_v20  ;;  %v6465_v21 = vadd.f32 %v2352_v50, %v7825_v49  ;;  %v2354_v61 = vpop.f32.mrb[118].mxu0  ;;  %v2740_v62 = vpop.f32.mrb[118].mxu1  ;;  %v3164_v63 = vadd.f32 %v3163_v35, %v3013_v32  ;;  %v6529_v37 = vadd.f32 %v2738_v52, %v7828_v13  ;;  %3161 = vadd.xlane.f32.xlu0 %v3160_v58 }
 0x2c5   : > { %v2869_v7 = vmax.f32 %v6464_v46, 0.0  ;;  %v6466_v45 = vadd.f32 %v2354_v61, %v7816_v42  ;;  %v2356_v28 = vpop.f32.mrb[119].mxu0  ;;  %v2742_v33 = vpop.f32.mrb[119].mxu1  ;;  %v2871_v5 = vmax.f32 %v6528_v48, 0.0  ;;  %v6530_v51 = vadd.f32 %v2740_v62, %v7819_v2 }
 0x2c6   : > { %v2870_v43 = vmax.f32 %v6465_v21, 0.0  ;;  %v6467_v47 = vadd.f32 %v2356_v28, %v7825_v49  ;;  %v6531_v34 = vadd.f32 %v2742_v33, %v7828_v13  ;;  %v2872_v19 = vmax.f32 %v6529_v37, 0.0 }
 0x2c7   : > { %v3019_v6 = vmul.f32 %v7832_v0, %v2869_v7  ;;  %v2873_v10 = vmax.f32 %v6466_v45, 0.0  ;;  %v3165_v3 = vadd.f32 %v3164_v63, %v3014_v17  ;;  %v3169_v1 = vadd.f32 %v3168_v56, %v3017_v22 }
 0x2c8   : > { %v3020_v41 = vmul.f32 %v7837_v27, %v2870_v43  ;;  %v2874_v30 = vmax.f32 %v6467_v47, 0.0  ;;  %v3021_v4 = vmul.f32 %v7840_v59, %v2871_v5  ;;  %v2875_v14 = vmax.f32 %v6530_v51, 0.0 }
 0x2c9   : > { %v3023_v24 = vmul.f32 %v7832_v0, %v2873_v10  ;;  %3166 = vadd.xlane.f32.xlu0 %v3165_v3  ;;  %v3170_v31 = vadd.f32 %v3169_v1, %v3018_v38  ;;  %v2876_v35 = vmax.f32 %v6531_v34, 0.0  ;;  %v3022_v44 = vmul.f32 %v7851_v15, %v2872_v19 }
 0x2ca   : > { %v3173_v8 = vadd.f32 %v3020_v41, %v3019_v6  ;;  %v3024_v9 = vmul.f32 %v7837_v27, %v2874_v30  ;;  %v2360_v11 = vpop.f32.mrb[120].mxu0  ;;  %v2746_v12 = vpop.f32.mrb[120].mxu1  ;;  %v3025_v61 = vmul.f32 %v7840_v59, %v2875_v14 }
 0x2cb   : > { %v6468_v16 = vadd.f32 %v2360_v11, %v7816_v42  ;;  %v6532_v18 = vadd.f32 %v2746_v12, %v7819_v2  ;;  %v2362_v20 = vpop.f32.mrb[121].mxu0  ;;  %v2748_v23 = vpop.f32.mrb[121].mxu1  ;;  %v3026_v37 = vmul.f32 %v7851_v15, %v2876_v35 }
 0x2cc   : > { %v3178_v32 = vadd.f32 %v3024_v9, %v3023_v24  ;;  %v6469_v36 = vadd.f32 %v2362_v20, %v7825_v49  ;;  %v2364_v39 = vpop.f32.mrb[122].mxu0  ;;  %v2750_v26 = vpop.f32.mrb[122].mxu1  ;;  %v3174_v40 = vadd.f32 %v3173_v8, %v3021_v4  ;;  %v6533_v60 = vadd.f32 %v2748_v23, %v7828_v13 }
 0x2cd   : > { %v2877_v46 = vmax.f32 %v6468_v16, 0.0  ;;  %v6470_v48 = vadd.f32 %v2364_v39, %v7816_v42  ;;  %v2366_v50 = vpop.f32.mrb[123].mxu0  ;;  %v2752_v52 = vpop.f32.mrb[123].mxu1  ;;  %v2879_v58 = vmax.f32 %v6532_v18, 0.0  ;;  %v6534_v7 = vadd.f32 %v2750_v26, %v7819_v2  ;;  %3171 = vadd.xlane.f32.xlu0 %v3170_v31 }
 0x2ce   : > { %v2878_v56 = vmax.f32 %v6469_v36, 0.0  ;;  %v6471_v21 = vadd.f32 %v2366_v50, %v7825_v49  ;;  %v6535_v17 = vadd.f32 %v2752_v52, %v7828_v13  ;;  %v3175_v5 = vadd.f32 %v3174_v40, %v3022_v44 }
 0x2cf   : > { %v3027_v62 = vmul.f32 %v7832_v0, %v2877_v46  ;;  %v2881_v63 = vmax.f32 %v6470_v48, 0.0  ;;  %v3179_v43 = vadd.f32 %v3178_v32, %v3025_v61  ;;  %v3029_v47 = vmul.f32 %v7840_v59, %v2879_v58 }
 0x2d0   : > { %v3028_v45 = vmul.f32 %v7837_v27, %v2878_v56  ;;  %v2882_v28 = vmax.f32 %v6471_v21, 0.0  ;;  %v2880_v6 = vmax.f32 %v6533_v60, 0.0  ;;  %v2883_v41 = vmax.f32 %v6534_v7, 0.0 }
 0x2d1   : > { %v3031_v33 = vmul.f32 %v7832_v0, %v2881_v63  ;;  %3176 = vadd.xlane.f32.xlu0 %v3175_v5  ;;  %v3180_v19 = vadd.f32 %v3179_v43, %v3026_v37  ;;  %v2884_v14 = vmax.f32 %v6535_v17, 0.0  ;;  %v6945_v5 = vmov 1966171168  }
 0x2d2   : > { %v3183_v22 = vadd.f32 %v3028_v45, %v3027_v62  ;;  %v3032_v10 = vmul.f32 %v7837_v27, %v2882_v28  ;;  %v2370_v51 = vpop.f32.mrb[124].mxu0  ;;  %v2756_v38 = vpop.f32.mrb[124].mxu1  ;;  %v3030_v26 = vmul.f32 %v7851_v15, %v2880_v6  ;;  %v3033_v40 = vmul.f32 %v7840_v59, %v2883_v41 }
 0x2d3   : > { %v6472_v30 = vadd.f32 %v2370_v51, %v7816_v42  ;;  %v6536_v34 = vadd.f32 %v2756_v38, %v7819_v2  ;;  %v2372_v24 = vpop.f32.mrb[125].mxu0  ;;  %v2758_v3 = vpop.f32.mrb[125].mxu1  ;;  %3181 = vadd.xlane.f32.xlu1 %v3180_v19  ;;  %v3034_v52 = vmul.f32 %v7851_v15, %v2884_v14  ;;  %v4306_v43 = vunpack.c.l.s4 %v6945_v5 }
 0x2d4   : > { %v3188_v1 = vadd.f32 %v3032_v10, %v3031_v33  ;;  %v6473_v4 = vadd.f32 %v2372_v24, %v7825_v49  ;;  %v6537_v8 = vadd.f32 %v2758_v3, %v7828_v13  ;;  %v2374_v9 = vpop.f32.mrb[126].mxu0  ;;  %v2760_v11 = vpop.f32.mrb[126].mxu1  ;;  %v3184_v12 = vadd.f32 %v3183_v22, %v3029_v47 }
 0x2d5   : > { %v2885_v16 = vmax.f32 %v6472_v30, 0.0  ;;  %v6474_v18 = vadd.f32 %v2374_v9, %v7816_v42  ;;  %v6538_v20 = vadd.f32 %v2760_v11, %v7819_v2  ;;  %v2376_v23 = vpop.f32.mrb[127].mxu0  ;;  %v2762_v31 = vpop.f32.mrb[127].mxu1  ;;  %v2887_v32 = vmax.f32 %v6536_v34, 0.0 }
 0x2d6   : > { %v2886_v35 = vmax.f32 %v6473_v4, 0.0  ;;  %v6475_v36 = vadd.f32 %v2376_v23, %v7825_v49  ;;  %v6539_v39 = vadd.f32 %v2762_v31, %v7828_v13  ;;  %v2888_v42 = vmax.f32 %v6537_v8, 0.0 }
 0x2d7   : > { %v3035_v44 = vmul.f32 %v7832_v0, %v2885_v16  ;;  %v2889_v46 = vmax.f32 %v6474_v18, 0.0  ;;  %v2891_v50 = vmax.f32 %v6538_v20, 0.0  ;;  %v3185_v56 = vadd.f32 %v3184_v12, %v3030_v26 }
 0x2d8   : > { %v3036_v48 = vmul.f32 %v7837_v27, %v2886_v35  ;;  %v2890_v2 = vmax.f32 %v6475_v36, 0.0  ;;  %v3189_v49 = vadd.f32 %v3188_v1, %v3033_v40  ;;  %v3037_v13 = vmul.f32 %v7840_v59, %v2887_v32 }
 0x2d9   : > { %v3039_v58 = vmul.f32 %v7832_v0, %v2889_v46  ;;  %v2892_v61 = vmax.f32 %v6539_v39, 0.0  ;;  %3186 = vadd.xlane.f32.xlu0 %v3185_v56  ;;  %v3038_v63 = vmul.f32 %v7851_v15, %v2888_v42  ;;  %v3041_v7 = vmul.f32 %v7840_v59, %v2891_v50 }
 0x2da   : > { %v3193_v60 = vadd.f32 %v3036_v48, %v3035_v44  ;;  %v3040_v21 = vmul.f32 %v7837_v27, %v2890_v2  ;;  %v3190_v62 = vadd.f32 %v3189_v49, %v3034_v52  ;;  %v3207_v27 = vpop.permute.xlu1 %3206  ;;  %v4307_v47 = vunpack.c.0.s8 %v4306_v43 }
 0x2db   : > { %v3042_v28 = vmul.f32 %v7851_v15, %v2892_v61  ;;  %v8099_v22 = vrot.slane %v3207_v27, %v7352_v55  ;;  %v8102_v59 = vsub.s32 4, %v7349_v54  ;;  %v8105_v10 = vsub.s32 5, %v7349_v54 }
 0x2dc   : > { %v3198_v37 = vadd.f32 %v3040_v21, %v3039_v58  ;;  %v3194_v45 = vadd.f32 %v3193_v60, %v3037_v13  ;;  %v8108_v15 = vsub.s32 6, %v7349_v54  ;;  %v8111_v51 = vsub.s32 7, %v7349_v54 }
 0x2dd   : > { %3191 = vadd.xlane.f32.xlu0 %v3190_v62  ;;  %v8115_v41 = vsub.s32 %v4307_v47, %v7349_v54 }
 0x2de   : > { %v3195_v33 = vadd.f32 %v3194_v45, %v3038_v63  ;;  %v3199_v0 = vadd.f32 %v3198_v37, %v3041_v7 }
 0x2e0   : > { %v3200_v17 = vadd.f32 %v3199_v0, %v3042_v28 }
 0x2e1   : > { %3196 = vadd.xlane.f32.xlu0 %v3195_v33 }
 0x2e5   : > { %3201 = vadd.xlane.f32.xlu0 %v3200_v17 }
 0x2f6   : > { %v3047_v6 = vpop.xlane.xlu0 %3046 }
 0x2f7   : > { %v3213_v38 = vadd.f32 %v8099_v22, %v3047_v6 }
 0x2f9   : > { %v3280_v30 = vrot.slane %v3213_v38, %v7352_v55  ;;  %v3284_v34 = vrot.slane %v3213_v38, %v7358_v57  ;;  %v3288_v19 = vrot.slane %v3213_v38, %v7396_v25  ;;  %v3292_v24 = vrot.slane %v3213_v38, %v7402_v29 }
 0x2fa   : > { %v3052_v3 = vpop.xlane.xlu0 %3051  ;;  %v3296_v1 = vrot.slane %v3213_v38, %v8102_v59  ;;  %v3300_v4 = vrot.slane %v3213_v38, %v8105_v10  ;;  %v3304_v8 = vrot.slane %v3213_v38, %v8108_v15  ;;  %v3308_v9 = vrot.slane %v3213_v38, %v8111_v51 }
 0x2fb   : > { %v3214_v11 = vadd.f32 %v8099_v22, %v3052_v3  ;;  %v4301_v12 = vcombine.low %v3280_v30, %v3284_v34  ;;  %v4302_v14 = vcombine.low %v3288_v19, %v3292_v24 }
 0x2fc   : > { %v4303_v16 = vcombine.low %v3296_v1, %v3300_v4  ;;  %v4304_v18 = vcombine.low %v3304_v8, %v3308_v9 }
 0x2fd   : > { %v4311_v20 = vrot.slane %v4301_v12, %v8115_v41  ;;  %v4318_v23 = vrot.slane %v4302_v14, %v8115_v41  ;;  %v3312_v31 = vrot.slane %v3214_v11, %v7352_v55  ;;  %v3316_v32 = vrot.slane %v3214_v11, %v7358_v57 }
 0x2fe   : > { %v3057_v35 = vpop.xlane.xlu1 %3056  ;;  %v4325_v36 = vrot.slane %v4303_v16, %v8115_v41  ;;  %v4332_v39 = vrot.slane %v4304_v18, %v8115_v41  ;;  %v3320_v26 = vrot.slane %v3214_v11, %v7396_v25  ;;  %v3324_v40 = vrot.slane %v3214_v11, %v7402_v29 }
 0x2ff   : > { %v3215_v44 = vadd.f32 %v8099_v22, %v3057_v35  ;;  %v4333_v46 = vcombine.low %v4311_v20, %v4318_v23  ;;  %v3328_v48 = vrot.slane %v3214_v11, %v8102_v59  ;;  %v3332_v42 = vrot.slane %v3214_v11, %v8105_v10 }
 0x300   : > { %v4334_v50 = vcombine.low %v4325_v36, %v4332_v39  ;;  %v3336_v2 = vrot.slane %v3214_v11, %v8108_v15  ;;  %v3340_v52 = vrot.slane %v3214_v11, %v8111_v51  ;;  %v4350_v58 = vcombine.low %v3312_v31, %v3316_v32 }
 0x301   : > { %v4341_v56 = vrot.slane %v4333_v46, %v8115_v41  ;;  %v4351_v49 = vcombine.low %v3320_v26, %v3324_v40  ;;  %v4352_v13 = vcombine.low %v3328_v48, %v3332_v42  ;;  %v3344_v60 = vrot.slane %v3215_v44, %v7352_v55 }
 0x302   : > { %v3062_v21 = vpop.xlane.xlu1 %3061  ;;  %v4348_v61 = vrot.slane %v4334_v50, %v8115_v41  ;;  %v4353_v62 = vcombine.low %v3336_v2, %v3340_v52  ;;  %v4360_v63 = vrot.slane %v4350_v58, %v8115_v41  ;;  %v3348_v7 = vrot.slane %v3215_v44, %v7358_v57 }
 0x303   : > { %v3216_v37 = vadd.f32 %v8099_v22, %v3062_v21  ;;  %v4367_v45 = vrot.slane %v4351_v49, %v8115_v41  ;;  %v4374_v28 = vrot.slane %v4352_v13, %v8115_v41  ;;  %v3352_v33 = vrot.slane %v3215_v44, %v7396_v25 }
 0x304   : > { %v4349_v0 = vcombine.low %v4341_v56, %v4348_v61  ;;  %v4381_v17 = vrot.slane %v4353_v62, %v8115_v41  ;;  %v3356_v5 = vrot.slane %v3215_v44, %v7402_v29  ;;  %v3360_v43 = vrot.slane %v3215_v44, %v8102_v59 }
 0x305   : > { %v4382_v27 = vcombine.low %v4360_v63, %v4367_v45  ;;  %v3364_v47 = vrot.slane %v3215_v44, %v8105_v10  ;;  %v3368_v6 = vrot.slane %v3215_v44, %v8108_v15  ;;  %v3372_v38 = vrot.slane %v3215_v44, %v8111_v51 }
 0x306   : > { %5870 = vperm.xlu0 %6679, %v4349_v0   ;;  %v3067_v30 = vpop.xlane.xlu0 %3066  ;;  %v4383_v34 = vcombine.low %v4374_v28, %v4381_v17  ;;  %v4399_v19 = vcombine.low %v3344_v60, %v3348_v7  ;;  %v4400_v24 = vcombine.low %v3352_v33, %v3356_v5  ;;  %v3376_v3 = vrot.slane %v3216_v37, %v7352_v55 }
 0x307   : > { %v3217_v1 = vadd.f32 %v8099_v22, %v3067_v30  ;;  %v4390_v4 = vrot.slane %v4382_v27, %v8115_v41  ;;  %v4401_v8 = vcombine.low %v3360_v43, %v3364_v47  ;;  %v4402_v9 = vcombine.low %v3368_v6, %v3372_v38 }
 0x308   : > { %v3072_v11 = vpop.xlane.xlu1 %3071  ;;  %v4397_v12 = vrot.slane %v4383_v34, %v8115_v41  ;;  %v4409_v14 = vrot.slane %v4399_v19, %v8115_v41  ;;  %v4416_v16 = vrot.slane %v4400_v24, %v8115_v41  ;;  %v3380_v18 = vrot.slane %v3216_v37, %v7358_v57 }
 0x309   : > { %v8162_v20 = vadd.f32 %v8099_v22, %v3072_v11  ;;  %v4423_v23 = vrot.slane %v4401_v8, %v8115_v41  ;;  %v4430_v31 = vrot.slane %v4402_v9, %v8115_v41  ;;  %v3384_v32 = vrot.slane %v3216_v37, %v7396_v25 }
 0x30a   : > { %v4398_v35 = vcombine.low %v4390_v4, %v4397_v12  ;;  %v4431_v36 = vcombine.low %v4409_v14, %v4416_v16  ;;  %v3388_v39 = vrot.slane %v3216_v37, %v7402_v29  ;;  %v3392_v26 = vrot.slane %v3216_v37, %v8102_v59 }
 0x30b   : > { %v4432_v40 = vcombine.low %v4423_v23, %v4430_v31  ;;  %v3396_v44 = vrot.slane %v3216_v37, %v8105_v10  ;;  %v3400_v46 = vrot.slane %v3216_v37, %v8108_v15  ;;  %v3404_v48 = vrot.slane %v3216_v37, %v8111_v51 }
 0x30c   : > { %5873 = vperm.xlu1 %6678, %v4398_v35   ;;  %v4439_v42 = vrot.slane %v4431_v36, %v8115_v41  ;;  %v4448_v50 = vcombine.low %v3376_v3, %v3380_v18  ;;  %v4449_v2 = vcombine.low %v3384_v32, %v3388_v39  ;;  %v3408_v52 = vrot.slane %v3217_v1, %v7352_v55 }
 0x30d   : > { %v4446_v58 = vrot.slane %v4432_v40, %v8115_v41  ;;  %v4450_v56 = vcombine.low %v3392_v26, %v3396_v44  ;;  %v4451_v49 = vcombine.low %v3400_v46, %v3404_v48  ;;  %v3412_v13 = vrot.slane %v3217_v1, %v7358_v57  ;;  %v3077_v60 = vpop.xlane.xlu0 %3076 }
 0x30e   : > { %v4458_v21 = vrot.slane %v4448_v50, %v8115_v41  ;;  %v4465_v61 = vrot.slane %v4449_v2, %v8115_v41  ;;  %v3416_v62 = vrot.slane %v3217_v1, %v7396_v25  ;;  %v3420_v63 = vrot.slane %v3217_v1, %v7402_v29 }
 0x30f   : > { %v4447_v7 = vcombine.low %v4439_v42, %v4446_v58  ;;  %v8181_v37 = vadd.f32 %v8099_v22, %v3077_v60  ;;  %v4472_v45 = vrot.slane %v4450_v56, %v8115_v41  ;;  %v4479_v28 = vrot.slane %v4451_v49, %v8115_v41 }
 0x310   : > { %v3082_v33 = vpop.xlane.xlu1 %3081  ;;  %v4480_v0 = vcombine.low %v4458_v21, %v4465_v61  ;;  %v3424_v17 = vrot.slane %v3217_v1, %v8102_v59  ;;  %v3428_v5 = vrot.slane %v3217_v1, %v8105_v10  ;;  %v3432_v43 = vrot.slane %v3217_v1, %v8108_v15 }
 0x311   : > { %5876 = vperm.xlu1 %6678, %v4447_v7   ;;  %v8189_v27 = vadd.f32 %v8099_v22, %v3082_v33  ;;  %v4481_v47 = vcombine.low %v4472_v45, %v4479_v28  ;;  %v3436_v6 = vrot.slane %v3217_v1, %v8111_v51  ;;  %v4497_v38 = vcombine.low %v3408_v52, %v3412_v13 }
 0x312   : > { %v4488_v30 = vrot.slane %v4480_v0, %v8115_v41  ;;  %v4498_v34 = vcombine.low %v3416_v62, %v3420_v63  ;;  %v4499_v19 = vcombine.low %v3424_v17, %v3428_v5  ;;  %v3440_v24 = vrot.slane %v8162_v20, %v7352_v55 }
 0x313   : > { %v4495_v3 = vrot.slane %v4481_v47, %v8115_v41  ;;  %v4500_v4 = vcombine.low %v3432_v43, %v3436_v6  ;;  %v4507_v8 = vrot.slane %v4497_v38, %v8115_v41  ;;  %v3444_v9 = vrot.slane %v8162_v20, %v7358_v57 }
 0x314   : > { %v4514_v11 = vrot.slane %v4498_v34, %v8115_v41  ;;  %v4521_v1 = vrot.slane %v4499_v19, %v8115_v41  ;;  %v3448_v12 = vrot.slane %v8162_v20, %v7396_v25  ;;  %v3452_v14 = vrot.slane %v8162_v20, %v7402_v29 }
 0x315   : > { %v4496_v16 = vcombine.low %v4488_v30, %v4495_v3  ;;  %v4528_v18 = vrot.slane %v4500_v4, %v8115_v41  ;;  %v3456_v23 = vrot.slane %v8162_v20, %v8102_v59  ;;  %v3460_v31 = vrot.slane %v8162_v20, %v8105_v10 }
 0x316   : > { %v4529_v32 = vcombine.low %v4507_v8, %v4514_v11  ;;  %v3087_v35 = vpop.xlane.xlu0 %3086  ;;  %v3464_v36 = vrot.slane %v8162_v20, %v8108_v15  ;;  %v3468_v39 = vrot.slane %v8162_v20, %v8111_v51  ;;  %v4546_v26 = vcombine.low %v3440_v24, %v3444_v9 }
 0x317   : > { %5879 = vperm.xlu1 %6678, %v4496_v16   ;;  %v4530_v40 = vcombine.low %v4521_v1, %v4528_v18  ;;  %v8215_v44 = vadd.f32 %v8099_v22, %v3087_v35  ;;  %v4547_v46 = vcombine.low %v3448_v12, %v3452_v14  ;;  %v4548_v48 = vcombine.low %v3456_v23, %v3460_v31 }
 0x318   : > { %v4537_v42 = vrot.slane %v4529_v32, %v8115_v41  ;;  %v3092_v50 = vpop.xlane.xlu1 %3091  ;;  %v4549_v2 = vcombine.low %v3464_v36, %v3468_v39  ;;  %v4556_v52 = vrot.slane %v4546_v26, %v8115_v41  ;;  %v3472_v58 = vrot.slane %v8181_v37, %v7352_v55 }
 0x319   : > { %v4544_v56 = vrot.slane %v4530_v40, %v8115_v41  ;;  %v8223_v20 = vadd.f32 %v8099_v22, %v3092_v50  ;;  %v4563_v49 = vrot.slane %v4547_v46, %v8115_v41  ;;  %v4570_v13 = vrot.slane %v4548_v48, %v8115_v41 }
 0x31a   : > { %v4577_v60 = vrot.slane %v4549_v2, %v8115_v41  ;;  %v3476_v21 = vrot.slane %v8181_v37, %v7358_v57  ;;  %v3480_v61 = vrot.slane %v8181_v37, %v7396_v25  ;;  %v3484_v62 = vrot.slane %v8181_v37, %v7402_v29 }
 0x31b   : > { %v4545_v63 = vcombine.low %v4537_v42, %v4544_v56  ;;  %v4578_v7 = vcombine.low %v4556_v52, %v4563_v49  ;;  %v3488_v45 = vrot.slane %v8181_v37, %v8102_v59  ;;  %v3492_v28 = vrot.slane %v8181_v37, %v8105_v10 }
 0x31c   : > { %v4579_v33 = vcombine.low %v4570_v13, %v4577_v60  ;;  %v3496_v0 = vrot.slane %v8181_v37, %v8108_v15  ;;  %v3500_v17 = vrot.slane %v8181_v37, %v8111_v51  ;;  %v4595_v5 = vcombine.low %v3472_v58, %v3476_v21 }
 0x31d   : > { %5882 = vperm.xlu1 %6678, %v4545_v63   ;;  %v4586_v43 = vrot.slane %v4578_v7, %v8115_v41  ;;  %v4596_v47 = vcombine.low %v3480_v61, %v3484_v62  ;;  %v4597_v6 = vcombine.low %v3488_v45, %v3492_v28  ;;  %v3504_v38 = vrot.slane %v8189_v27, %v7352_v55 }
 0x31e   : > { %v4593_v30 = vrot.slane %v4579_v33, %v8115_v41  ;;  %v4598_v34 = vcombine.low %v3496_v0, %v3500_v17  ;;  %v4605_v19 = vrot.slane %v4595_v5, %v8115_v41  ;;  %v3097_v24 = vpop.xlane.xlu0 %3096  ;;  %v3508_v3 = vrot.slane %v8189_v27, %v7358_v57 }
 0x31f   : > { %v4612_v37 = vrot.slane %v4596_v47, %v8115_v41  ;;  %v4619_v4 = vrot.slane %v4597_v6, %v8115_v41  ;;  %v8252_v8 = vadd.f32 %v8099_v22, %v3097_v24  ;;  %v3512_v9 = vrot.slane %v8189_v27, %v7396_v25 }
 0x320   : > { %v4594_v11 = vcombine.low %v4586_v43, %v4593_v30  ;;  %v4626_v1 = vrot.slane %v4598_v34, %v8115_v41  ;;  %v3102_v12 = vpop.xlane.xlu1 %3101  ;;  %v3516_v14 = vrot.slane %v8189_v27, %v7402_v29  ;;  %v3520_v16 = vrot.slane %v8189_v27, %v8102_v59 }
 0x321   : > { %v4627_v18 = vcombine.low %v4605_v19, %v4612_v37  ;;  %v8262_v23 = vadd.f32 %v8099_v22, %v3102_v12  ;;  %v3524_v31 = vrot.slane %v8189_v27, %v8105_v10  ;;  %v3528_v32 = vrot.slane %v8189_v27, %v8108_v15 }
 0x322   : > { %5885 = vperm.xlu1 %6678, %v4594_v11   ;;  %v4628_v35 = vcombine.low %v4619_v4, %v4626_v1  ;;  %v3532_v36 = vrot.slane %v8189_v27, %v8111_v51  ;;  %v4644_v39 = vcombine.low %v3504_v38, %v3508_v3  ;;  %v4645_v26 = vcombine.low %v3512_v9, %v3516_v14 }
 0x323   : > { %v4635_v40 = vrot.slane %v4627_v18, %v8115_v41  ;;  %v4646_v46 = vcombine.low %v3520_v16, %v3524_v31  ;;  %v3536_v48 = vrot.slane %v8215_v44, %v7352_v55  ;;  %v3540_v42 = vrot.slane %v8215_v44, %v7358_v57 }
 0x324   : > { %v4642_v50 = vrot.slane %v4628_v35, %v8115_v41  ;;  %v4647_v2 = vcombine.low %v3528_v32, %v3532_v36  ;;  %v4654_v52 = vrot.slane %v4644_v39, %v8115_v41  ;;  %v4661_v58 = vrot.slane %v4645_v26, %v8115_v41 }
 0x325   : > { %v4668_v27 = vrot.slane %v4646_v46, %v8115_v41  ;;  %v3544_v56 = vrot.slane %v8215_v44, %v7396_v25  ;;  %v3548_v49 = vrot.slane %v8215_v44, %v7402_v29  ;;  %v3552_v13 = vrot.slane %v8215_v44, %v8102_v59 }
 0x326   : > { %v4643_v60 = vcombine.low %v4635_v40, %v4642_v50  ;;  %v4675_v21 = vrot.slane %v4647_v2, %v8115_v41  ;;  %v4676_v61 = vcombine.low %v4654_v52, %v4661_v58  ;;  %v3556_v62 = vrot.slane %v8215_v44, %v8105_v10  ;;  %v3107_v63 = vpop.xlane.xlu0 %3106 }
 0x327   : > { %v3560_v7 = vrot.slane %v8215_v44, %v8108_v15  ;;  %v3564_v45 = vrot.slane %v8215_v44, %v8111_v51  ;;  %v4693_v28 = vcombine.low %v3536_v48, %v3540_v42  ;;  %v4694_v33 = vcombine.low %v3544_v56, %v3548_v49 }
 0x328   : > { %5888 = vperm.xlu1 %6678, %v4643_v60   ;;  %v4677_v0 = vcombine.low %v4668_v27, %v4675_v21  ;;  %v4684_v17 = vrot.slane %v4676_v61, %v8115_v41  ;;  %v4695_v5 = vcombine.low %v3552_v13, %v3556_v62  ;;  %v8294_v43 = vadd.f32 %v8099_v22, %v3107_v63  ;;  %v3112_v47 = vpop.xlane.xlu1 %3111 }
 0x329   : > { %v4696_v6 = vcombine.low %v3560_v7, %v3564_v45  ;;  %v4703_v38 = vrot.slane %v4693_v28, %v8115_v41  ;;  %v4710_v30 = vrot.slane %v4694_v33, %v8115_v41  ;;  %v8299_v34 = vadd.f32 %v8099_v22, %v3112_v47 }
 0x32a   : > { %v4691_v44 = vrot.slane %v4677_v0, %v8115_v41  ;;  %v4717_v19 = vrot.slane %v4695_v5, %v8115_v41  ;;  %v3568_v24 = vrot.slane %v8223_v20, %v7352_v55  ;;  %v3572_v3 = vrot.slane %v8223_v20, %v7358_v57 }
 0x32b   : > { %v4724_v37 = vrot.slane %v4696_v6, %v8115_v41  ;;  %v4725_v4 = vcombine.low %v4703_v38, %v4710_v30  ;;  %v3576_v9 = vrot.slane %v8223_v20, %v7396_v25  ;;  %v3580_v11 = vrot.slane %v8223_v20, %v7402_v29 }
 0x32c   : > { %v4692_v1 = vcombine.low %v4684_v17, %v4691_v44  ;;  %v3584_v12 = vrot.slane %v8223_v20, %v8102_v59  ;;  %v3588_v14 = vrot.slane %v8223_v20, %v8105_v10  ;;  %v3592_v16 = vrot.slane %v8223_v20, %v8108_v15 }
 0x32d   : > { %v4726_v18 = vcombine.low %v4717_v19, %v4724_v37  ;;  %v4733_v31 = vrot.slane %v4725_v4, %v8115_v41  ;;  %v3596_v32 = vrot.slane %v8223_v20, %v8111_v51  ;;  %v4742_v35 = vcombine.low %v3568_v24, %v3572_v3  ;;  %v3117_v27 = vpop.xlane.xlu0 %3116 }
 0x32e   : > { %5891 = vperm.xlu1 %6678, %v4692_v1   ;;  %v4743_v36 = vcombine.low %v3576_v9, %v3580_v11  ;;  %v4744_v39 = vcombine.low %v3584_v12, %v3588_v14  ;;  %v3600_v26 = vrot.slane %v8252_v8, %v7352_v55  ;;  %v3604_v40 = vrot.slane %v8252_v8, %v7358_v57 }
 0x32f   : > { %v4740_v46 = vrot.slane %v4726_v18, %v8115_v41  ;;  %v4745_v48 = vcombine.low %v3592_v16, %v3596_v32  ;;  %v4752_v42 = vrot.slane %v4742_v35, %v8115_v41  ;;  %v3608_v50 = vrot.slane %v8252_v8, %v7396_v25 }
 0x330   : > { %v4759_v20 = vrot.slane %v4743_v36, %v8115_v41  ;;  %v4766_v2 = vrot.slane %v4744_v39, %v8115_v41  ;;  %v3612_v52 = vrot.slane %v8252_v8, %v7402_v29  ;;  %v3616_v58 = vrot.slane %v8252_v8, %v8102_v59  ;;  %v3122_v56 = vpop.xlane.xlu1 %3121 }
 0x331   : > { %v4741_v49 = vcombine.low %v4733_v31, %v4740_v46  ;;  %v4773_v13 = vrot.slane %v4745_v48, %v8115_v41  ;;  %v3620_v60 = vrot.slane %v8252_v8, %v8105_v10  ;;  %v3624_v21 = vrot.slane %v8252_v8, %v8108_v15 }
 0x332   : > { %v4774_v61 = vcombine.low %v4752_v42, %v4759_v20  ;;  %v3628_v62 = vrot.slane %v8252_v8, %v8111_v51  ;;  %v4791_v63 = vcombine.low %v3600_v26, %v3604_v40  ;;  %v4792_v7 = vcombine.low %v3608_v50, %v3612_v52 }
 0x333   : > { %5894 = vperm.xlu1 %6678, %v4741_v49   ;;  %v4775_v45 = vcombine.low %v4766_v2, %v4773_v13  ;;  %v4793_v28 = vcombine.low %v3616_v58, %v3620_v60  ;;  %v8343_v33 = vadd.f32 %v8099_v22, %v3117_v27  ;;  %v8346_v0 = vadd.f32 %v8099_v22, %v3122_v56 }
 0x334   : > { %v4782_v17 = vrot.slane %v4774_v61, %v8115_v41  ;;  %v4794_v5 = vcombine.low %v3624_v21, %v3628_v62  ;;  %v4801_v47 = vrot.slane %v4791_v63, %v8115_v41  ;;  %v4808_v6 = vrot.slane %v4792_v7, %v8115_v41 }
 0x335   : > { %v4789_v8 = vrot.slane %v4775_v45, %v8115_v41  ;;  %v4815_v38 = vrot.slane %v4793_v28, %v8115_v41  ;;  %v3632_v30 = vrot.slane %v8262_v23, %v7352_v55  ;;  %v3636_v44 = vrot.slane %v8262_v23, %v7358_v57 }
 0x336   : > { %v4822_v19 = vrot.slane %v4794_v5, %v8115_v41  ;;  %v4823_v24 = vcombine.low %v4801_v47, %v4808_v6  ;;  %v3640_v3 = vrot.slane %v8262_v23, %v7396_v25  ;;  %v3644_v37 = vrot.slane %v8262_v23, %v7402_v29  ;;  %v3127_v4 = vpop.xlane.xlu0 %3126 }
 0x337   : > { %v4790_v9 = vcombine.low %v4782_v17, %v4789_v8  ;;  %v3648_v11 = vrot.slane %v8262_v23, %v8102_v59  ;;  %v3652_v1 = vrot.slane %v8262_v23, %v8105_v10  ;;  %v3656_v12 = vrot.slane %v8262_v23, %v8108_v15 }
 0x338   : > { %v4824_v14 = vcombine.low %v4815_v38, %v4822_v19  ;;  %v4831_v16 = vrot.slane %v4823_v24, %v8115_v41  ;;  %v3660_v18 = vrot.slane %v8262_v23, %v8111_v51  ;;  %v4840_v31 = vcombine.low %v3632_v30, %v3636_v44  ;;  %v3132_v32 = vpop.xlane.xlu1 %3131 }
 0x339   : > { %5897 = vperm.xlu1 %6678, %v4790_v9   ;;  %v4841_v35 = vcombine.low %v3640_v3, %v3644_v37  ;;  %v4842_v36 = vcombine.low %v3648_v11, %v3652_v1  ;;  %v3229_v39 = vadd.f32 %v8099_v22, %v3127_v4  ;;  %v3230_v26 = vadd.f32 %v8099_v22, %v3132_v32 }
 0x33a   : > { %v4838_v40 = vrot.slane %v4824_v14, %v8115_v41  ;;  %v4843_v46 = vcombine.low %v3656_v12, %v3660_v18  ;;  %v4850_v48 = vrot.slane %v4840_v31, %v8115_v41  ;;  %v3664_v42 = vrot.slane %v8294_v43, %v7352_v55 }
 0x33b   : > { %v4857_v50 = vrot.slane %v4841_v35, %v8115_v41  ;;  %v4864_v23 = vrot.slane %v4842_v36, %v8115_v41  ;;  %v3792_v20 = vrot.slane %v3229_v39, %v7352_v55  ;;  %v3796_v2 = vrot.slane %v3229_v39, %v7358_v57 }
 0x33c   : > { %v4839_v52 = vcombine.low %v4831_v16, %v4838_v40  ;;  %v4871_v58 = vrot.slane %v4843_v46, %v8115_v41  ;;  %v3800_v27 = vrot.slane %v3229_v39, %v7396_v25  ;;  %v3804_v56 = vrot.slane %v3229_v39, %v7402_v29 }
 0x33d   : > { %v4872_v49 = vcombine.low %v4850_v48, %v4857_v50  ;;  %v3808_v13 = vrot.slane %v3229_v39, %v8102_v59  ;;  %v3812_v60 = vrot.slane %v3229_v39, %v8105_v10  ;;  %v3816_v21 = vrot.slane %v3229_v39, %v8108_v15 }
 0x33e   : > { %5900 = vperm.xlu1 %6678, %v4839_v52   ;;  %v4873_v61 = vcombine.low %v4864_v23, %v4871_v58  ;;  %v3137_v62 = vpop.xlane.xlu0 %3136  ;;  %v3820_v63 = vrot.slane %v3229_v39, %v8111_v51  ;;  %v5085_v7 = vcombine.low %v3792_v20, %v3796_v2  ;;  %v5086_v45 = vcombine.low %v3800_v27, %v3804_v56 }
 0x33f   : > { %v4880_v28 = vrot.slane %v4872_v49, %v8115_v41  ;;  %v8390_v17 = vadd.f32 %v8099_v22, %v3137_v62  ;;  %v5087_v5 = vcombine.low %v3808_v13, %v3812_v60  ;;  %v3824_v47 = vrot.slane %v3230_v26, %v7352_v55 }
 0x340   : > { %v4887_v6 = vrot.slane %v4873_v61, %v8115_v41  ;;  %v3142_v8 = vpop.xlane.xlu1 %3141  ;;  %v5088_v38 = vcombine.low %v3816_v21, %v3820_v63  ;;  %v5095_v30 = vrot.slane %v5085_v7, %v8115_v41  ;;  %v5102_v44 = vrot.slane %v5086_v45, %v8115_v41 }
 0x341   : > { %v8397_v19 = vadd.f32 %v8099_v22, %v3142_v8  ;;  %v5109_v24 = vrot.slane %v5087_v5, %v8115_v41  ;;  %v3828_v3 = vrot.slane %v3230_v26, %v7358_v57  ;;  %v3832_v37 = vrot.slane %v3230_v26, %v7396_v25 }
 0x342   : > { %v4888_v4 = vcombine.low %v4880_v28, %v4887_v6  ;;  %v5116_v9 = vrot.slane %v5088_v38, %v8115_v41  ;;  %v5117_v11 = vcombine.low %v5095_v30, %v5102_v44  ;;  %v3836_v1 = vrot.slane %v3230_v26, %v7402_v29 }
 0x343   : > { %v3840_v12 = vrot.slane %v3230_v26, %v8102_v59  ;;  %v3844_v14 = vrot.slane %v3230_v26, %v8105_v10  ;;  %v3848_v16 = vrot.slane %v3230_v26, %v8108_v15  ;;  %v3852_v18 = vrot.slane %v3230_v26, %v8111_v51 }
 0x344   : > { %5903 = vperm.xlu1 %6678, %v4888_v4   ;;  %v5118_v31 = vcombine.low %v5109_v24, %v5116_v9  ;;  %v5125_v32 = vrot.slane %v5117_v11, %v8115_v41  ;;  %v5134_v35 = vcombine.low %v3824_v47, %v3828_v3  ;;  %v5135_v36 = vcombine.low %v3832_v37, %v3836_v1 }
 0x345   : > { %v5136_v39 = vcombine.low %v3840_v12, %v3844_v14  ;;  %v5137_v40 = vcombine.low %v3848_v16, %v3852_v18  ;;  %v3668_v46 = vrot.slane %v8294_v43, %v7358_v57  ;;  %v3672_v48 = vrot.slane %v8294_v43, %v7396_v25 }
 0x346   : > { %v5132_v50 = vrot.slane %v5118_v31, %v8115_v41  ;;  %v3147_v23 = vpop.xlane.xlu0 %3146  ;;  %v5144_v20 = vrot.slane %v5134_v35, %v8115_v41  ;;  %v5151_v26 = vrot.slane %v5135_v36, %v8115_v41  ;;  %v3676_v2 = vrot.slane %v8294_v43, %v7402_v29 }
 0x347   : > { %v8419_v52 = vadd.f32 %v8099_v22, %v3147_v23  ;;  %v5158_v58 = vrot.slane %v5136_v39, %v8115_v41  ;;  %v5165_v27 = vrot.slane %v5137_v40, %v8115_v41  ;;  %v3680_v56 = vrot.slane %v8294_v43, %v8102_v59 }
 0x348   : > { %v5133_v49 = vcombine.low %v5125_v32, %v5132_v50  ;;  %v3152_v13 = vpop.xlane.xlu1 %3151  ;;  %v5166_v60 = vcombine.low %v5144_v20, %v5151_v26  ;;  %v3684_v21 = vrot.slane %v8294_v43, %v8105_v10  ;;  %v3688_v61 = vrot.slane %v8294_v43, %v8108_v15 }
 0x349   : > { %v8430_v62 = vadd.f32 %v8099_v22, %v3152_v13  ;;  %v5167_v63 = vcombine.low %v5158_v58, %v5165_v27  ;;  %v3692_v7 = vrot.slane %v8294_v43, %v8111_v51  ;;  %v4889_v45 = vcombine.low %v3664_v42, %v3668_v46 }
 0x34a   : > { %5918 = vperm.xlu1 %6678, %v5133_v49   ;;  %v5174_v28 = vrot.slane %v5166_v60, %v8115_v41  ;;  %v4890_v5 = vcombine.low %v3672_v48, %v3676_v2  ;;  %v4891_v47 = vcombine.low %v3680_v56, %v3684_v21  ;;  %v3856_v6 = vrot.slane %v8390_v17, %v7352_v55 }
 0x34b   : > { %v5181_v8 = vrot.slane %v5167_v63, %v8115_v41  ;;  %v4892_v38 = vcombine.low %v3688_v61, %v3692_v7  ;;  %v4899_v30 = vrot.slane %v4889_v45, %v8115_v41  ;;  %v3860_v44 = vrot.slane %v8390_v17, %v7358_v57 }
 0x34c   : > { %v4906_v24 = vrot.slane %v4890_v5, %v8115_v41  ;;  %v4913_v43 = vrot.slane %v4891_v47, %v8115_v41  ;;  %v3864_v42 = vrot.slane %v8390_v17, %v7396_v25  ;;  %v3868_v3 = vrot.slane %v8390_v17, %v7402_v29 }
 0x34d   : > { %v5182_v37 = vcombine.low %v5174_v28, %v5181_v8  ;;  %v4920_v4 = vrot.slane %v4892_v38, %v8115_v41  ;;  %v3872_v9 = vrot.slane %v8390_v17, %v8102_v59  ;;  %v3876_v11 = vrot.slane %v8390_v17, %v8105_v10  ;;  %v3157_v18 = vpop.xlane.xlu0 %3156 }
 0x34e   : > { %v4921_v1 = vcombine.low %v4899_v30, %v4906_v24  ;;  %v3880_v12 = vrot.slane %v8390_v17, %v8108_v15  ;;  %v3884_v14 = vrot.slane %v8390_v17, %v8111_v51  ;;  %v5183_v16 = vcombine.low %v3856_v6, %v3860_v44 }
 0x34f   : > { %5921 = vperm.xlu1 %6678, %v5182_v37   ;;  %v4922_v31 = vcombine.low %v4913_v43, %v4920_v4  ;;  %v5184_v32 = vcombine.low %v3864_v42, %v3868_v3  ;;  %v5185_v35 = vcombine.low %v3872_v9, %v3876_v11  ;;  %v8460_v36 = vadd.f32 %v8099_v22, %v3157_v18 }
 0x350   : > { %v4929_v39 = vrot.slane %v4921_v1, %v8115_v41  ;;  %v5186_v40 = vcombine.low %v3880_v12, %v3884_v14  ;;  %v5193_v46 = vrot.slane %v5183_v16, %v8115_v41  ;;  %v3696_v48 = vrot.slane %v8299_v34, %v7352_v55 }
 0x351   : > { %v4936_v50 = vrot.slane %v4922_v31, %v8115_v41  ;;  %v5200_v17 = vrot.slane %v5184_v32, %v8115_v41  ;;  %v5207_v23 = vrot.slane %v5185_v35, %v8115_v41  ;;  %v3700_v20 = vrot.slane %v8299_v34, %v7358_v57  ;;  %v3162_v42 = vpop.xlane.xlu0 %3161 }
 0x352   : > { %v5214_v26 = vrot.slane %v5186_v40, %v8115_v41  ;;  %v3704_v2 = vrot.slane %v8299_v34, %v7396_v25  ;;  %v3708_v58 = vrot.slane %v8299_v34, %v7402_v29  ;;  %v3712_v27 = vrot.slane %v8299_v34, %v8102_v59 }
 0x353   : > { %v4937_v56 = vcombine.low %v4929_v39, %v4936_v50  ;;  %v5215_v49 = vcombine.low %v5193_v46, %v5200_v17  ;;  %v3716_v13 = vrot.slane %v8299_v34, %v8105_v10  ;;  %v3720_v60 = vrot.slane %v8299_v34, %v8108_v15 }
 0x354   : > { %v5216_v21 = vcombine.low %v5207_v23, %v5214_v26  ;;  %v3724_v61 = vrot.slane %v8299_v34, %v8111_v51  ;;  %v4938_v63 = vcombine.low %v3696_v48, %v3700_v20  ;;  %v4939_v7 = vcombine.low %v3704_v2, %v3708_v58 }
 0x355   : > { %5906 = vperm.xlu1 %6678, %v4937_v56   ;;  %v5223_v45 = vrot.slane %v5215_v49, %v8115_v41  ;;  %v4940_v28 = vcombine.low %v3712_v27, %v3716_v13  ;;  %v3888_v5 = vrot.slane %v8397_v19, %v7352_v55  ;;  %v3892_v47 = vrot.slane %v8397_v19, %v7358_v57 }
 0x356   : > { %v5230_v6 = vrot.slane %v5216_v21, %v8115_v41  ;;  %v4941_v8 = vcombine.low %v3720_v60, %v3724_v61  ;;  %v4948_v38 = vrot.slane %v4938_v63, %v8115_v41  ;;  %v4955_v30 = vrot.slane %v4939_v7, %v8115_v41 }
 0x357   : > { %v4962_v34 = vrot.slane %v4940_v28, %v8115_v41  ;;  %v3896_v44 = vrot.slane %v8397_v19, %v7396_v25  ;;  %v3900_v24 = vrot.slane %v8397_v19, %v7402_v29  ;;  %v3904_v43 = vrot.slane %v8397_v19, %v8102_v59 }
 0x358   : > { %v5231_v3 = vcombine.low %v5223_v45, %v5230_v6  ;;  %v4969_v37 = vrot.slane %v4941_v8, %v8115_v41  ;;  %v4970_v4 = vcombine.low %v4948_v38, %v4955_v30  ;;  %v3908_v9 = vrot.slane %v8397_v19, %v8105_v10 }
 0x359   : > { %v3912_v11 = vrot.slane %v8397_v19, %v8108_v15  ;;  %v3916_v1 = vrot.slane %v8397_v19, %v8111_v51  ;;  %v5232_v12 = vcombine.low %v3888_v5, %v3892_v47  ;;  %v5233_v14 = vcombine.low %v3896_v44, %v3900_v24  ;;  %v3167_v44 = vpop.xlane.xlu0 %3166 }
 0x35a   : > { %5924 = vperm.xlu0 %6679, %v5231_v3   ;;  %v4971_v16 = vcombine.low %v4962_v34, %v4969_v37  ;;  %v4978_v18 = vrot.slane %v4970_v4, %v8115_v41  ;;  %v5234_v31 = vcombine.low %v3904_v43, %v3908_v9  ;;  %v8508_v32 = vadd.f32 %v8099_v22, %v3162_v42 }
 0x35b   : > { %v5235_v35 = vcombine.low %v3912_v11, %v3916_v1  ;;  %v5242_v39 = vrot.slane %v5232_v12, %v8115_v41  ;;  %v5249_v40 = vrot.slane %v5233_v14, %v8115_v41  ;;  %v3728_v46 = vrot.slane %v8343_v33, %v7352_v55 }
 0x35c   : > { %v4985_v19 = vrot.slane %v4971_v16, %v8115_v41  ;;  %v5256_v48 = vrot.slane %v5234_v31, %v8115_v41  ;;  %v3732_v50 = vrot.slane %v8343_v33, %v7358_v57  ;;  %v3736_v17 = vrot.slane %v8343_v33, %v7396_v25 }
 0x35d   : > { %v5263_v23 = vrot.slane %v5235_v35, %v8115_v41  ;;  %v5264_v20 = vcombine.low %v5242_v39, %v5249_v40  ;;  %v3740_v26 = vrot.slane %v8343_v33, %v7402_v29  ;;  %v3744_v2 = vrot.slane %v8343_v33, %v8102_v59 }
 0x35e   : > { %v4986_v58 = vcombine.low %v4978_v18, %v4985_v19  ;;  %v3748_v27 = vrot.slane %v8343_v33, %v8105_v10  ;;  %v3752_v56 = vrot.slane %v8343_v33, %v8108_v15  ;;  %v3756_v49 = vrot.slane %v8343_v33, %v8111_v51 }
 0x35f   : > { %v5265_v13 = vcombine.low %v5256_v48, %v5263_v23  ;;  %v5272_v60 = vrot.slane %v5264_v20, %v8115_v41  ;;  %v4987_v21 = vcombine.low %v3728_v46, %v3732_v50  ;;  %v4988_v61 = vcombine.low %v3736_v17, %v3740_v26 }
 0x360   : > { %5909 = vperm.xlu1 %6678, %v4986_v58   ;;  %v4989_v63 = vcombine.low %v3744_v2, %v3748_v27  ;;  %v4990_v7 = vcombine.low %v3752_v56, %v3756_v49  ;;  %v3920_v45 = vrot.slane %v8419_v52, %v7352_v55  ;;  %v3924_v28 = vrot.slane %v8419_v52, %v7358_v57 }
 0x361   : > { %v5279_v5 = vrot.slane %v5265_v13, %v8115_v41  ;;  %v4997_v47 = vrot.slane %v4987_v21, %v8115_v41  ;;  %v5004_v33 = vrot.slane %v4988_v61, %v8115_v41  ;;  %v3928_v6 = vrot.slane %v8419_v52, %v7396_v25 }
 0x362   : > { %v5011_v8 = vrot.slane %v4989_v63, %v8115_v41  ;;  %v5018_v38 = vrot.slane %v4990_v7, %v8115_v41  ;;  %v3932_v30 = vrot.slane %v8419_v52, %v7402_v29  ;;  %v3936_v34 = vrot.slane %v8419_v52, %v8102_v59 }
 0x363   : > { %v5280_v24 = vcombine.low %v5272_v60, %v5279_v5  ;;  %v5019_v43 = vcombine.low %v4997_v47, %v5004_v33  ;;  %v3940_v42 = vrot.slane %v8419_v52, %v8105_v10  ;;  %v3944_v3 = vrot.slane %v8419_v52, %v8108_v15  ;;  %v3172_v5 = vpop.xlane.xlu0 %3171 }
 0x364   : > { %v5020_v37 = vcombine.low %v5011_v8, %v5018_v38  ;;  %v3948_v4 = vrot.slane %v8419_v52, %v8111_v51  ;;  %v5281_v9 = vcombine.low %v3920_v45, %v3924_v28  ;;  %v5282_v11 = vcombine.low %v3928_v6, %v3932_v30 }
 0x365   : > { %5927 = vperm.xlu0 %6679, %v5280_v24   ;;  %v5027_v1 = vrot.slane %v5019_v43, %v8115_v41  ;;  %v5283_v12 = vcombine.low %v3936_v34, %v3940_v42  ;;  %v8555_v14 = vadd.f32 %v8099_v22, %v3167_v44  ;;  %v3760_v16 = vrot.slane %v8346_v0, %v7352_v55 }
 0x366   : > { %v5034_v18 = vrot.slane %v5020_v37, %v8115_v41  ;;  %v5284_v31 = vcombine.low %v3944_v3, %v3948_v4  ;;  %v5291_v35 = vrot.slane %v5281_v9, %v8115_v41  ;;  %v5298_v39 = vrot.slane %v5282_v11, %v8115_v41 }
 0x367   : > { %v5305_v52 = vrot.slane %v5283_v12, %v8115_v41  ;;  %v3764_v40 = vrot.slane %v8346_v0, %v7358_v57  ;;  %v3768_v46 = vrot.slane %v8346_v0, %v7396_v25  ;;  %v3772_v19 = vrot.slane %v8346_v0, %v7402_v29 }
 0x368   : > { %v5035_v48 = vcombine.low %v5027_v1, %v5034_v18  ;;  %v5312_v50 = vrot.slane %v5284_v31, %v8115_v41  ;;  %v5313_v17 = vcombine.low %v5291_v35, %v5298_v39  ;;  %v3776_v23 = vrot.slane %v8346_v0, %v8102_v59 }
 0x369   : > { %v3780_v20 = vrot.slane %v8346_v0, %v8105_v10  ;;  %v3784_v26 = vrot.slane %v8346_v0, %v8108_v15  ;;  %v3788_v2 = vrot.slane %v8346_v0, %v8111_v51  ;;  %v5036_v58 = vcombine.low %v3760_v16, %v3764_v40 }
 0x36a   : > { %5912 = vperm.xlu1 %6678, %v5035_v48   ;;  %v5314_v27 = vcombine.low %v5305_v52, %v5312_v50  ;;  %v5321_v56 = vrot.slane %v5313_v17, %v8115_v41  ;;  %v5037_v49 = vcombine.low %v3768_v46, %v3772_v19  ;;  %v3952_v13 = vrot.slane %v8430_v62, %v7352_v55  ;;  %v3177_v52 = vpop.xlane.xlu0 %3176  ;;  %v3182_v50 = vpop.xlane.xlu1 %3181 }
 0x36b   : > { %v5038_v60 = vcombine.low %v3776_v23, %v3780_v20  ;;  %v5039_v21 = vcombine.low %v3784_v26, %v3788_v2  ;;  %v5046_v61 = vrot.slane %v5036_v58, %v8115_v41  ;;  %v3956_v63 = vrot.slane %v8430_v62, %v7358_v57 }
 0x36c   : > { %v5328_v7 = vrot.slane %v5314_v27, %v8115_v41  ;;  %v5053_v0 = vrot.slane %v5037_v49, %v8115_v41  ;;  %v3960_v45 = vrot.slane %v8430_v62, %v7396_v25  ;;  %v3964_v28 = vrot.slane %v8430_v62, %v7402_v29 }
 0x36d   : > { %v5060_v47 = vrot.slane %v5038_v60, %v8115_v41  ;;  %v5067_v33 = vrot.slane %v5039_v21, %v8115_v41  ;;  %v3968_v6 = vrot.slane %v8430_v62, %v8102_v59  ;;  %v3972_v8 = vrot.slane %v8430_v62, %v8105_v10 }
 0x36e   : > { %v5329_v38 = vcombine.low %v5321_v56, %v5328_v7  ;;  %v5068_v30 = vcombine.low %v5046_v61, %v5053_v0  ;;  %v3976_v34 = vrot.slane %v8430_v62, %v8108_v15  ;;  %v3980_v44 = vrot.slane %v8430_v62, %v8111_v51 }
 0x36f   : > { %v5069_v24 = vcombine.low %v5060_v47, %v5067_v33  ;;  %v5330_v43 = vcombine.low %v3952_v13, %v3956_v63  ;;  %v5331_v42 = vcombine.low %v3960_v45, %v3964_v28  ;;  %v5332_v3 = vcombine.low %v3968_v6, %v3972_v8 }
 0x370   : > { %5930 = vperm.xlu0 %6679, %v5329_v38   ;;  %v5076_v37 = vrot.slane %v5068_v30, %v8115_v41  ;;  %v5333_v4 = vcombine.low %v3976_v34, %v3980_v44  ;;  %v8602_v9 = vadd.f32 %v8099_v22, %v3172_v5  ;;  %v3984_v11 = vrot.slane %v8460_v36, %v7352_v55 }
 0x371   : > { %v5083_v1 = vrot.slane %v5069_v24, %v8115_v41  ;;  %v5340_v12 = vrot.slane %v5330_v43, %v8115_v41  ;;  %v5347_v62 = vrot.slane %v5331_v42, %v8115_v41  ;;  %v5354_v16 = vrot.slane %v5332_v3, %v8115_v41 }
 0x372   : > { %v5361_v18 = vrot.slane %v5333_v4, %v8115_v41  ;;  %v3988_v31 = vrot.slane %v8460_v36, %v7358_v57  ;;  %v3992_v35 = vrot.slane %v8460_v36, %v7396_v25  ;;  %v3996_v39 = vrot.slane %v8460_v36, %v7402_v29 }
 0x373   : > { %v5084_v40 = vcombine.low %v5076_v37, %v5083_v1  ;;  %v5362_v46 = vcombine.low %v5340_v12, %v5347_v62  ;;  %v4000_v19 = vrot.slane %v8460_v36, %v8102_v59  ;;  %v4004_v48 = vrot.slane %v8460_v36, %v8105_v10  ;;  %v3187_v37 = vpop.xlane.xlu0 %3186 }
 0x374   : > { %v5363_v17 = vcombine.low %v5354_v16, %v5361_v18  ;;  %v4008_v23 = vrot.slane %v8460_v36, %v8108_v15  ;;  %v4012_v20 = vrot.slane %v8460_v36, %v8111_v51  ;;  %v5379_v26 = vcombine.low %v3984_v11, %v3988_v31 }
 0x375   : > { %5915 = vperm.xlu1 %6678, %v5084_v40   ;;  %v5370_v2 = vrot.slane %v5362_v46, %v8115_v41  ;;  %v5380_v58 = vcombine.low %v3992_v35, %v3996_v39  ;;  %v5381_v27 = vcombine.low %v4000_v19, %v4004_v48  ;;  %v8627_v56 = vadd.f32 %v8099_v22, %v3177_v52 }
 0x376   : > { %v5377_v49 = vrot.slane %v5363_v17, %v8115_v41  ;;  %v5382_v13 = vcombine.low %v4008_v23, %v4012_v20  ;;  %v5389_v60 = vrot.slane %v5379_v26, %v8115_v41  ;;  %v8632_v21 = vadd.f32 %v8099_v22, %v3182_v50 }
 0x377   : > { %v5396_v61 = vrot.slane %v5380_v58, %v8115_v41  ;;  %v5403_v36 = vrot.slane %v5381_v27, %v8115_v41  ;;  %v4016_v63 = vrot.slane %v8508_v32, %v7352_v55  ;;  %v4020_v7 = vrot.slane %v8508_v32, %v7358_v57 }
 0x378   : > { %v5378_v0 = vcombine.low %v5370_v2, %v5377_v49  ;;  %v5410_v45 = vrot.slane %v5382_v13, %v8115_v41  ;;  %v4024_v28 = vrot.slane %v8508_v32, %v7396_v25  ;;  %v4028_v5 = vrot.slane %v8508_v32, %v7402_v29  ;;  %v3192_v49 = vpop.xlane.xlu0 %3191 }
 0x379   : > { %v5411_v47 = vcombine.low %v5389_v60, %v5396_v61  ;;  %v4032_v33 = vrot.slane %v8508_v32, %v8102_v59  ;;  %v4036_v6 = vrot.slane %v8508_v32, %v8105_v10  ;;  %v4040_v8 = vrot.slane %v8508_v32, %v8108_v15 }
 0x37a   : > { %5933 = vperm.xlu0 %6679, %v5378_v0   ;;  %v5412_v38 = vcombine.low %v5403_v36, %v5410_v45  ;;  %v4044_v30 = vrot.slane %v8508_v32, %v8111_v51  ;;  %v5428_v34 = vcombine.low %v4016_v63, %v4020_v7  ;;  %v5429_v44 = vcombine.low %v4024_v28, %v4028_v5 }
 0x37b   : > { %v5419_v24 = vrot.slane %v5411_v47, %v8115_v41  ;;  %v5430_v43 = vcombine.low %v4032_v33, %v4036_v6  ;;  %v4048_v42 = vrot.slane %v8555_v14, %v7352_v55  ;;  %v4052_v3 = vrot.slane %v8555_v14, %v7358_v57 }
 0x37c   : > { %v5426_v4 = vrot.slane %v5412_v38, %v8115_v41  ;;  %v5431_v11 = vcombine.low %v4040_v8, %v4044_v30  ;;  %v5438_v1 = vrot.slane %v5428_v34, %v8115_v41  ;;  %v5445_v12 = vrot.slane %v5429_v44, %v8115_v41 }
 0x37d   : > { %v5452_v32 = vrot.slane %v5430_v43, %v8115_v41  ;;  %v4056_v62 = vrot.slane %v8555_v14, %v7396_v25  ;;  %v4060_v16 = vrot.slane %v8555_v14, %v7402_v29  ;;  %v4064_v18 = vrot.slane %v8555_v14, %v8102_v59 }
 0x37e   : > { %v5427_v31 = vcombine.low %v5419_v24, %v5426_v4  ;;  %v5459_v35 = vrot.slane %v5431_v11, %v8115_v41  ;;  %v5460_v39 = vcombine.low %v5438_v1, %v5445_v12  ;;  %v4068_v52 = vrot.slane %v8555_v14, %v8105_v10 }
 0x37f   : > { %v4072_v40 = vrot.slane %v8555_v14, %v8108_v15  ;;  %v4076_v46 = vrot.slane %v8555_v14, %v8111_v51  ;;  %v5477_v19 = vcombine.low %v4048_v42, %v4052_v3  ;;  %v5478_v48 = vcombine.low %v4056_v62, %v4060_v16 }
 0x380   : > { %5936 = vperm.xlu0 %6679, %v5427_v31   ;;  %v5461_v50 = vcombine.low %v5452_v32, %v5459_v35  ;;  %v5468_v17 = vrot.slane %v5460_v39, %v8115_v41  ;;  %v5479_v23 = vcombine.low %v4064_v18, %v4068_v52  ;;  %v8677_v20 = vadd.f32 %v8099_v22, %v3187_v37  ;;  %v3197_v37 = vpop.xlane.xlu0 %3196 }
 0x381   : > { %v5480_v26 = vcombine.low %v4072_v40, %v4076_v46  ;;  %v5487_v2 = vrot.slane %v5477_v19, %v8115_v41  ;;  %v5494_v58 = vrot.slane %v5478_v48, %v8115_v41  ;;  %v4080_v27 = vrot.slane %v8602_v9, %v7352_v55 }
 0x382   : > { %v5475_v14 = vrot.slane %v5461_v50, %v8115_v41  ;;  %v5501_v13 = vrot.slane %v5479_v23, %v8115_v41  ;;  %v4084_v60 = vrot.slane %v8602_v9, %v7358_v57  ;;  %v4088_v61 = vrot.slane %v8602_v9, %v7396_v25 }
 0x383   : > { %v5508_v36 = vrot.slane %v5480_v26, %v8115_v41  ;;  %v5509_v63 = vcombine.low %v5487_v2, %v5494_v58  ;;  %v4092_v7 = vrot.slane %v8602_v9, %v7402_v29  ;;  %v4096_v0 = vrot.slane %v8602_v9, %v8102_v59 }
 0x384   : > { %v5476_v45 = vcombine.low %v5468_v17, %v5475_v14  ;;  %v4100_v28 = vrot.slane %v8602_v9, %v8105_v10  ;;  %v4104_v5 = vrot.slane %v8602_v9, %v8108_v15  ;;  %v4108_v47 = vrot.slane %v8602_v9, %v8111_v51 }
 0x385   : > { %v5510_v33 = vcombine.low %v5501_v13, %v5508_v36  ;;  %v5517_v6 = vrot.slane %v5509_v63, %v8115_v41  ;;  %v5526_v8 = vcombine.low %v4080_v27, %v4084_v60  ;;  %v5527_v38 = vcombine.low %v4088_v61, %v4092_v7 }
 0x386   : > { %5939 = vperm.xlu0 %6679, %v5476_v45   ;;  %v5528_v30 = vcombine.low %v4096_v0, %v4100_v28  ;;  %v5529_v34 = vcombine.low %v4104_v5, %v4108_v47  ;;  %v8702_v44 = vadd.f32 %v8099_v22, %v3192_v49  ;;  %v4112_v24 = vrot.slane %v8627_v56, %v7352_v55  ;;  %v3202_v49 = vpop.xlane.xlu0 %3201 }
 0x387   : > { %v5524_v43 = vrot.slane %v5510_v33, %v8115_v41  ;;  %v5536_v42 = vrot.slane %v5526_v8, %v8115_v41  ;;  %v5543_v9 = vrot.slane %v5527_v38, %v8115_v41  ;;  %v4116_v3 = vrot.slane %v8627_v56, %v7358_v57 }
 0x388   : > { %v5550_v4 = vrot.slane %v5528_v30, %v8115_v41  ;;  %v5557_v11 = vrot.slane %v5529_v34, %v8115_v41  ;;  %v4120_v1 = vrot.slane %v8627_v56, %v7396_v25  ;;  %v4124_v12 = vrot.slane %v8627_v56, %v7402_v29 }
 0x389   : > { %v5525_v32 = vcombine.low %v5517_v6, %v5524_v43  ;;  %v5558_v62 = vcombine.low %v5536_v42, %v5543_v9  ;;  %v4128_v16 = vrot.slane %v8627_v56, %v8102_v59  ;;  %v4132_v18 = vrot.slane %v8627_v56, %v8105_v10 }
 0x38a   : > { %v5559_v31 = vcombine.low %v5550_v4, %v5557_v11  ;;  %v4136_v35 = vrot.slane %v8627_v56, %v8108_v15  ;;  %v4140_v39 = vrot.slane %v8627_v56, %v8111_v51  ;;  %v5575_v52 = vcombine.low %v4112_v24, %v4116_v3 }
 0x38b   : > { %5942 = vperm.xlu0 %6679, %v5525_v32   ;;  %v5566_v40 = vrot.slane %v5558_v62, %v8115_v41  ;;  %v5576_v46 = vcombine.low %v4120_v1, %v4124_v12  ;;  %v5577_v19 = vcombine.low %v4128_v16, %v4132_v18  ;;  %v8727_v48 = vadd.f32 %v8099_v22, %v3197_v37 }
 0x38c   : > { %v5573_v50 = vrot.slane %v5559_v31, %v8115_v41  ;;  %v5578_v17 = vcombine.low %v4136_v35, %v4140_v39  ;;  %v5585_v23 = vrot.slane %v5575_v52, %v8115_v41  ;;  %v4144_v26 = vrot.slane %v8632_v21, %v7352_v55 }
 0x38d   : > { %v5592_v2 = vrot.slane %v5576_v46, %v8115_v41  ;;  %v5599_v56 = vrot.slane %v5577_v19, %v8115_v41  ;;  %v4148_v58 = vrot.slane %v8632_v21, %v7358_v57  ;;  %v4152_v27 = vrot.slane %v8632_v21, %v7396_v25 }
 0x38e   : > { %v5574_v14 = vcombine.low %v5566_v40, %v5573_v50  ;;  %v5606_v13 = vrot.slane %v5578_v17, %v8115_v41  ;;  %v4156_v60 = vrot.slane %v8632_v21, %v7402_v29  ;;  %v4160_v61 = vrot.slane %v8632_v21, %v8102_v59 }
 0x38f   : > { %v5607_v36 = vcombine.low %v5585_v23, %v5592_v2  ;;  %v4164_v63 = vrot.slane %v8632_v21, %v8105_v10  ;;  %v4168_v7 = vrot.slane %v8632_v21, %v8108_v15  ;;  %v4172_v0 = vrot.slane %v8632_v21, %v8111_v51 }
 0x390   : > { %5945 = vperm.xlu0 %6679, %v5574_v14   ;;  %v5608_v45 = vcombine.low %v5599_v56, %v5606_v13  ;;  %v5624_v28 = vcombine.low %v4144_v26, %v4148_v58  ;;  %v5625_v5 = vcombine.low %v4152_v27, %v4156_v60  ;;  %v8751_v47 = vadd.f32 %v8099_v22, %v3202_v49 }
 0x391   : > { %v5615_v33 = vrot.slane %v5607_v36, %v8115_v41  ;;  %v5626_v6 = vcombine.low %v4160_v61, %v4164_v63  ;;  %v5627_v8 = vcombine.low %v4168_v7, %v4172_v0  ;;  %v4176_v38 = vrot.slane %v8677_v20, %v7352_v55 }
 0x392   : > { %v5622_v30 = vrot.slane %v5608_v45, %v8115_v41  ;;  %v5634_v34 = vrot.slane %v5624_v28, %v8115_v41  ;;  %v5641_v21 = vrot.slane %v5625_v5, %v8115_v41  ;;  %v4180_v24 = vrot.slane %v8677_v20, %v7358_v57 }
 0x393   : > { %v5648_v43 = vrot.slane %v5626_v6, %v8115_v41  ;;  %v5655_v22 = vrot.slane %v5627_v8, %v8115_v41  ;;  %v4184_v42 = vrot.slane %v8677_v20, %v7396_v25  ;;  %v4188_v9 = vrot.slane %v8677_v20, %v7402_v29 }
 0x394   : > { %v5623_v3 = vcombine.low %v5615_v33, %v5622_v30  ;;  %v5656_v37 = vcombine.low %v5634_v34, %v5641_v21  ;;  %v4192_v4 = vrot.slane %v8677_v20, %v8102_v59  ;;  %v4196_v11 = vrot.slane %v8677_v20, %v8105_v10 }
 0x395   : > { %v5657_v1 = vcombine.low %v5648_v43, %v5655_v22  ;;  %v4200_v12 = vrot.slane %v8677_v20, %v8108_v15  ;;  %v4204_v32 = vrot.slane %v8677_v20, %v8111_v51  ;;  %v5673_v62 = vcombine.low %v4176_v38, %v4180_v24 }
 0x396   : > { %5948 = vperm.xlu0 %6679, %v5623_v3   ;;  %v5664_v16 = vrot.slane %v5656_v37, %v8115_v41  ;;  %v5674_v18 = vcombine.low %v4184_v42, %v4188_v9  ;;  %v5675_v31 = vcombine.low %v4192_v4, %v4196_v11  ;;  %v4208_v35 = vrot.slane %v8702_v44, %v7352_v55 }
 0x397   : > { %v5671_v39 = vrot.slane %v5657_v1, %v8115_v41  ;;  %v5676_v52 = vcombine.low %v4200_v12, %v4204_v32  ;;  %v5683_v40 = vrot.slane %v5673_v62, %v8115_v41  ;;  %v4212_v46 = vrot.slane %v8702_v44, %v7358_v57 }
 0x398   : > { %v5690_v19 = vrot.slane %v5674_v18, %v8115_v41  ;;  %v5697_v20 = vrot.slane %v5675_v31, %v8115_v41  ;;  %v4216_v50 = vrot.slane %v8702_v44, %v7396_v25  ;;  %v4220_v17 = vrot.slane %v8702_v44, %v7402_v29 }
 0x399   : > { %v5672_v23 = vcombine.low %v5664_v16, %v5671_v39  ;;  %v5704_v26 = vrot.slane %v5676_v52, %v8115_v41  ;;  %v4224_v2 = vrot.slane %v8702_v44, %v8102_v59  ;;  %v4228_v56 = vrot.slane %v8702_v44, %v8105_v10 }
 0x39a   : > { %v5705_v58 = vcombine.low %v5683_v40, %v5690_v19  ;;  %v4232_v27 = vrot.slane %v8702_v44, %v8108_v15  ;;  %v4236_v49 = vrot.slane %v8702_v44, %v8111_v51  ;;  %v5722_v14 = vcombine.low %v4208_v35, %v4212_v46 }
 0x39b   : > { %5951 = vperm.xlu0 %6679, %v5672_v23   ;;  %v5706_v13 = vcombine.low %v5697_v20, %v5704_v26  ;;  %v5723_v60 = vcombine.low %v4216_v50, %v4220_v17  ;;  %v5724_v61 = vcombine.low %v4224_v2, %v4228_v56  ;;  %v4240_v36 = vrot.slane %v8727_v48, %v7352_v55 }
 0x39c   : > { %v5713_v63 = vrot.slane %v5705_v58, %v8115_v41  ;;  %v5725_v7 = vcombine.low %v4232_v27, %v4236_v49  ;;  %v5732_v0 = vrot.slane %v5722_v14, %v8115_v41  ;;  %v4244_v45 = vrot.slane %v8727_v48, %v7358_v57  ;;  %v5874_v27 = vpop.permute.xlu1 %5873 }
 0x39d   : > { %v5720_v28 = vrot.slane %v5706_v13, %v8115_v41  ;;  %v5739_v44 = vrot.slane %v5723_v60, %v8115_v41  ;;  %v5746_v5 = vrot.slane %v5724_v61, %v8115_v41  ;;  %v4248_v33 = vrot.slane %v8727_v48, %v7396_v25  ;;  %v5871_v60 = vpop.permute.xlu0 %5870 }
 0x39e   : > { %v5753_v6 = vrot.slane %v5725_v7, %v8115_v41  ;;  %v4252_v8 = vrot.slane %v8727_v48, %v7402_v29  ;;  %v4256_v38 = vrot.slane %v8727_v48, %v8102_v59  ;;  %v4260_v30 = vrot.slane %v8727_v48, %v8105_v10 }
 0x39f   : > { %v5721_v34 = vcombine.low %v5713_v63, %v5720_v28  ;;  %v5754_v21 = vcombine.low %v5732_v0, %v5739_v44  ;;  %v4264_v24 = vrot.slane %v8727_v48, %v8108_v15  ;;  %v4268_v43 = vrot.slane %v8727_v48, %v8111_v51 }
 0x3a0   : > { %v5755_v22 = vcombine.low %v5746_v5, %v5753_v6  ;;  %v5771_v42 = vcombine.low %v4240_v36, %v4244_v45  ;;  %v5772_v9 = vcombine.low %v4248_v33, %v4252_v8  ;;  %v5773_v3 = vcombine.low %v4256_v38, %v4260_v30  ;;  %v5877_v49 = vpop.permute.xlu1 %5876 }
 0x3a1   : > { %5954 = vperm.xlu0 %6679, %v5721_v34   ;;  %v5762_v37 = vrot.slane %v5754_v21, %v8115_v41  ;;  %v5774_v4 = vcombine.low %v4264_v24, %v4268_v43  ;;  %v4272_v11 = vrot.slane %v8751_v47, %v7352_v55  ;;  %v4276_v1 = vrot.slane %v8751_v47, %v7358_v57 }
 0x3a2   : > { %v5769_v12 = vrot.slane %v5755_v22, %v8115_v41  ;;  %v5781_v32 = vrot.slane %v5771_v42, %v8115_v41  ;;  %v5788_v48 = vrot.slane %v5772_v9, %v8115_v41  ;;  %v5795_v62 = vrot.slane %v5773_v3, %v8115_v41 }
 0x3a3   : > { %v5802_v16 = vrot.slane %v5774_v4, %v8115_v41  ;;  %v4280_v18 = vrot.slane %v8751_v47, %v7396_v25  ;;  %v4284_v31 = vrot.slane %v8751_v47, %v7402_v29  ;;  %v4288_v55 = vrot.slane %v8751_v47, %v8102_v59 }
 0x3a4   : > { %v5770_v57 = vcombine.low %v5762_v37, %v5769_v12  ;;  %v5803_v35 = vcombine.low %v5781_v32, %v5788_v48  ;;  %v4292_v39 = vrot.slane %v8751_v47, %v8105_v10  ;;  %v4296_v52 = vrot.slane %v8751_v47, %v8108_v15  ;;  %v5880_v14 = vpop.permute.xlu1 %5879 }
 0x3a5   : > { %v5804_v40 = vcombine.low %v5795_v62, %v5802_v16  ;;  %v4300_v46 = vrot.slane %v8751_v47, %v8111_v51  ;;  %v5820_v19 = vcombine.low %v4272_v11, %v4276_v1  ;;  %v5821_v25 = vcombine.low %v4280_v18, %v4284_v31 }
 0x3a6   : > { %5957 = vperm.xlu0 %6679, %v5770_v57   ;;  %v5811_v29 = vrot.slane %v5803_v35, %v8115_v41  ;;  %v5822_v20 = vcombine.low %v4288_v55, %v4292_v39  ;;  %v8878_v21 = vand.u32 127, %v349_v53 }
 0x3a7   : > { %v5818_v59 = vrot.slane %v5804_v40, %v8115_v41  ;;  %v5823_v50 = vcombine.low %v4296_v52, %v4300_v46  ;;  %v5830_v17 = vrot.slane %v5820_v19, %v8115_v41  ;;  %v5837_v10 = vrot.slane %v5821_v25, %v8115_v41 }
 0x3a8   : > { %v5844_v23 = vrot.slane %v5822_v20, %v8115_v41  ;;  %v5883_v13 = vpop.permute.xlu1 %5882  ;;  %v5971_v43 = vadd.s32 4294967288, %v8878_v21  ;;  %v5978_v22 = vadd.s32 4294967280, %v8878_v21  ;;  %v5985_v42 = vadd.s32 4294967272, %v8878_v21 }
 0x3a9   : > { %v5819_v15 = vcombine.low %v5811_v29, %v5818_v59  ;;  %v5851_v26 = vrot.slane %v5823_v50, %v8115_v41  ;;  %v5852_v2 = vcombine.low %v5830_v17, %v5837_v10  ;;  %v5992_v9 = vadd.s32 4294967264, %v8878_v21 }
 0x3aa   : > { %v5974_v37 = vsub.s32 %v5971_v43, %v7349_v54  ;;  %v5999_v4 = vadd.s32 4294967256, %v8878_v21  ;;  %v5981_v1 = vsub.s32 %v5978_v22, %v7349_v54  ;;  %v6006_v12 = vadd.s32 4294967248, %v8878_v21 }
 0x3ab   : > { %5960 = vperm.xlu0 %6679, %v5819_v15   ;;  %v5853_v51 = vcombine.low %v5844_v23, %v5851_v26  ;;  %v5860_v47 = vrot.slane %v5852_v2, %v8115_v41  ;;  %v5969_v32 = vsub.s32 %v8878_v21, %v7349_v54  ;;  %v5988_v48 = vsub.s32 %v5985_v42, %v7349_v54 }
 0x3ac   : > { %v5886_v61 = vpop.permute.xlu1 %5885  ;;  %v8896_v62 = vsub.s32 %v5992_v9, %v7349_v54  ;;  %v5975_v16 = vrot.slane %v5874_v27, %v5974_v37  ;;  %v8899_v18 = vsub.s32 %v5999_v4, %v7349_v54  ;;  %v6013_v31 = vadd.s32 4294967240, %v8878_v21 }
 0x3ad   : > { %v5867_v56 = vrot.slane %v5853_v51, %v8115_v41  ;;  %v5982_v55 = vrot.slane %v5877_v49, %v5981_v1  ;;  %v8903_v57 = vsub.s32 %v6006_v12, %v7349_v54  ;;  %v5970_v52 = vrot.slane %v5871_v60, %v5969_v32 }
 0x3ae   : > { %v5989_v40 = vrot.slane %v5880_v14, %v5988_v48  ;;  %v6020_v46 = vadd.s32 4294967232, %v8878_v21  ;;  %v5996_v19 = vrot.slane %v5883_v13, %v8896_v62  ;;  %v6003_v29 = vrot.slane %v5886_v61, %v8899_v18 }
 0x3af   : > { %v5868_v58 = vcombine.low %v5860_v47, %v5867_v56  ;;  %v5977_v25 = vsel %vm5976_vm0, %v5975_v16, %v5970_v52  ;;  %v6016_v20 = vsub.s32 %v6013_v31, %v7349_v54  ;;  %v6027_v23 = vadd.s32 4294967224, %v8878_v21 }
 0x3b0   : > { %v8851_v63 = vpop.permute.xlu1 %5888  ;;  %v5984_v59 = vsel %vm5983_vm1, %v5982_v55, %v5977_v25  ;;  %v6023_v10 = vsub.s32 %v6020_v46, %v7349_v54  ;;  %v6034_v26 = vadd.s32 4294967216, %v8878_v21  ;;  %v6041_v49 = vadd.s32 4294967208, %v8878_v21 }
 0x3b1   : > { %5963 = vperm.xlu0 %6679, %v5868_v58   ;;  %v6010_v50 = vrot.slane %v8851_v63, %v8903_v57  ;;  %v5991_v17 = vsel %vm5990_vm2, %v5989_v40, %v5984_v59  ;;  %v6030_v60 = vsub.s32 %v6027_v23, %v7349_v54  ;;  %v6048_v43 = vadd.s32 4294967200, %v8878_v21 }
 0x3b2   : > { %v5998_v15 = vsel %vm5997_vm3, %v5996_v19, %v5991_v17  ;;  %v6069_v12 = vadd.s32 4294967176, %v8878_v21 }
 0x3b3   : > { %v6005_v47 = vsel %vm6004_vm4, %v6003_v29, %v5998_v15 }
 0x3b4   : > { %v8855_v0 = vpop.permute.xlu1 %5891  ;;  %v6012_v27 = vsel %vm6011_vm5, %v6010_v50, %v6005_v47 }
 0x3b5   : > { %v6017_v56 = vrot.slane %v8855_v0, %v6016_v20  ;;  %v6037_v0 = vsub.s32 %v6034_v26, %v7349_v54 }
 0x3b7   : > { %v6019_v42 = vsel %vm6018_vm6, %v6017_v56, %v6012_v27 }
 0x3b8   : > { %v8859_v28 = vpop.permute.xlu1 %5894 }
 0x3b9   : > { %v6024_v13 = vrot.slane %v8859_v28, %v6023_v10  ;;  %v6055_v28 = vadd.s32 4294967192, %v8878_v21 }
 0x3bb   : > { %v6058_v31 = vsub.s32 %v6055_v28, %v7349_v54 }
 0x3bc   : > { %v8863_v5 = vpop.permute.xlu1 %5897 }
 0x3c0   : > { %v8867_v6 = vpop.permute.xlu1 %5900 }
 0x3c4   : > { %v8871_v38 = vpop.permute.xlu1 %5903 }
 0x3c9   : > { %v8875_v34 = vpop.permute.xlu1 %5918 }
 0x3ca   : > { %v6079_v61 = vrot.slane %v8875_v34, %v5969_v32 }
 0x3ce   : > { %v5922_v3 = vpop.permute.xlu1 %5921 }
 0x3cf   : > { %v6083_v58 = vrot.slane %v5922_v3, %v5974_v37  ;;  %v6062_v37 = vadd.s32 4294967184, %v8878_v21  ;;  %v6038_v21 = vrot.slane %v8867_v6, %v6037_v0 }
 0x3d4   : > { %v8905_v35 = vpop.permute.xlu1 %5906 }
 0x3d9   : > { %v8849_v36 = vpop.permute.xlu0 %5924 }
 0x3da   : > { %v6088_v14 = vrot.slane %v8849_v36, %v5981_v1  ;;  %v6084_v36 = vsel %vm5976_vm0, %v6083_v58, %v6079_v61 }
 0x3dc   : > { %v6089_v3 = vsel %vm5983_vm1, %v6088_v14, %v6084_v36 }
 0x3df   : > { %v8922_v2 = vpop.permute.xlu1 %5909 }
 0x3e4   : > { %v8853_v7 = vpop.permute.xlu0 %5927 }
 0x3e5   : > { %v6093_v63 = vrot.slane %v8853_v7, %v5988_v48  ;;  %v6044_v7 = vsub.s32 %v6041_v49, %v7349_v54  ;;  %v6051_v48 = vsub.s32 %v6048_v43, %v7349_v54 }
 0x3e7   : > { %v6094_v1 = vsel %vm5990_vm2, %v6093_v63, %v6089_v3  ;;  %v6052_v25 = vrot.slane %v8905_v35, %v6051_v48 }
 0x3e9   : > { %v5913_v4 = vpop.permute.xlu1 %5912 }
 0x3ef   : > { %v8857_v45 = vpop.permute.xlu0 %5930 }
 0x3f0   : > { %v6098_v22 = vrot.slane %v8857_v45, %v8896_v62 }
 0x3f2   : > { %v6099_v62 = vsel %vm5997_vm3, %v6098_v22, %v6094_v1 }
 0x3f9   : > { %v8861_v44 = vpop.permute.xlu0 %5933 }
 0x3fa   : > { %v6103_v9 = vrot.slane %v8861_v44, %v8899_v18  ;;  %v6026_v44 = vsel %vm6025_vm7, %v6024_v13, %v6019_v42  ;;  %v6031_v18 = vrot.slane %v8863_v5, %v6030_v60  ;;  %v6072_v5 = vsub.s32 %v6069_v12, %v7349_v54 }
 0x3ff   : > { %v8865_v33 = vpop.permute.xlu0 %5936 }
 0x400   : > { %v6108_v45 = vrot.slane %v8865_v33, %v8903_v57  ;;  %v6104_v33 = vsel %vm6004_vm4, %v6103_v9, %v6099_v62 }
 0x402   : > { %v6109_v57 = vsel %vm6011_vm5, %v6108_v45, %v6104_v33 }
 0x405   : > { %v8869_v8 = vpop.permute.xlu0 %5939 }
 0x406   : > { %v6113_v32 = vrot.slane %v8869_v8, %v6016_v20  ;;  %v6065_v8 = vsub.s32 %v6062_v37, %v7349_v54 }
 0x408   : > { %v6114_v46 = vsel %vm6018_vm6, %v6113_v32, %v6109_v57 }
 0x40a   : > { %v8873_v30 = vpop.permute.xlu0 %5942 }
 0x40b   : > { %v6118_v16 = vrot.slane %v8873_v30, %v6023_v10  ;;  %v6045_v30 = vrot.slane %v8871_v38, %v6044_v7  ;;  %v6059_v38 = vrot.slane %v8922_v2, %v6058_v31 }
 0x40d   : > { %v6119_v6 = vsel %vm6025_vm7, %v6118_v16, %v6114_v46 }
 0x40f   : > { %v8880_v24 = vpop.permute.xlu0 %5945 }
 0x410   : > { %v6123_v55 = vrot.slane %v8880_v24, %v6030_v60  ;;  %v5916_v24 = vpop.permute.xlu1 %5915 }
 0x411   : > { %v6073_v10 = vrot.slane %v5916_v24, %v6072_v5 }
 0x412   : > { %v6124_v54 = vsel %vm6032_vm8, %v6123_v55, %v6119_v6 }
 0x415   : > { %v8888_v11 = vpop.permute.xlu0 %5948 }
 0x416   : > { %v6128_v52 = vrot.slane %v8888_v11, %v6037_v0  ;;  %v6033_v11 = vsel %vm6032_vm8, %v6031_v18, %v6026_v44 }
 0x417   : > { %v6040_v59 = vsel %vm6039_vm9, %v6038_v21, %v6033_v11 }
 0x418   : > { %v6129_v35 = vsel %vm6039_vm9, %v6128_v52, %v6124_v54  ;;  %v6047_v17 = vsel %vm6046_vm10, %v6045_v30, %v6040_v59 }
 0x419   : > { %v6054_v15 = vsel %vm6053_vm11, %v6052_v25, %v6047_v17 }
 0x41a   : > { %v8907_v39 = vpop.permute.xlu0 %5951 }
 0x41b   : > { %v6133_v19 = vrot.slane %v8907_v39, %v6044_v7  ;;  %v6066_v39 = vrot.slane %v5913_v4, %v6065_v8 }
 0x41d   : > { %v6134_v23 = vsel %vm6046_vm10, %v6133_v19, %v6129_v35 }
 0x420   : > { %v8924_v51 = vpop.permute.xlu0 %5954 }
 0x421   : > { %v6138_v29 = vrot.slane %v8924_v51, %v6051_v48  ;;  %v6061_v51 = vsel %vm6060_vm12, %v6059_v38, %v6054_v15 }
 0x422   : > { %v6068_v58 = vsel %vm6067_vm13, %v6066_v39, %v6061_v51 }
 0x423   : > { %v6139_v26 = vsel %vm6053_vm11, %v6138_v29, %v6134_v23  ;;  %v6075_v49 = vsel %vm6074_vm14, %v6073_v10, %v6068_v58 }
 0x425   : > { %v5958_v34 = vpop.permute.xlu0 %5957 }
 0x426   : > { %v6143_v20 = vrot.slane %v5958_v34, %v6058_v31 }
 0x428   : > { %v6144_v47 = vsel %vm6060_vm12, %v6143_v20, %v6139_v26 }
 0x42a   : > { %v5961_v40 = vpop.permute.xlu0 %5960 }
 0x42b   : > { %v6148_v50 = vrot.slane %v5961_v40, %v6065_v8 }
 0x42d   : > { %v6149_v27 = vsel %vm6067_vm13, %v6148_v50, %v6144_v47 }
 0x430   : > { %v5964_v2 = vpop.permute.xlu0 %5963 }
 0x431   : > { %v6153_v56 = vrot.slane %v5964_v2, %v6072_v5 }
 0x433   : > { %v6154_v14 = vsel %vm6074_vm14, %v6153_v56, %v6149_v27 }
 0x434   : > { %v6155_v13 = vcombine.low %v6075_v49, %v6154_v14 }
 0x436   : > { %v6162_v60 = vrot.slane %v6155_v13, %v8115_v41 }
 0x438   : > { %v6169_v61 = vrot.slane %v6162_v60, %v8115_v41 }
 0x43a   : > { %6175 = vst.msk [vmem:[%s280_s15] sm:$0x3] %vm6173_vm15, %v6169_v61 }
 0x43b PF: > { %s19_s26 = sadd.s32 1, %s6942_s26  }
 0x43c   : > { %p16_p5 = scmp.ge.s32.totalorder %s19_s26, 4  }
 0x43e   :  { %18 = sbr.rel (!%p16_p5) target bundleno = 3 (0x3), region = 78 }

</bundles_post_ra>
